<compile_context>
chip_gen: v5e
topology: v5e:2x2
jax: 0.10.0
libtpu: 0.0.40
codegen_flags: <defaults>
</compile_context>

<pallas_src>
import functools

import jax
import jax.numpy as jnp
from jax import lax
from jax.experimental import pallas as pl
from jax.experimental.pallas import tpu as pltpu

COMPUTE_DTYPE = jnp.bfloat16   # activations / weights at kernel boundaries


def _pick_chunk_rows(h):
    for cand in (32, 16, 8, 4, 2):
        if h % cand == 0:
            return cand
    return h


# ----------------------------------------------------------------------------
# Pallas kernels
# ----------------------------------------------------------------------------
def _conv_block_kernel(x_ref, w1_ref, b1_ref, w2_ref, b2_ref,
                       w3_ref, b3_ref, w4_ref, b4_ref,
                       o_ref, sa_ref, sb_ref, tap_ref, pool_ref,
                       *, height, width, chunk_rows):
    """Fused conv, conv+ReLU, conv, conv+ReLU, 2x2 maxpool for one sample.

    Flat padded layout: a pixel (y, x) of an HxW map lives at lane
    (y + 2) * (W + 2) + (x + 1) of a (C, (H + 4) * (W + 2)) slab; the two guard
    rows at each end plus the left/right pad columns are zero, so every 3x3 tap
    is a pure static lane-offset slice of the slab.

    x_ref : (Cin, (H+4)*(W+2))       bf16  block input, flat-padded
    wK_ref: (Ch, 9*CinK)             bf16  prepacked weights, col = k*Cin + ci
    bK_ref: (Ch, 1)                  f32
    o_ref : (Ch, (H/2+4)*(W/2+2))    bf16  pooled output, flat-padded
    sa/sb : (Ch, (H+4)*(W+2))        bf16  ping-pong activation scratch
    tap   : (9*max_cin, R*(W+2))     bf16  stacked-tap operand for one chunk
    pool  : (Ch*R/2, W+2)            bf16  row-pair maxes for one chunk
    """
    H, W, R = height, width, chunk_rows
    Wb = W + 2
    L = R * Wb
    Ch = sa_ref.shape[0]
    Wp2 = W // 2
    Wb2 = Wp2 + 2

    # Zero only the guard / top-bottom pad rows of the ping-pong buffers (the
    # interiors are fully overwritten; interior pad columns come from the lane
    # mask below).  No full-buffer zero fills.
    guard = jnp.zeros((Ch, 2 * Wb), sa_ref.dtype)
    for s in (sa_ref, sb_ref):
        s[:, 0:2 * Wb] = guard
        s[:, (H + 2) * Wb:(H + 4) * Wb] = guard
    # The pooled output block must carry a clean zero border for the next block.
    o_ref[...] = jnp.zeros_like(o_ref)

    # Lane mask that zeroes the left/right pad columns of every row of a chunk.
    xp_col = jax.lax.broadcasted_iota(jnp.int32, (1, L), 1) % Wb
    col_ok = jnp.logical_and(xp_col >= 1, xp_col <= W)

    # Exact 0/1 selection matrices for the stride-2 column pooling.
    sel_r = jax.lax.broadcasted_iota(jnp.int32, (Wb, Wp2), 0)
    sel_c = jax.lax.broadcasted_iota(jnp.int32, (Wb, Wp2), 1)
    s_even = (sel_r == 2 * sel_c + 1).astype(COMPUTE_DTYPE)
    s_odd = (sel_r == 2 * sel_c + 2).astype(COMPUTE_DTYPE)

    def conv_chunk(src_ref, w_ref, b_ref, r0, relu, mask):
        # 3x3 "same" conv for rows [r0, r0+R): build the stacked (9*Cin, L) tap
        # operand from nine static lane-offset slices, then ONE bf16 dot with
        # f32 accumulation.  The accumulator is only (Ch, R*(W+2)).
        cin = w_ref.shape[1] // 9
        base = (r0 + 2) * Wb
        for k in range(9):
            dy, dx = divmod(k, 3)
            off = (dy - 1) * Wb + (dx - 1)
            tap_ref[k * cin:(k + 1) * cin, :] = (
                src_ref[:, base + off:base + off + L])
        acc = jnp.dot(w_ref[...], tap_ref[0:9 * cin, :],
                      preferred_element_type=jnp.float32)
        acc = acc + b_ref[...]
        if relu:
            acc = jnp.maximum(acc, 0.0)
        if mask:
            acc = jnp.where(col_ok, acc, 0.0)
        return acc                                        # (Ch, L) f32

    def run_conv(src_ref, dst_ref, w_ref, b_ref, relu):
        for r0 in range(0, H, R):
            y = conv_chunk(src_ref, w_ref, b_ref, r0, relu, mask=True)
            dst_ref[:, (r0 + 2) * Wb:(r0 + 2) * Wb + L] = y.astype(dst_ref.dtype)

    run_conv(x_ref, sa_ref, w1_ref, b1_ref, relu=False)    # conv1
    run_conv(sa_ref, sb_ref, w2_ref, b2_ref, relu=True)    # conv2 + ReLU
    run_conv(sb_ref, sa_ref, w3_ref, b3_ref, relu=False)   # conv3

    # conv4 + ReLU fused with the 2x2 stride-2 max-pool, chunk by chunk.
    for r0 in range(0, H, R):
        y4 = conv_chunk(sa_ref, w4_ref, b4_ref, r0, relu=True, mask=False)
        y4 = y4.astype(COMPUTE_DTYPE)
        for t in range(R // 2):
            a = y4[:, (2 * t) * Wb:(2 * t + 1) * Wb]
            b = y4[:, (2 * t + 1) * Wb:(2 * t + 2) * Wb]
            pool_ref[t * Ch:(t + 1) * Ch, :] = jnp.maximum(a, b)
        rm = pool_ref[...]                                 # (Ch*R/2, Wb) bf16
        pooled = jnp.maximum(
            jnp.dot(rm, s_even, preferred_element_type=jnp.float32),
            jnp.dot(rm, s_odd, preferred_element_type=jnp.float32),
        ).astype(o_ref.dtype)                              # (Ch*R/2, W/2)
        for t in range(R // 2):
            yy = r0 // 2 + t
            o_ref[:, (yy + 2) * Wb2 + 1:(yy + 2) * Wb2 + 1 + Wp2] = (
                pooled[t * Ch:(t + 1) * Ch, :])


def _linear_kernel(x_ref, w_ref, b_ref, o_ref):
    # Reduction-gridded matmul: o_ref (resident across the K axis) accumulates.
    @pl.when(pl.program_id(0) == 0)
    def _():
        o_ref[...] = jnp.broadcast_to(b_ref[...], o_ref.shape)

    o_ref[...] += jnp.dot(x_ref[...], w_ref[...],
                          preferred_element_type=jnp.float32)


# ----------------------------------------------------------------------------
# Wrappers
# ----------------------------------------------------------------------------
def conv_block(x_flat, ws, bs, *, height, width):
    """One SpideyDroneNet block on flat-padded channels-first activations.

    x_flat: (N, Cin, (H+4)*(W+2)) bf16 -> (N, Ch, (H/2+4)*(W/2+2)) bf16.
    """
    H, W = height, width
    assert H % 2 == 0 and W % 2 == 0
    N, Cin, Lp = x_flat.shape
    assert Lp == (H + 4) * (W + 2)
    Ch = ws[0].shape[0]
    Wb = W + 2
    R = _pick_chunk_rows(H)
    assert H % R == 0 and R % 2 == 0
    Lp_out = (H // 2 + 4) * (W // 2 + 2)
    cin_max = max(Cin, Ch)

    in_specs = [pl.BlockSpec((None, Cin, Lp), lambda n: (n, 0, 0))]
    operands = [x_flat]
    for w, b in zip(ws, bs):
        in_specs.append(pl.BlockSpec(w.shape, lambda n: (0, 0)))
        in_specs.append(pl.BlockSpec(b.shape, lambda n: (0, 0)))
        operands += [w, b]

    # Explicit VMEM budget: double-buffered in/out blocks + all scratch + weights.
    logical_bytes = (
        2 * (Cin * Lp + Ch * Lp_out) * 2
        + 2 * Ch * Lp * 2
        + 9 * cin_max * R * Wb * 2
        + Ch * (R // 2) * Wb * 2
        + sum(int(w.size) * 2 + int(b.size) * 4 for w, b in zip(ws, bs)))
    vmem_limit = int(min(max(4 * logical_bytes, 8 << 20), 48 << 20))

    kernel = functools.partial(_conv_block_kernel,
                               height=H, width=W, chunk_rows=R)
    return pl.pallas_call(
        kernel,
        out_shape=jax.ShapeDtypeStruct((N, Ch, Lp_out), COMPUTE_DTYPE),
        grid=(N,),
        in_specs=in_specs,
        out_specs=pl.BlockSpec((None, Ch, Lp_out), lambda n: (n, 0, 0)),
        scratch_shapes=[
            pltpu.VMEM((Ch, Lp), COMPUTE_DTYPE),                 # ping
            pltpu.VMEM((Ch, Lp), COMPUTE_DTYPE),                 # pong
            pltpu.VMEM((9 * cin_max, R * Wb), COMPUTE_DTYPE),    # stacked taps
            pltpu.VMEM((Ch * (R // 2), Wb), COMPUTE_DTYPE),      # pool row maxes
        ],
        compiler_params=pltpu.CompilerParams(
            dimension_semantics=("parallel",),
            vmem_limit_bytes=vmem_limit),
    )(*operands)


def linear(x_2d, w_fo, b_1o):
    """x (N, F) bf16 @ w (F, O) bf16 + b (1, O) f32 -> (N, O) f32."""
    N, F = x_2d.shape
    O = w_fo.shape[1]
    tk = F
    for cand in (4096, 2048, 1024, 512, 256, 128):
        if F % cand == 0:
            tk = cand
            break

    return pl.pallas_call(
        _linear_kernel,
        out_shape=jax.ShapeDtypeStruct((N, O), jnp.float32),
        grid=(F // tk,),
        in_specs=[pl.BlockSpec((N, tk), lambda k: (0, k)),
                  pl.BlockSpec((tk, O), lambda k: (k, 0)),
                  pl.BlockSpec((1, O), lambda k: (0, 0))],
        out_specs=pl.BlockSpec((N, O), lambda k: (0, 0)),
        compiler_params=pltpu.CompilerParams(
            dimension_semantics=("arbitrary",)),
    )(x_2d.astype(COMPUTE_DTYPE), w_fo, b_1o)


# ----------------------------------------------------------------------------
# One-time weight preparation (hoisted out of the forward pass)
# ----------------------------------------------------------------------------
def prepare_params(params, hidden, hw):
    """Repack conv weights as (Ch, 9*Cin) and fold NCHW-flatten + the padded
    activation layout into the FC weight.  Call once, outside the forward."""
    prepped = {}
    for blk in ("b1", "b2"):
        for i in range(1, 5):
            w = params[f"{blk}c{i}_w"]          # (Cout, Cin, 3, 3) OIHW
            b = params[f"{blk}c{i}_b"]
            cout, cin = w.shape[0], w.shape[1]
            w2 = jnp.transpose(w, (0, 2, 3, 1)).reshape(cout, 9 * cin)
            prepped[f"{blk}c{i}_w"] = w2.astype(COMPUTE_DTYPE)
            prepped[f"{blk}c{i}_b"] = b.reshape(cout, 1).astype(jnp.float32)

    H4 = W4 = hw // 4
    O = params["fc_w"].shape[0]
    wf = params["fc_w"].reshape(O, hidden, H4, W4)          # NCHW flatten order
    wf = jnp.pad(wf, ((0, 0), (0, 0), (2, 2), (1, 1)))      # flat-padded layout
    wf = wf.reshape(O, hidden * (H4 + 4) * (W4 + 2))
    prepped["fc_w"] = jnp.transpose(wf).astype(COMPUTE_DTYPE)   # (F', O)
    prepped["fc_b"] = params["fc_b"].reshape(1, O).astype(jnp.float32)
    return prepped


# ----------------------------------------------------------------------------
# SpideyDroneNet forward
# ----------------------------------------------------------------------------
def spidey_forward(x_nchw, prepped):
    N, _, H, W = x_nchw.shape
    # Flat-padded channels-first input for block 1 (one-time pad of the input).
    xp = jnp.pad(x_nchw, ((0, 0), (0, 0), (2, 2), (1, 1)))
    a = xp.reshape(N, xp.shape[1], (H + 4) * (W + 2)).astype(COMPUTE_DTYPE)

    h, w = H, W
    for blk in ("b1", "b2"):
        ws = [prepped[f"{blk}c{i}_w"] for i in range(1, 5)]
        bs = [prepped[f"{blk}c{i}_b"] for i in range(1, 5)]
        a = conv_block(a, ws, bs, height=h, width=w)
        h //= 2
        w //= 2

    flat = a.reshape(N, -1)                  # (N, Ch * (H/4+4)*(W/4+2)), bf16
    return linear(flat, prepped["fc_w"], prepped["fc_b"])


# ----------------------------------------------------------------------------
# Deterministic parameters + mixed-precision-matched reference for validation
# ----------------------------------------------------------------------------
def make_params(key, in_ch, hidden, out_dim, hw):
    # NOTE: the PyTorch module hardcodes in_features = hidden*64*64 (a 256x256
    # input); for other spatial sizes we use the equivalent hidden*(H//4)*(W//4).
    flat = hidden * (hw // 4) * (hw // 4)
    names_shapes = []
    cins = [in_ch, hidden, hidden, hidden]
    for i in range(4):
        names_shapes.append((f"b1c{i+1}_w", (hidden, cins[i], 3, 3)))
        names_shapes.append((f"b1c{i+1}_b", (hidden,)))
    for i in range(4):
        names_shapes.append((f"b2c{i+1}_w", (hidden, hidden, 3, 3)))
        names_shapes.append((f"b2c{i+1}_b", (hidden,)))
    names_shapes.append(("fc_w", (out_dim, flat)))
    names_shapes.append(("fc_b", (out_dim,)))

    params = {}
    keys = jax.random.split(key, len(names_shapes))
    for k, (name, shape) in zip(keys, names_shapes):
        params[name] = 0.1 * jax.random.normal(k, shape, dtype=jnp.float32)
    return params


def _ref_conv(x, w, b, relu):
    y = lax.conv_general_dilated(
        x.astype(COMPUTE_DTYPE), w.astype(COMPUTE_DTYPE), (1, 1), ((1, 1), (1, 1)),
        dimension_numbers=("NCHW", "OIHW", "NCHW"),
        preferred_element_type=jnp.float32)
    y = y + b.reshape(1, -1, 1, 1)
    return jnp.maximum(y, 0.0) if relu else y


def _ref_pool(x):
    return lax.reduce_window(x, -jnp.inf, lax.max,
                             (1, 1, 2, 2), (1, 1, 2, 2), "VALID")


def ref_forward(x, p):
    # Mirrors the kernels' precision policy: bf16 matmul operands, f32
    # accumulation, f32 bias/ReLU epilogues, bf16 activations between layers.
    x = _ref_conv(x, p["b1c1_w"], p["b1c1_b"], False)
    x = _ref_conv(x, p["b1c2_w"], p["b1c2_b"], True)
    x = _ref_conv(x, p["b1c3_w"], p["b1c3_b"], False)
    x = _ref_conv(x, p["b1c4_w"], p["b1c4_b"], True)
    x = _ref_pool(x)
    x = _ref_conv(x, p["b2c1_w"], p["b2c1_b"], False)
    x = _ref_conv(x, p["b2c2_w"], p["b2c2_b"], True)
    x = _ref_conv(x, p["b2c3_w"], p["b2c3_b"], False)
    x = _ref_conv(x, p["b2c4_w"], p["b2c4_b"], True)
    x = _ref_pool(x)
    flat = x.reshape(x.shape[0], -1)                         # NCHW flatten order
    return (jnp.dot(flat.astype(COMPUTE_DTYPE),
                    p["fc_w"].T.astype(COMPUTE_DTYPE),
                    preferred_element_type=jnp.float32)
            + p["fc_b"])


# ----------------------------------------------------------------------------
if __name__ == "__main__":
    N, C_IN, HW = 2, 4, 16
    HIDDEN, OUT = 8, 10

    key = jax.random.PRNGKey(0)
    kx, kp = jax.random.split(key)
    x = jax.random.normal(kx, (N, C_IN, HW, HW), dtype=jnp.float32)
    params = make_params(kp, C_IN, HIDDEN, OUT, HW)

    prepped = prepare_params(params, HIDDEN, HW)             # one-time prep
    out = jax.jit(spidey_forward)(x, prepped)
    out = jax.block_until_ready(out)

    expected = ref_forward(x, params)
    assert out.shape == (N, OUT), out.shape
    assert jnp.allclose(out, expected, rtol=2e-2, atol=2e-2), (
        float(jnp.max(jnp.abs(out - expected))))

    print("KERNEL_OK")
</pallas_src>

<mosaic_0001>
module attributes {stable_mosaic.version = 11 : i64} {
  func.func @_conv_block_kernel(%arg0: i32, %arg1: memref<1x4x360xbf16, #tpu.memory_space<vmem>>, %arg2: memref<8x36xbf16, #tpu.memory_space<vmem>>, %arg3: memref<8x1xf32, #tpu.memory_space<vmem>>, %arg4: memref<8x72xbf16, #tpu.memory_space<vmem>>, %arg5: memref<8x1xf32, #tpu.memory_space<vmem>>, %arg6: memref<8x72xbf16, #tpu.memory_space<vmem>>, %arg7: memref<8x1xf32, #tpu.memory_space<vmem>>, %arg8: memref<8x72xbf16, #tpu.memory_space<vmem>>, %arg9: memref<8x1xf32, #tpu.memory_space<vmem>>, %arg10: memref<1x8x120xbf16, #tpu.memory_space<vmem>>, %arg11: memref<8x360xbf16, #tpu.memory_space<vmem>>, %arg12: memref<8x360xbf16, #tpu.memory_space<vmem>>, %arg13: memref<72x288xbf16, #tpu.memory_space<vmem>>, %arg14: memref<64x18xbf16, #tpu.memory_space<vmem>>) attributes {dimension_semantics = [#tpu.dimension_semantics<parallel>], iteration_bounds = array<i64: 2>, scalar_prefetch = 0 : i64, scratch_operands = 4 : i64, tpu.core_type = #tpu.core_type<tc>, window_params = [{transform_indices = @transform_0, window_bounds = array<i64: 1, 4, 360>}, {pipeline_mode = #tpu.pipeline_mode<synchronous>, transform_indices = @transform_1, window_bounds = array<i64: 8, 36>}, {pipeline_mode = #tpu.pipeline_mode<synchronous>, transform_indices = @transform_2, window_bounds = array<i64: 8, 1>}, {pipeline_mode = #tpu.pipeline_mode<synchronous>, transform_indices = @transform_3, window_bounds = array<i64: 8, 72>}, {pipeline_mode = #tpu.pipeline_mode<synchronous>, transform_indices = @transform_4, window_bounds = array<i64: 8, 1>}, {pipeline_mode = #tpu.pipeline_mode<synchronous>, transform_indices = @transform_5, window_bounds = array<i64: 8, 72>}, {pipeline_mode = #tpu.pipeline_mode<synchronous>, transform_indices = @transform_6, window_bounds = array<i64: 8, 1>}, {pipeline_mode = #tpu.pipeline_mode<synchronous>, transform_indices = @transform_7, window_bounds = array<i64: 8, 72>}, {pipeline_mode = #tpu.pipeline_mode<synchronous>, transform_indices = @transform_8, window_bounds = array<i64: 8, 1>}, {transform_indices = @transform_9, window_bounds = array<i64: 1, 8, 120>}]} {
    %cst = arith.constant 0.000000e+00 : bf16
    %0 = vector.broadcast %cst : bf16 to vector<8x36xbf16>
    %c0 = arith.constant 0 : index
    %c0_0 = arith.constant 0 : index
    %1 = vector.load %arg11[%c0, %c0_0] : memref<8x360xbf16, #tpu.memory_space<vmem>>, vector<8x36xbf16>
    tpu.vector_store %arg11[%c0, %c0_0], %0 {strides = array<i32>} : memref<8x360xbf16, #tpu.memory_space<vmem>>, vector<8x36xbf16>,
    %c0_1 = arith.constant 0 : index
    %c324 = arith.constant 324 : index
    %2 = vector.load %arg11[%c0_1, %c324] : memref<8x360xbf16, #tpu.memory_space<vmem>>, vector<8x36xbf16>
    tpu.vector_store %arg11[%c0_1, %c324], %0 {strides = array<i32>} : memref<8x360xbf16, #tpu.memory_space<vmem>>, vector<8x36xbf16>,
    %c0_2 = arith.constant 0 : index
    %c0_3 = arith.constant 0 : index
    %3 = vector.load %arg12[%c0_2, %c0_3] : memref<8x360xbf16, #tpu.memory_space<vmem>>, vector<8x36xbf16>
    tpu.vector_store %arg12[%c0_2, %c0_3], %0 {strides = array<i32>} : memref<8x360xbf16, #tpu.memory_space<vmem>>, vector<8x36xbf16>,
    %c0_4 = arith.constant 0 : index
    %c324_5 = arith.constant 324 : index
    %4 = vector.load %arg12[%c0_4, %c324_5] : memref<8x360xbf16, #tpu.memory_space<vmem>>, vector<8x36xbf16>
    tpu.vector_store %arg12[%c0_4, %c324_5], %0 {strides = array<i32>} : memref<8x360xbf16, #tpu.memory_space<vmem>>, vector<8x36xbf16>,
    %cst_6 = arith.constant 0.000000e+00 : bf16
    %5 = vector.broadcast %cst_6 : bf16 to vector<8x120xbf16>
    %c0_7 = arith.constant 0 : index
    %c0_8 = arith.constant 0 : index
    %c0_9 = arith.constant 0 : index
    %6 = vector.load %arg10[%c0_7, %c0_8, %c0_9] : memref<1x8x120xbf16, #tpu.memory_space<vmem>>, vector<1x8x120xbf16>
    %7 = vector.shape_cast %6 : vector<1x8x120xbf16> to vector<8x120xbf16>
    %8 = vector.shape_cast %5 : vector<8x120xbf16> to vector<1x8x120xbf16>
    tpu.vector_store %arg10[%c0_7, %c0_8, %c0_9], %8 {strides = array<i32>} : memref<1x8x120xbf16, #tpu.memory_space<vmem>>, vector<1x8x120xbf16>,
    %9 = tpu.iota {dimensions = array<i32: 1>} : vector<1x288xi32>
    %c18_i32 = arith.constant 18 : i32
    %c0_i32 = arith.constant 0 : i32
    %10 = arith.cmpi eq, %c18_i32, %c0_i32 : i32
    %c1_i32 = arith.constant 1 : i32
    %11 = arith.select %10, %c1_i32, %c18_i32 : i32
    %12 = vector.broadcast %11 : i32 to vector<1x288xi32>
    %13 = arith.remsi %9, %12 : vector<1x288xi32>
    %c0_i32_10 = arith.constant 0 : i32
    %14 = vector.broadcast %c0_i32_10 : i32 to vector<1x288xi32>
    %15 = arith.cmpi ne, %13, %14 : vector<1x288xi32>
    %c0_i32_11 = arith.constant 0 : i32
    %16 = vector.broadcast %c0_i32_11 : i32 to vector<1x288xi32>
    %17 = arith.cmpi slt, %13, %16 : vector<1x288xi32>
    %c0_i32_12 = arith.constant 0 : i32
    %18 = arith.cmpi slt, %11, %c0_i32_12 : i32
    %19 = vector.broadcast %18 : i1 to vector<1x288xi1>
    %20 = vector.broadcast %19 : vector<1x288xi1> to vector<1x288xi1>
    %21 = arith.xori %17, %20 : vector<1x288xi1>
    %22 = arith.andi %21, %15 : vector<1x288xi1>
    %23 = vector.broadcast %11 : i32 to vector<1x288xi32>
    %24 = arith.addi %13, %23 : vector<1x288xi32>
    %25 = arith.select %22, %24, %13 : vector<1x288xi1>, vector<1x288xi32>
    %c1_i32_13 = arith.constant 1 : i32
    %26 = vector.broadcast %c1_i32_13 : i32 to vector<1x288xi32>
    %27 = arith.cmpi sge, %25, %26 : vector<1x288xi32>
    %c16_i32 = arith.constant 16 : i32
    %28 = vector.broadcast %c16_i32 : i32 to vector<1x288xi32>
    %29 = arith.cmpi sle, %25, %28 : vector<1x288xi32>
    %30 = arith.andi %27, %29 : vector<1x288xi1>
    %31 = tpu.iota {dimensions = array<i32: 0>} : vector<18x8xi32>
    %32 = tpu.iota {dimensions = array<i32: 1>} : vector<18x8xi32>
    %c2_i32 = arith.constant 2 : i32
    %33 = vector.broadcast %c2_i32 : i32 to vector<18x8xi32>
    %34 = arith.muli %33, %32 : vector<18x8xi32>
    %c1_i32_14 = arith.constant 1 : i32
    %35 = vector.broadcast %c1_i32_14 : i32 to vector<18x8xi32>
    %36 = arith.addi %34, %35 : vector<18x8xi32>
    %37 = arith.cmpi eq, %31, %36 : vector<18x8xi32>
    %38 = arith.extui %37 : vector<18x8xi1> to vector<18x8xi32>
    %39 = arith.sitofp %38 : vector<18x8xi32> to vector<18x8xf32>
    %40 = arith.truncf %39 : vector<18x8xf32> to vector<18x8xbf16>
    %c2_i32_15 = arith.constant 2 : i32
    %41 = vector.broadcast %c2_i32_15 : i32 to vector<18x8xi32>
    %42 = arith.muli %41, %32 : vector<18x8xi32>
    %c2_i32_16 = arith.constant 2 : i32
    %43 = vector.broadcast %c2_i32_16 : i32 to vector<18x8xi32>
    %44 = arith.addi %42, %43 : vector<18x8xi32>
    %45 = arith.cmpi eq, %31, %44 : vector<18x8xi32>
    %46 = arith.extui %45 : vector<18x8xi1> to vector<18x8xi32>
    %47 = arith.sitofp %46 : vector<18x8xi32> to vector<18x8xf32>
    %48 = arith.truncf %47 : vector<18x8xf32> to vector<18x8xbf16>
    %c0_17 = arith.constant 0 : index
    %c0_18 = arith.constant 0 : index
    %c17 = arith.constant 17 : index
    %49 = vector.load %arg1[%c0_17, %c0_18, %c17] : memref<1x4x360xbf16, #tpu.memory_space<vmem>>, vector<1x4x288xbf16>
    %50 = vector.shape_cast %49 : vector<1x4x288xbf16> to vector<4x288xbf16>
    %c0_19 = arith.constant 0 : index
    %c0_20 = arith.constant 0 : index
    %51 = vector.load %arg13[%c0_19, %c0_20] : memref<72x288xbf16, #tpu.memory_space<vmem>>, vector<4x288xbf16>
    tpu.vector_store %arg13[%c0_19, %c0_20], %50 {strides = array<i32>} : memref<72x288xbf16, #tpu.memory_space<vmem>>, vector<4x288xbf16>,
    %c0_21 = arith.constant 0 : index
    %c0_22 = arith.constant 0 : index
    %c18 = arith.constant 18 : index
    %52 = vector.load %arg1[%c0_21, %c0_22, %c18] : memref<1x4x360xbf16, #tpu.memory_space<vmem>>, vector<1x4x288xbf16>
    %53 = vector.shape_cast %52 : vector<1x4x288xbf16> to vector<4x288xbf16>
    %c4 = arith.constant 4 : index
    %c0_23 = arith.constant 0 : index
    %54 = vector.load %arg13[%c4, %c0_23] : memref<72x288xbf16, #tpu.memory_space<vmem>>, vector<4x288xbf16>
    tpu.vector_store %arg13[%c4, %c0_23], %53 {strides = array<i32>} : memref<72x288xbf16, #tpu.memory_space<vmem>>, vector<4x288xbf16>,
    %c0_24 = arith.constant 0 : index
    %c0_25 = arith.constant 0 : index
    %c19 = arith.constant 19 : index
    %55 = vector.load %arg1[%c0_24, %c0_25, %c19] : memref<1x4x360xbf16, #tpu.memory_space<vmem>>, vector<1x4x288xbf16>
    %56 = vector.shape_cast %55 : vector<1x4x288xbf16> to vector<4x288xbf16>
    %c8 = arith.constant 8 : index
    %c0_26 = arith.constant 0 : index
    %57 = vector.load %arg13[%c8, %c0_26] : memref<72x288xbf16, #tpu.memory_space<vmem>>, vector<4x288xbf16>
    tpu.vector_store %arg13[%c8, %c0_26], %56 {strides = array<i32>} : memref<72x288xbf16, #tpu.memory_space<vmem>>, vector<4x288xbf16>,
    %c0_27 = arith.constant 0 : index
    %c0_28 = arith.constant 0 : index
    %c35 = arith.constant 35 : index
    %58 = vector.load %arg1[%c0_27, %c0_28, %c35] : memref<1x4x360xbf16, #tpu.memory_space<vmem>>, vector<1x4x288xbf16>
    %59 = vector.shape_cast %58 : vector<1x4x288xbf16> to vector<4x288xbf16>
    %c12 = arith.constant 12 : index
    %c0_29 = arith.constant 0 : index
    %60 = vector.load %arg13[%c12, %c0_29] : memref<72x288xbf16, #tpu.memory_space<vmem>>, vector<4x288xbf16>
    tpu.vector_store %arg13[%c12, %c0_29], %59 {strides = array<i32>} : memref<72x288xbf16, #tpu.memory_space<vmem>>, vector<4x288xbf16>,
    %c0_30 = arith.constant 0 : index
    %c0_31 = arith.constant 0 : index
    %c36 = arith.constant 36 : index
    %61 = vector.load %arg1[%c0_30, %c0_31, %c36] : memref<1x4x360xbf16, #tpu.memory_space<vmem>>, vector<1x4x288xbf16>
    %62 = vector.shape_cast %61 : vector<1x4x288xbf16> to vector<4x288xbf16>
    %c16 = arith.constant 16 : index
    %c0_32 = arith.constant 0 : index
    %63 = vector.load %arg13[%c16, %c0_32] : memref<72x288xbf16, #tpu.memory_space<vmem>>, vector<4x288xbf16>
    tpu.vector_store %arg13[%c16, %c0_32], %62 {strides = array<i32>} : memref<72x288xbf16, #tpu.memory_space<vmem>>, vector<4x288xbf16>,
    %c0_33 = arith.constant 0 : index
    %c0_34 = arith.constant 0 : index
    %c37 = arith.constant 37 : index
    %64 = vector.load %arg1[%c0_33, %c0_34, %c37] : memref<1x4x360xbf16, #tpu.memory_space<vmem>>, vector<1x4x288xbf16>
    %65 = vector.shape_cast %64 : vector<1x4x288xbf16> to vector<4x288xbf16>
    %c20 = arith.constant 20 : index
    %c0_35 = arith.constant 0 : index
    %66 = vector.load %arg13[%c20, %c0_35] : memref<72x288xbf16, #tpu.memory_space<vmem>>, vector<4x288xbf16>
    tpu.vector_store %arg13[%c20, %c0_35], %65 {strides = array<i32>} : memref<72x288xbf16, #tpu.memory_space<vmem>>, vector<4x288xbf16>,
    %c0_36 = arith.constant 0 : index
    %c0_37 = arith.constant 0 : index
    %c53 = arith.constant 53 : index
    %67 = vector.load %arg1[%c0_36, %c0_37, %c53] : memref<1x4x360xbf16, #tpu.memory_space<vmem>>, vector<1x4x288xbf16>
    %68 = vector.shape_cast %67 : vector<1x4x288xbf16> to vector<4x288xbf16>
    %c24 = arith.constant 24 : index
    %c0_38 = arith.constant 0 : index
    %69 = vector.load %arg13[%c24, %c0_38] : memref<72x288xbf16, #tpu.memory_space<vmem>>, vector<4x288xbf16>
    tpu.vector_store %arg13[%c24, %c0_38], %68 {strides = array<i32>} : memref<72x288xbf16, #tpu.memory_space<vmem>>, vector<4x288xbf16>,
    %c0_39 = arith.constant 0 : index
    %c0_40 = arith.constant 0 : index
    %c54 = arith.constant 54 : index
    %70 = vector.load %arg1[%c0_39, %c0_40, %c54] : memref<1x4x360xbf16, #tpu.memory_space<vmem>>, vector<1x4x288xbf16>
    %71 = vector.shape_cast %70 : vector<1x4x288xbf16> to vector<4x288xbf16>
    %c28 = arith.constant 28 : index
    %c0_41 = arith.constant 0 : index
    %72 = vector.load %arg13[%c28, %c0_41] : memref<72x288xbf16, #tpu.memory_space<vmem>>, vector<4x288xbf16>
    tpu.vector_store %arg13[%c28, %c0_41], %71 {strides = array<i32>} : memref<72x288xbf16, #tpu.memory_space<vmem>>, vector<4x288xbf16>,
    %c0_42 = arith.constant 0 : index
    %c0_43 = arith.constant 0 : index
    %c55 = arith.constant 55 : index
    %73 = vector.load %arg1[%c0_42, %c0_43, %c55] : memref<1x4x360xbf16, #tpu.memory_space<vmem>>, vector<1x4x288xbf16>
    %74 = vector.shape_cast %73 : vector<1x4x288xbf16> to vector<4x288xbf16>
    %c32 = arith.constant 32 : index
    %c0_44 = arith.constant 0 : index
    %75 = vector.load %arg13[%c32, %c0_44] : memref<72x288xbf16, #tpu.memory_space<vmem>>, vector<4x288xbf16>
    tpu.vector_store %arg13[%c32, %c0_44], %74 {strides = array<i32>} : memref<72x288xbf16, #tpu.memory_space<vmem>>, vector<4x288xbf16>,
    %c0_45 = arith.constant 0 : index
    %c0_46 = arith.constant 0 : index
    %76 = vector.load %arg2[%c0_45, %c0_46] : memref<8x36xbf16, #tpu.memory_space<vmem>>, vector<8x36xbf16>
    %c0_47 = arith.constant 0 : index
    %c0_48 = arith.constant 0 : index
    %77 = vector.load %arg13[%c0_47, %c0_48] : memref<72x288xbf16, #tpu.memory_space<vmem>>, vector<36x288xbf16>
    %cst_49 = arith.constant dense<0.000000e+00> : vector<8x288xf32>
    %78 = tpu.matmul %76, %77, %cst_49 {dimension_numbers = #tpu.dot_dimension_numbers<[1], [0], [0], [1], [0, 0, 1, 1], [], []>} : vector<8x36xbf16>, vector<36x288xbf16>, vector<8x288xf32> -> vector<8x288xf32>
    %c0_50 = arith.constant 0 : index
    %c0_51 = arith.constant 0 : index
    %79 = vector.load %arg3[%c0_50, %c0_51] : memref<8x1xf32, #tpu.memory_space<vmem>>, vector<8x1xf32>
    %80 = vector.broadcast %79 : vector<8x1xf32> to vector<8x288xf32>
    %81 = arith.addf %78, %80 : vector<8x288xf32>
    %cst_52 = arith.constant 0.000000e+00 : f32
    %82 = vector.shape_cast %30 : vector<1x288xi1> to vector<1x288xi1>
    %83 = vector.broadcast %82 : vector<1x288xi1> to vector<8x288xi1>
    %84 = vector.broadcast %cst_52 : f32 to vector<8x288xf32>
    %85 = arith.select %83, %81, %84 : vector<8x288xi1>, vector<8x288xf32>
    %86 = arith.truncf %85 : vector<8x288xf32> to vector<8x288xbf16>
    %c0_53 = arith.constant 0 : index
    %c36_54 = arith.constant 36 : index
    %87 = vector.load %arg11[%c0_53, %c36_54] : memref<8x360xbf16, #tpu.memory_space<vmem>>, vector<8x288xbf16>
    tpu.vector_store %arg11[%c0_53, %c36_54], %86 {strides = array<i32>} : memref<8x360xbf16, #tpu.memory_space<vmem>>, vector<8x288xbf16>,
    %c0_55 = arith.constant 0 : index
    %c17_56 = arith.constant 17 : index
    %88 = vector.load %arg11[%c0_55, %c17_56] : memref<8x360xbf16, #tpu.memory_space<vmem>>, vector<8x288xbf16>
    %c0_57 = arith.constant 0 : index
    %c0_58 = arith.constant 0 : index
    %89 = vector.load %arg13[%c0_57, %c0_58] : memref<72x288xbf16, #tpu.memory_space<vmem>>, vector<8x288xbf16>
    tpu.vector_store %arg13[%c0_57, %c0_58], %88 {strides = array<i32>} : memref<72x288xbf16, #tpu.memory_space<vmem>>, vector<8x288xbf16>,
    %c0_59 = arith.constant 0 : index
    %c18_60 = arith.constant 18 : index
    %90 = vector.load %arg11[%c0_59, %c18_60] : memref<8x360xbf16, #tpu.memory_space<vmem>>, vector<8x288xbf16>
    %c8_61 = arith.constant 8 : index
    %c0_62 = arith.constant 0 : index
    %91 = vector.load %arg13[%c8_61, %c0_62] : memref<72x288xbf16, #tpu.memory_space<vmem>>, vector<8x288xbf16>
    tpu.vector_store %arg13[%c8_61, %c0_62], %90 {strides = array<i32>} : memref<72x288xbf16, #tpu.memory_space<vmem>>, vector<8x288xbf16>,
    %c0_63 = arith.constant 0 : index
    %c19_64 = arith.constant 19 : index
    %92 = vector.load %arg11[%c0_63, %c19_64] : memref<8x360xbf16, #tpu.memory_space<vmem>>, vector<8x288xbf16>
    %c16_65 = arith.constant 16 : index
    %c0_66 = arith.constant 0 : index
    %93 = vector.load %arg13[%c16_65, %c0_66] : memref<72x288xbf16, #tpu.memory_space<vmem>>, vector<8x288xbf16>
    tpu.vector_store %arg13[%c16_65, %c0_66], %92 {strides = array<i32>} : memref<72x288xbf16, #tpu.memory_space<vmem>>, vector<8x288xbf16>,
    %c0_67 = arith.constant 0 : index
    %c35_68 = arith.constant 35 : index
    %94 = vector.load %arg11[%c0_67, %c35_68] : memref<8x360xbf16, #tpu.memory_space<vmem>>, vector<8x288xbf16>
    %c24_69 = arith.constant 24 : index
    %c0_70 = arith.constant 0 : index
    %95 = vector.load %arg13[%c24_69, %c0_70] : memref<72x288xbf16, #tpu.memory_space<vmem>>, vector<8x288xbf16>
    tpu.vector_store %arg13[%c24_69, %c0_70], %94 {strides = array<i32>} : memref<72x288xbf16, #tpu.memory_space<vmem>>, vector<8x288xbf16>,
    %c0_71 = arith.constant 0 : index
    %c36_72 = arith.constant 36 : index
    %96 = vector.load %arg11[%c0_71, %c36_72] : memref<8x360xbf16, #tpu.memory_space<vmem>>, vector<8x288xbf16>
    %c32_73 = arith.constant 32 : index
    %c0_74 = arith.constant 0 : index
    %97 = vector.load %arg13[%c32_73, %c0_74] : memref<72x288xbf16, #tpu.memory_space<vmem>>, vector<8x288xbf16>
    tpu.vector_store %arg13[%c32_73, %c0_74], %96 {strides = array<i32>} : memref<72x288xbf16, #tpu.memory_space<vmem>>, vector<8x288xbf16>,
    %c0_75 = arith.constant 0 : index
    %c37_76 = arith.constant 37 : index
    %98 = vector.load %arg11[%c0_75, %c37_76] : memref<8x360xbf16, #tpu.memory_space<vmem>>, vector<8x288xbf16>
    %c40 = arith.constant 40 : index
    %c0_77 = arith.constant 0 : index
    %99 = vector.load %arg13[%c40, %c0_77] : memref<72x288xbf16, #tpu.memory_space<vmem>>, vector<8x288xbf16>
    tpu.vector_store %arg13[%c40, %c0_77], %98 {strides = array<i32>} : memref<72x288xbf16, #tpu.memory_space<vmem>>, vector<8x288xbf16>,
    %c0_78 = arith.constant 0 : index
    %c53_79 = arith.constant 53 : index
    %100 = vector.load %arg11[%c0_78, %c53_79] : memref<8x360xbf16, #tpu.memory_space<vmem>>, vector<8x288xbf16>
    %c48 = arith.constant 48 : index
    %c0_80 = arith.constant 0 : index
    %101 = vector.load %arg13[%c48, %c0_80] : memref<72x288xbf16, #tpu.memory_space<vmem>>, vector<8x288xbf16>
    tpu.vector_store %arg13[%c48, %c0_80], %100 {strides = array<i32>} : memref<72x288xbf16, #tpu.memory_space<vmem>>, vector<8x288xbf16>,
    %c0_81 = arith.constant 0 : index
    %c54_82 = arith.constant 54 : index
    %102 = vector.load %arg11[%c0_81, %c54_82] : memref<8x360xbf16, #tpu.memory_space<vmem>>, vector<8x288xbf16>
    %c56 = arith.constant 56 : index
    %c0_83 = arith.constant 0 : index
    %103 = vector.load %arg13[%c56, %c0_83] : memref<72x288xbf16, #tpu.memory_space<vmem>>, vector<8x288xbf16>
    tpu.vector_store %arg13[%c56, %c0_83], %102 {strides = array<i32>} : memref<72x288xbf16, #tpu.memory_space<vmem>>, vector<8x288xbf16>,
    %c0_84 = arith.constant 0 : index
    %c55_85 = arith.constant 55 : index
    %104 = vector.load %arg11[%c0_84, %c55_85] : memref<8x360xbf16, #tpu.memory_space<vmem>>, vector<8x288xbf16>
    %c64 = arith.constant 64 : index
    %c0_86 = arith.constant 0 : index
    %105 = vector.load %arg13[%c64, %c0_86] : memref<72x288xbf16, #tpu.memory_space<vmem>>, vector<8x288xbf16>
    tpu.vector_store %arg13[%c64, %c0_86], %104 {strides = array<i32>} : memref<72x288xbf16, #tpu.memory_space<vmem>>, vector<8x288xbf16>,
    %c0_87 = arith.constant 0 : index
    %c0_88 = arith.constant 0 : index
    %106 = vector.load %arg4[%c0_87, %c0_88] : memref<8x72xbf16, #tpu.memory_space<vmem>>, vector<8x72xbf16>
    %c0_89 = arith.constant 0 : index
    %c0_90 = arith.constant 0 : index
    %107 = vector.load %arg13[%c0_89, %c0_90] : memref<72x288xbf16, #tpu.memory_space<vmem>>, vector<72x288xbf16>
    %cst_91 = arith.constant dense<0.000000e+00> : vector<8x288xf32>
    %108 = tpu.matmul %106, %107, %cst_91 {dimension_numbers = #tpu.dot_dimension_numbers<[1], [0], [0], [1], [0, 0, 1, 1], [], []>} : vector<8x72xbf16>, vector<72x288xbf16>, vector<8x288xf32> -> vector<8x288xf32>
    %c0_92 = arith.constant 0 : index
    %c0_93 = arith.constant 0 : index
    %109 = vector.load %arg5[%c0_92, %c0_93] : memref<8x1xf32, #tpu.memory_space<vmem>>, vector<8x1xf32>
    %110 = vector.broadcast %109 : vector<8x1xf32> to vector<8x288xf32>
    %111 = arith.addf %108, %110 : vector<8x288xf32>
    %cst_94 = arith.constant 0.000000e+00 : f32
    %112 = vector.broadcast %cst_94 : f32 to vector<8x288xf32>
    %113 = arith.maximumf %111, %112 : vector<8x288xf32>
    %cst_95 = arith.constant 0.000000e+00 : f32
    %114 = vector.shape_cast %30 : vector<1x288xi1> to vector<1x288xi1>
    %115 = vector.broadcast %114 : vector<1x288xi1> to vector<8x288xi1>
    %116 = vector.broadcast %cst_95 : f32 to vector<8x288xf32>
    %117 = arith.select %115, %113, %116 : vector<8x288xi1>, vector<8x288xf32>
    %118 = arith.truncf %117 : vector<8x288xf32> to vector<8x288xbf16>
    %c0_96 = arith.constant 0 : index
    %c36_97 = arith.constant 36 : index
    %119 = vector.load %arg12[%c0_96, %c36_97] : memref<8x360xbf16, #tpu.memory_space<vmem>>, vector<8x288xbf16>
    tpu.vector_store %arg12[%c0_96, %c36_97], %118 {strides = array<i32>} : memref<8x360xbf16, #tpu.memory_space<vmem>>, vector<8x288xbf16>,
    %c0_98 = arith.constant 0 : index
    %c17_99 = arith.constant 17 : index
    %120 = vector.load %arg12[%c0_98, %c17_99] : memref<8x360xbf16, #tpu.memory_space<vmem>>, vector<8x288xbf16>
    %c0_100 = arith.constant 0 : index
    %c0_101 = arith.constant 0 : index
    %121 = vector.load %arg13[%c0_100, %c0_101] : memref<72x288xbf16, #tpu.memory_space<vmem>>, vector<8x288xbf16>
    tpu.vector_store %arg13[%c0_100, %c0_101], %120 {strides = array<i32>} : memref<72x288xbf16, #tpu.memory_space<vmem>>, vector<8x288xbf16>,
    %c0_102 = arith.constant 0 : index
    %c18_103 = arith.constant 18 : index
    %122 = vector.load %arg12[%c0_102, %c18_103] : memref<8x360xbf16, #tpu.memory_space<vmem>>, vector<8x288xbf16>
    %c8_104 = arith.constant 8 : index
    %c0_105 = arith.constant 0 : index
    %123 = vector.load %arg13[%c8_104, %c0_105] : memref<72x288xbf16, #tpu.memory_space<vmem>>, vector<8x288xbf16>
    tpu.vector_store %arg13[%c8_104, %c0_105], %122 {strides = array<i32>} : memref<72x288xbf16, #tpu.memory_space<vmem>>, vector<8x288xbf16>,
    %c0_106 = arith.constant 0 : index
    %c19_107 = arith.constant 19 : index
    %124 = vector.load %arg12[%c0_106, %c19_107] : memref<8x360xbf16, #tpu.memory_space<vmem>>, vector<8x288xbf16>
    %c16_108 = arith.constant 16 : index
    %c0_109 = arith.constant 0 : index
    %125 = vector.load %arg13[%c16_108, %c0_109] : memref<72x288xbf16, #tpu.memory_space<vmem>>, vector<8x288xbf16>
    tpu.vector_store %arg13[%c16_108, %c0_109], %124 {strides = array<i32>} : memref<72x288xbf16, #tpu.memory_space<vmem>>, vector<8x288xbf16>,
    %c0_110 = arith.constant 0 : index
    %c35_111 = arith.constant 35 : index
    %126 = vector.load %arg12[%c0_110, %c35_111] : memref<8x360xbf16, #tpu.memory_space<vmem>>, vector<8x288xbf16>
    %c24_112 = arith.constant 24 : index
    %c0_113 = arith.constant 0 : index
    %127 = vector.load %arg13[%c24_112, %c0_113] : memref<72x288xbf16, #tpu.memory_space<vmem>>, vector<8x288xbf16>
    tpu.vector_store %arg13[%c24_112, %c0_113], %126 {strides = array<i32>} : memref<72x288xbf16, #tpu.memory_space<vmem>>, vector<8x288xbf16>,
    %c0_114 = arith.constant 0 : index
    %c36_115 = arith.constant 36 : index
    %128 = vector.load %arg12[%c0_114, %c36_115] : memref<8x360xbf16, #tpu.memory_space<vmem>>, vector<8x288xbf16>
    %c32_116 = arith.constant 32 : index
    %c0_117 = arith.constant 0 : index
    %129 = vector.load %arg13[%c32_116, %c0_117] : memref<72x288xbf16, #tpu.memory_space<vmem>>, vector<8x288xbf16>
    tpu.vector_store %arg13[%c32_116, %c0_117], %128 {strides = array<i32>} : memref<72x288xbf16, #tpu.memory_space<vmem>>, vector<8x288xbf16>,
    %c0_118 = arith.constant 0 : index
    %c37_119 = arith.constant 37 : index
    %130 = vector.load %arg12[%c0_118, %c37_119] : memref<8x360xbf16, #tpu.memory_space<vmem>>, vector<8x288xbf16>
    %c40_120 = arith.constant 40 : index
    %c0_121 = arith.constant 0 : index
    %131 = vector.load %arg13[%c40_120, %c0_121] : memref<72x288xbf16, #tpu.memory_space<vmem>>, vector<8x288xbf16>
    tpu.vector_store %arg13[%c40_120, %c0_121], %130 {strides = array<i32>} : memref<72x288xbf16, #tpu.memory_space<vmem>>, vector<8x288xbf16>,
    %c0_122 = arith.constant 0 : index
    %c53_123 = arith.constant 53 : index
    %132 = vector.load %arg12[%c0_122, %c53_123] : memref<8x360xbf16, #tpu.memory_space<vmem>>, vector<8x288xbf16>
    %c48_124 = arith.constant 48 : index
    %c0_125 = arith.constant 0 : index
    %133 = vector.load %arg13[%c48_124, %c0_125] : memref<72x288xbf16, #tpu.memory_space<vmem>>, vector<8x288xbf16>
    tpu.vector_store %arg13[%c48_124, %c0_125], %132 {strides = array<i32>} : memref<72x288xbf16, #tpu.memory_space<vmem>>, vector<8x288xbf16>,
    %c0_126 = arith.constant 0 : index
    %c54_127 = arith.constant 54 : index
    %134 = vector.load %arg12[%c0_126, %c54_127] : memref<8x360xbf16, #tpu.memory_space<vmem>>, vector<8x288xbf16>
    %c56_128 = arith.constant 56 : index
    %c0_129 = arith.constant 0 : index
    %135 = vector.load %arg13[%c56_128, %c0_129] : memref<72x288xbf16, #tpu.memory_space<vmem>>, vector<8x288xbf16>
    tpu.vector_store %arg13[%c56_128, %c0_129], %134 {strides = array<i32>} : memref<72x288xbf16, #tpu.memory_space<vmem>>, vector<8x288xbf16>,
    %c0_130 = arith.constant 0 : index
    %c55_131 = arith.constant 55 : index
    %136 = vector.load %arg12[%c0_130, %c55_131] : memref<8x360xbf16, #tpu.memory_space<vmem>>, vector<8x288xbf16>
    %c64_132 = arith.constant 64 : index
    %c0_133 = arith.constant 0 : index
    %137 = vector.load %arg13[%c64_132, %c0_133] : memref<72x288xbf16, #tpu.memory_space<vmem>>, vector<8x288xbf16>
    tpu.vector_store %arg13[%c64_132, %c0_133], %136 {strides = array<i32>} : memref<72x288xbf16, #tpu.memory_space<vmem>>, vector<8x288xbf16>,
    %c0_134 = arith.constant 0 : index
    %c0_135 = arith.constant 0 : index
    %138 = vector.load %arg6[%c0_134, %c0_135] : memref<8x72xbf16, #tpu.memory_space<vmem>>, vector<8x72xbf16>
    %c0_136 = arith.constant 0 : index
    %c0_137 = arith.constant 0 : index
    %139 = vector.load %arg13[%c0_136, %c0_137] : memref<72x288xbf16, #tpu.memory_space<vmem>>, vector<72x288xbf16>
    %cst_138 = arith.constant dense<0.000000e+00> : vector<8x288xf32>
    %140 = tpu.matmul %138, %139, %cst_138 {dimension_numbers = #tpu.dot_dimension_numbers<[1], [0], [0], [1], [0, 0, 1, 1], [], []>} : vector<8x72xbf16>, vector<72x288xbf16>, vector<8x288xf32> -> vector<8x288xf32>
    %c0_139 = arith.constant 0 : index
    %c0_140 = arith.constant 0 : index
    %141 = vector.load %arg7[%c0_139, %c0_140] : memref<8x1xf32, #tpu.memory_space<vmem>>, vector<8x1xf32>
    %142 = vector.broadcast %141 : vector<8x1xf32> to vector<8x288xf32>
    %143 = arith.addf %140, %142 : vector<8x288xf32>
    %cst_141 = arith.constant 0.000000e+00 : f32
    %144 = vector.shape_cast %30 : vector<1x288xi1> to vector<1x288xi1>
    %145 = vector.broadcast %144 : vector<1x288xi1> to vector<8x288xi1>
    %146 = vector.broadcast %cst_141 : f32 to vector<8x288xf32>
    %147 = arith.select %145, %143, %146 : vector<8x288xi1>, vector<8x288xf32>
    %148 = arith.truncf %147 : vector<8x288xf32> to vector<8x288xbf16>
    %c0_142 = arith.constant 0 : index
    %c36_143 = arith.constant 36 : index
    %149 = vector.load %arg11[%c0_142, %c36_143] : memref<8x360xbf16, #tpu.memory_space<vmem>>, vector<8x288xbf16>
    tpu.vector_store %arg11[%c0_142, %c36_143], %148 {strides = array<i32>} : memref<8x360xbf16, #tpu.memory_space<vmem>>, vector<8x288xbf16>,
    %c0_144 = arith.constant 0 : index
    %c17_145 = arith.constant 17 : index
    %150 = vector.load %arg11[%c0_144, %c17_145] : memref<8x360xbf16, #tpu.memory_space<vmem>>, vector<8x288xbf16>
    %c0_146 = arith.constant 0 : index
    %c0_147 = arith.constant 0 : index
    %151 = vector.load %arg13[%c0_146, %c0_147] : memref<72x288xbf16, #tpu.memory_space<vmem>>, vector<8x288xbf16>
    tpu.vector_store %arg13[%c0_146, %c0_147], %150 {strides = array<i32>} : memref<72x288xbf16, #tpu.memory_space<vmem>>, vector<8x288xbf16>,
    %c0_148 = arith.constant 0 : index
    %c18_149 = arith.constant 18 : index
    %152 = vector.load %arg11[%c0_148, %c18_149] : memref<8x360xbf16, #tpu.memory_space<vmem>>, vector<8x288xbf16>
    %c8_150 = arith.constant 8 : index
    %c0_151 = arith.constant 0 : index
    %153 = vector.load %arg13[%c8_150, %c0_151] : memref<72x288xbf16, #tpu.memory_space<vmem>>, vector<8x288xbf16>
    tpu.vector_store %arg13[%c8_150, %c0_151], %152 {strides = array<i32>} : memref<72x288xbf16, #tpu.memory_space<vmem>>, vector<8x288xbf16>,
    %c0_152 = arith.constant 0 : index
    %c19_153 = arith.constant 19 : index
    %154 = vector.load %arg11[%c0_152, %c19_153] : memref<8x360xbf16, #tpu.memory_space<vmem>>, vector<8x288xbf16>
    %c16_154 = arith.constant 16 : index
    %c0_155 = arith.constant 0 : index
    %155 = vector.load %arg13[%c16_154, %c0_155] : memref<72x288xbf16, #tpu.memory_space<vmem>>, vector<8x288xbf16>
    tpu.vector_store %arg13[%c16_154, %c0_155], %154 {strides = array<i32>} : memref<72x288xbf16, #tpu.memory_space<vmem>>, vector<8x288xbf16>,
    %c0_156 = arith.constant 0 : index
    %c35_157 = arith.constant 35 : index
    %156 = vector.load %arg11[%c0_156, %c35_157] : memref<8x360xbf16, #tpu.memory_space<vmem>>, vector<8x288xbf16>
    %c24_158 = arith.constant 24 : index
    %c0_159 = arith.constant 0 : index
    %157 = vector.load %arg13[%c24_158, %c0_159] : memref<72x288xbf16, #tpu.memory_space<vmem>>, vector<8x288xbf16>
    tpu.vector_store %arg13[%c24_158, %c0_159], %156 {strides = array<i32>} : memref<72x288xbf16, #tpu.memory_space<vmem>>, vector<8x288xbf16>,
    %c0_160 = arith.constant 0 : index
    %c36_161 = arith.constant 36 : index
    %158 = vector.load %arg11[%c0_160, %c36_161] : memref<8x360xbf16, #tpu.memory_space<vmem>>, vector<8x288xbf16>
    %c32_162 = arith.constant 32 : index
    %c0_163 = arith.constant 0 : index
    %159 = vector.load %arg13[%c32_162, %c0_163] : memref<72x288xbf16, #tpu.memory_space<vmem>>, vector<8x288xbf16>
    tpu.vector_store %arg13[%c32_162, %c0_163], %158 {strides = array<i32>} : memref<72x288xbf16, #tpu.memory_space<vmem>>, vector<8x288xbf16>,
    %c0_164 = arith.constant 0 : index
    %c37_165 = arith.constant 37 : index
    %160 = vector.load %arg11[%c0_164, %c37_165] : memref<8x360xbf16, #tpu.memory_space<vmem>>, vector<8x288xbf16>
    %c40_166 = arith.constant 40 : index
    %c0_167 = arith.constant 0 : index
    %161 = vector.load %arg13[%c40_166, %c0_167] : memref<72x288xbf16, #tpu.memory_space<vmem>>, vector<8x288xbf16>
    tpu.vector_store %arg13[%c40_166, %c0_167], %160 {strides = array<i32>} : memref<72x288xbf16, #tpu.memory_space<vmem>>, vector<8x288xbf16>,
    %c0_168 = arith.constant 0 : index
    %c53_169 = arith.constant 53 : index
    %162 = vector.load %arg11[%c0_168, %c53_169] : memref<8x360xbf16, #tpu.memory_space<vmem>>, vector<8x288xbf16>
    %c48_170 = arith.constant 48 : index
    %c0_171 = arith.constant 0 : index
    %163 = vector.load %arg13[%c48_170, %c0_171] : memref<72x288xbf16, #tpu.memory_space<vmem>>, vector<8x288xbf16>
    tpu.vector_store %arg13[%c48_170, %c0_171], %162 {strides = array<i32>} : memref<72x288xbf16, #tpu.memory_space<vmem>>, vector<8x288xbf16>,
    %c0_172 = arith.constant 0 : index
    %c54_173 = arith.constant 54 : index
    %164 = vector.load %arg11[%c0_172, %c54_173] : memref<8x360xbf16, #tpu.memory_space<vmem>>, vector<8x288xbf16>
    %c56_174 = arith.constant 56 : index
    %c0_175 = arith.constant 0 : index
    %165 = vector.load %arg13[%c56_174, %c0_175] : memref<72x288xbf16, #tpu.memory_space<vmem>>, vector<8x288xbf16>
    tpu.vector_store %arg13[%c56_174, %c0_175], %164 {strides = array<i32>} : memref<72x288xbf16, #tpu.memory_space<vmem>>, vector<8x288xbf16>,
    %c0_176 = arith.constant 0 : index
    %c55_177 = arith.constant 55 : index
    %166 = vector.load %arg11[%c0_176, %c55_177] : memref<8x360xbf16, #tpu.memory_space<vmem>>, vector<8x288xbf16>
    %c64_178 = arith.constant 64 : index
    %c0_179 = arith.constant 0 : index
    %167 = vector.load %arg13[%c64_178, %c0_179] : memref<72x288xbf16, #tpu.memory_space<vmem>>, vector<8x288xbf16>
    tpu.vector_store %arg13[%c64_178, %c0_179], %166 {strides = array<i32>} : memref<72x288xbf16, #tpu.memory_space<vmem>>, vector<8x288xbf16>,
    %c0_180 = arith.constant 0 : index
    %c0_181 = arith.constant 0 : index
    %168 = vector.load %arg8[%c0_180, %c0_181] : memref<8x72xbf16, #tpu.memory_space<vmem>>, vector<8x72xbf16>
    %c0_182 = arith.constant 0 : index
    %c0_183 = arith.constant 0 : index
    %169 = vector.load %arg13[%c0_182, %c0_183] : memref<72x288xbf16, #tpu.memory_space<vmem>>, vector<72x288xbf16>
    %cst_184 = arith.constant dense<0.000000e+00> : vector<8x288xf32>
    %170 = tpu.matmul %168, %169, %cst_184 {dimension_numbers = #tpu.dot_dimension_numbers<[1], [0], [0], [1], [0, 0, 1, 1], [], []>} : vector<8x72xbf16>, vector<72x288xbf16>, vector<8x288xf32> -> vector<8x288xf32>
    %c0_185 = arith.constant 0 : index
    %c0_186 = arith.constant 0 : index
    %171 = vector.load %arg9[%c0_185, %c0_186] : memref<8x1xf32, #tpu.memory_space<vmem>>, vector<8x1xf32>
    %172 = vector.broadcast %171 : vector<8x1xf32> to vector<8x288xf32>
    %173 = arith.addf %170, %172 : vector<8x288xf32>
    %cst_187 = arith.constant 0.000000e+00 : f32
    %174 = vector.broadcast %cst_187 : f32 to vector<8x288xf32>
    %175 = arith.maximumf %173, %174 : vector<8x288xf32>
    %176 = arith.truncf %175 : vector<8x288xf32> to vector<8x288xbf16>
    %177 = vector.extract_strided_slice %176 {offsets = [0, 0], sizes = [8, 18], strides = [1, 1]} : vector<8x288xbf16> to vector<8x18xbf16>
    %178 = vector.extract_strided_slice %176 {offsets = [0, 18], sizes = [8, 18], strides = [1, 1]} : vector<8x288xbf16> to vector<8x18xbf16>
    %179 = arith.maximumf %177, %178 : vector<8x18xbf16>
    %c0_188 = arith.constant 0 : index
    %c0_189 = arith.constant 0 : index
    %180 = vector.load %arg14[%c0_188, %c0_189] : memref<64x18xbf16, #tpu.memory_space<vmem>>, vector<8x18xbf16>
    tpu.vector_store %arg14[%c0_188, %c0_189], %179 {strides = array<i32>} : memref<64x18xbf16, #tpu.memory_space<vmem>>, vector<8x18xbf16>,
    %181 = vector.extract_strided_slice %176 {offsets = [0, 36], sizes = [8, 18], strides = [1, 1]} : vector<8x288xbf16> to vector<8x18xbf16>
    %182 = vector.extract_strided_slice %176 {offsets = [0, 54], sizes = [8, 18], strides = [1, 1]} : vector<8x288xbf16> to vector<8x18xbf16>
    %183 = arith.maximumf %181, %182 : vector<8x18xbf16>
    %c8_190 = arith.constant 8 : index
    %c0_191 = arith.constant 0 : index
    %184 = vector.load %arg14[%c8_190, %c0_191] : memref<64x18xbf16, #tpu.memory_space<vmem>>, vector<8x18xbf16>
    tpu.vector_store %arg14[%c8_190, %c0_191], %183 {strides = array<i32>} : memref<64x18xbf16, #tpu.memory_space<vmem>>, vector<8x18xbf16>,
    %185 = vector.extract_strided_slice %176 {offsets = [0, 72], sizes = [8, 18], strides = [1, 1]} : vector<8x288xbf16> to vector<8x18xbf16>
    %186 = vector.extract_strided_slice %176 {offsets = [0, 90], sizes = [8, 18], strides = [1, 1]} : vector<8x288xbf16> to vector<8x18xbf16>
    %187 = arith.maximumf %185, %186 : vector<8x18xbf16>
    %c16_192 = arith.constant 16 : index
    %c0_193 = arith.constant 0 : index
    %188 = vector.load %arg14[%c16_192, %c0_193] : memref<64x18xbf16, #tpu.memory_space<vmem>>, vector<8x18xbf16>
    tpu.vector_store %arg14[%c16_192, %c0_193], %187 {strides = array<i32>} : memref<64x18xbf16, #tpu.memory_space<vmem>>, vector<8x18xbf16>,
    %189 = vector.extract_strided_slice %176 {offsets = [0, 108], sizes = [8, 18], strides = [1, 1]} : vector<8x288xbf16> to vector<8x18xbf16>
    %190 = vector.extract_strided_slice %176 {offsets = [0, 126], sizes = [8, 18], strides = [1, 1]} : vector<8x288xbf16> to vector<8x18xbf16>
    %191 = arith.maximumf %189, %190 : vector<8x18xbf16>
    %c24_194 = arith.constant 24 : index
    %c0_195 = arith.constant 0 : index
    %192 = vector.load %arg14[%c24_194, %c0_195] : memref<64x18xbf16, #tpu.memory_space<vmem>>, vector<8x18xbf16>
    tpu.vector_store %arg14[%c24_194, %c0_195], %191 {strides = array<i32>} : memref<64x18xbf16, #tpu.memory_space<vmem>>, vector<8x18xbf16>,
    %193 = vector.extract_strided_slice %176 {offsets = [0, 144], sizes = [8, 18], strides = [1, 1]} : vector<8x288xbf16> to vector<8x18xbf16>
    %194 = vector.extract_strided_slice %176 {offsets = [0, 162], sizes = [8, 18], strides = [1, 1]} : vector<8x288xbf16> to vector<8x18xbf16>
    %195 = arith.maximumf %193, %194 : vector<8x18xbf16>
    %c32_196 = arith.constant 32 : index
    %c0_197 = arith.constant 0 : index
    %196 = vector.load %arg14[%c32_196, %c0_197] : memref<64x18xbf16, #tpu.memory_space<vmem>>, vector<8x18xbf16>
    tpu.vector_store %arg14[%c32_196, %c0_197], %195 {strides = array<i32>} : memref<64x18xbf16, #tpu.memory_space<vmem>>, vector<8x18xbf16>,
    %197 = vector.extract_strided_slice %176 {offsets = [0, 180], sizes = [8, 18], strides = [1, 1]} : vector<8x288xbf16> to vector<8x18xbf16>
    %198 = vector.extract_strided_slice %176 {offsets = [0, 198], sizes = [8, 18], strides = [1, 1]} : vector<8x288xbf16> to vector<8x18xbf16>
    %199 = arith.maximumf %197, %198 : vector<8x18xbf16>
    %c40_198 = arith.constant 40 : index
    %c0_199 = arith.constant 0 : index
    %200 = vector.load %arg14[%c40_198, %c0_199] : memref<64x18xbf16, #tpu.memory_space<vmem>>, vector<8x18xbf16>
    tpu.vector_store %arg14[%c40_198, %c0_199], %199 {strides = array<i32>} : memref<64x18xbf16, #tpu.memory_space<vmem>>, vector<8x18xbf16>,
    %201 = vector.extract_strided_slice %176 {offsets = [0, 216], sizes = [8, 18], strides = [1, 1]} : vector<8x288xbf16> to vector<8x18xbf16>
    %202 = vector.extract_strided_slice %176 {offsets = [0, 234], sizes = [8, 18], strides = [1, 1]} : vector<8x288xbf16> to vector<8x18xbf16>
    %203 = arith.maximumf %201, %202 : vector<8x18xbf16>
    %c48_200 = arith.constant 48 : index
    %c0_201 = arith.constant 0 : index
    %204 = vector.load %arg14[%c48_200, %c0_201] : memref<64x18xbf16, #tpu.memory_space<vmem>>, vector<8x18xbf16>
    tpu.vector_store %arg14[%c48_200, %c0_201], %203 {strides = array<i32>} : memref<64x18xbf16, #tpu.memory_space<vmem>>, vector<8x18xbf16>,
    %205 = vector.extract_strided_slice %176 {offsets = [0, 252], sizes = [8, 18], strides = [1, 1]} : vector<8x288xbf16> to vector<8x18xbf16>
    %206 = vector.extract_strided_slice %176 {offsets = [0, 270], sizes = [8, 18], strides = [1, 1]} : vector<8x288xbf16> to vector<8x18xbf16>
    %207 = arith.maximumf %205, %206 : vector<8x18xbf16>
    %c56_202 = arith.constant 56 : index
    %c0_203 = arith.constant 0 : index
    %208 = vector.load %arg14[%c56_202, %c0_203] : memref<64x18xbf16, #tpu.memory_space<vmem>>, vector<8x18xbf16>
    tpu.vector_store %arg14[%c56_202, %c0_203], %207 {strides = array<i32>} : memref<64x18xbf16, #tpu.memory_space<vmem>>, vector<8x18xbf16>,
    %c0_204 = arith.constant 0 : index
    %c0_205 = arith.constant 0 : index
    %209 = vector.load %arg14[%c0_204, %c0_205] : memref<64x18xbf16, #tpu.memory_space<vmem>>, vector<64x18xbf16>
    %cst_206 = arith.constant dense<0.000000e+00> : vector<64x8xf32>
    %210 = tpu.matmul %209, %40, %cst_206 {dimension_numbers = #tpu.dot_dimension_numbers<[1], [0], [0], [1], [0, 0, 1, 1], [], []>} : vector<64x18xbf16>, vector<18x8xbf16>, vector<64x8xf32> -> vector<64x8xf32>
    %cst_207 = arith.constant dense<0.000000e+00> : vector<64x8xf32>
    %211 = tpu.matmul %209, %48, %cst_207 {dimension_numbers = #tpu.dot_dimension_numbers<[1], [0], [0], [1], [0, 0, 1, 1], [], []>} : vector<64x18xbf16>, vector<18x8xbf16>, vector<64x8xf32> -> vector<64x8xf32>
    %212 = arith.maximumf %210, %211 : vector<64x8xf32>
    %213 = arith.truncf %212 : vector<64x8xf32> to vector<64x8xbf16>
    %214 = vector.extract_strided_slice %213 {offsets = [0, 0], sizes = [8, 8], strides = [1, 1]} : vector<64x8xbf16> to vector<8x8xbf16>
    %c0_208 = arith.constant 0 : index
    %c0_209 = arith.constant 0 : index
    %c21 = arith.constant 21 : index
    %215 = vector.load %arg10[%c0_208, %c0_209, %c21] : memref<1x8x120xbf16, #tpu.memory_space<vmem>>, vector<1x8x8xbf16>
    %216 = vector.shape_cast %215 : vector<1x8x8xbf16> to vector<8x8xbf16>
    %217 = vector.shape_cast %214 : vector<8x8xbf16> to vector<1x8x8xbf16>
    tpu.vector_store %arg10[%c0_208, %c0_209, %c21], %217 {strides = array<i32>} : memref<1x8x120xbf16, #tpu.memory_space<vmem>>, vector<1x8x8xbf16>,
    %218 = vector.extract_strided_slice %213 {offsets = [8, 0], sizes = [8, 8], strides = [1, 1]} : vector<64x8xbf16> to vector<8x8xbf16>
    %c0_210 = arith.constant 0 : index
    %c0_211 = arith.constant 0 : index
    %c31 = arith.constant 31 : index
    %219 = vector.load %arg10[%c0_210, %c0_211, %c31] : memref<1x8x120xbf16, #tpu.memory_space<vmem>>, vector<1x8x8xbf16>
    %220 = vector.shape_cast %219 : vector<1x8x8xbf16> to vector<8x8xbf16>
    %221 = vector.shape_cast %218 : vector<8x8xbf16> to vector<1x8x8xbf16>
    tpu.vector_store %arg10[%c0_210, %c0_211, %c31], %221 {strides = array<i32>} : memref<1x8x120xbf16, #tpu.memory_space<vmem>>, vector<1x8x8xbf16>,
    %222 = vector.extract_strided_slice %213 {offsets = [16, 0], sizes = [8, 8], strides = [1, 1]} : vector<64x8xbf16> to vector<8x8xbf16>
    %c0_212 = arith.constant 0 : index
    %c0_213 = arith.constant 0 : index
    %c41 = arith.constant 41 : index
    %223 = vector.load %arg10[%c0_212, %c0_213, %c41] : memref<1x8x120xbf16, #tpu.memory_space<vmem>>, vector<1x8x8xbf16>
    %224 = vector.shape_cast %223 : vector<1x8x8xbf16> to vector<8x8xbf16>
    %225 = vector.shape_cast %222 : vector<8x8xbf16> to vector<1x8x8xbf16>
    tpu.vector_store %arg10[%c0_212, %c0_213, %c41], %225 {strides = array<i32>} : memref<1x8x120xbf16, #tpu.memory_space<vmem>>, vector<1x8x8xbf16>,
    %226 = vector.extract_strided_slice %213 {offsets = [24, 0], sizes = [8, 8], strides = [1, 1]} : vector<64x8xbf16> to vector<8x8xbf16>
    %c0_214 = arith.constant 0 : index
    %c0_215 = arith.constant 0 : index
    %c51 = arith.constant 51 : index
    %227 = vector.load %arg10[%c0_214, %c0_215, %c51] : memref<1x8x120xbf16, #tpu.memory_space<vmem>>, vector<1x8x8xbf16>
    %228 = vector.shape_cast %227 : vector<1x8x8xbf16> to vector<8x8xbf16>
    %229 = vector.shape_cast %226 : vector<8x8xbf16> to vector<1x8x8xbf16>
    tpu.vector_store %arg10[%c0_214, %c0_215, %c51], %229 {strides = array<i32>} : memref<1x8x120xbf16, #tpu.memory_space<vmem>>, vector<1x8x8xbf16>,
    %230 = vector.extract_strided_slice %213 {offsets = [32, 0], sizes = [8, 8], strides = [1, 1]} : vector<64x8xbf16> to vector<8x8xbf16>
    %c0_216 = arith.constant 0 : index
    %c0_217 = arith.constant 0 : index
    %c61 = arith.constant 61 : index
    %231 = vector.load %arg10[%c0_216, %c0_217, %c61] : memref<1x8x120xbf16, #tpu.memory_space<vmem>>, vector<1x8x8xbf16>
    %232 = vector.shape_cast %231 : vector<1x8x8xbf16> to vector<8x8xbf16>
    %233 = vector.shape_cast %230 : vector<8x8xbf16> to vector<1x8x8xbf16>
    tpu.vector_store %arg10[%c0_216, %c0_217, %c61], %233 {strides = array<i32>} : memref<1x8x120xbf16, #tpu.memory_space<vmem>>, vector<1x8x8xbf16>,
    %234 = vector.extract_strided_slice %213 {offsets = [40, 0], sizes = [8, 8], strides = [1, 1]} : vector<64x8xbf16> to vector<8x8xbf16>
    %c0_218 = arith.constant 0 : index
    %c0_219 = arith.constant 0 : index
    %c71 = arith.constant 71 : index
    %235 = vector.load %arg10[%c0_218, %c0_219, %c71] : memref<1x8x120xbf16, #tpu.memory_space<vmem>>, vector<1x8x8xbf16>
    %236 = vector.shape_cast %235 : vector<1x8x8xbf16> to vector<8x8xbf16>
    %237 = vector.shape_cast %234 : vector<8x8xbf16> to vector<1x8x8xbf16>
    tpu.vector_store %arg10[%c0_218, %c0_219, %c71], %237 {strides = array<i32>} : memref<1x8x120xbf16, #tpu.memory_space<vmem>>, vector<1x8x8xbf16>,
    %238 = vector.extract_strided_slice %213 {offsets = [48, 0], sizes = [8, 8], strides = [1, 1]} : vector<64x8xbf16> to vector<8x8xbf16>
    %c0_220 = arith.constant 0 : index
    %c0_221 = arith.constant 0 : index
    %c81 = arith.constant 81 : index
    %239 = vector.load %arg10[%c0_220, %c0_221, %c81] : memref<1x8x120xbf16, #tpu.memory_space<vmem>>, vector<1x8x8xbf16>
    %240 = vector.shape_cast %239 : vector<1x8x8xbf16> to vector<8x8xbf16>
    %241 = vector.shape_cast %238 : vector<8x8xbf16> to vector<1x8x8xbf16>
    tpu.vector_store %arg10[%c0_220, %c0_221, %c81], %241 {strides = array<i32>} : memref<1x8x120xbf16, #tpu.memory_space<vmem>>, vector<1x8x8xbf16>,
    %242 = vector.extract_strided_slice %213 {offsets = [56, 0], sizes = [8, 8], strides = [1, 1]} : vector<64x8xbf16> to vector<8x8xbf16>
    %c0_222 = arith.constant 0 : index
    %c0_223 = arith.constant 0 : index
    %c91 = arith.constant 91 : index
    %243 = vector.load %arg10[%c0_222, %c0_223, %c91] : memref<1x8x120xbf16, #tpu.memory_space<vmem>>, vector<1x8x8xbf16>
    %244 = vector.shape_cast %243 : vector<1x8x8xbf16> to vector<8x8xbf16>
    %245 = vector.shape_cast %242 : vector<8x8xbf16> to vector<1x8x8xbf16>
    tpu.vector_store %arg10[%c0_222, %c0_223, %c91], %245 {strides = array<i32>} : memref<1x8x120xbf16, #tpu.memory_space<vmem>>, vector<1x8x8xbf16>,
    return
  }
  func.func @transform_0(%arg0: i32) -> (i32, i32, i32) {
    %c0_i32 = arith.constant 0 : i32
    %c0_i32_0 = arith.constant 0 : i32
    %c0_i32_1 = arith.constant 0 : i32
    return %arg0, %c0_i32, %c0_i32_0 : i32, i32, i32
  }
  func.func @transform_1(%arg0: i32) -> (i32, i32) {
    %c0_i32 = arith.constant 0 : i32
    %c0_i32_0 = arith.constant 0 : i32
    %c0_i32_1 = arith.constant 0 : i32
    return %c0_i32, %c0_i32_0 : i32, i32
  }
  func.func @transform_2(%arg0: i32) -> (i32, i32) {
    %c0_i32 = arith.constant 0 : i32
    %c0_i32_0 = arith.constant 0 : i32
    %c0_i32_1 = arith.constant 0 : i32
    return %c0_i32, %c0_i32_0 : i32, i32
  }
  func.func @transform_3(%arg0: i32) -> (i32, i32) {
    %c0_i32 = arith.constant 0 : i32
    %c0_i32_0 = arith.constant 0 : i32
    %c0_i32_1 = arith.constant 0 : i32
    return %c0_i32, %c0_i32_0 : i32, i32
  }
  func.func @transform_4(%arg0: i32) -> (i32, i32) {
    %c0_i32 = arith.constant 0 : i32
    %c0_i32_0 = arith.constant 0 : i32
    %c0_i32_1 = arith.constant 0 : i32
    return %c0_i32, %c0_i32_0 : i32, i32
  }
  func.func @transform_5(%arg0: i32) -> (i32, i32) {
    %c0_i32 = arith.constant 0 : i32
    %c0_i32_0 = arith.constant 0 : i32
    %c0_i32_1 = arith.constant 0 : i32
    return %c0_i32, %c0_i32_0 : i32, i32
  }
  func.func @transform_6(%arg0: i32) -> (i32, i32) {
    %c0_i32 = arith.constant 0 : i32
    %c0_i32_0 = arith.constant 0 : i32
    %c0_i32_1 = arith.constant 0 : i32
    return %c0_i32, %c0_i32_0 : i32, i32
  }
  func.func @transform_7(%arg0: i32) -> (i32, i32) {
    %c0_i32 = arith.constant 0 : i32
    %c0_i32_0 = arith.constant 0 : i32
    %c0_i32_1 = arith.constant 0 : i32
    return %c0_i32, %c0_i32_0 : i32, i32
  }
  func.func @transform_8(%arg0: i32) -> (i32, i32) {
    %c0_i32 = arith.constant 0 : i32
    %c0_i32_0 = arith.constant 0 : i32
    %c0_i32_1 = arith.constant 0 : i32
    return %c0_i32, %c0_i32_0 : i32, i32
  }
  func.func @transform_9(%arg0: i32) -> (i32, i32, i32) {
    %c0_i32 = arith.constant 0 : i32
    %c0_i32_0 = arith.constant 0 : i32
    %c0_i32_1 = arith.constant 0 : i32
    return %arg0, %c0_i32, %c0_i32_0 : i32, i32, i32
  }
}

module attributes {stable_mosaic.version = 11 : i64} {
  func.func @_conv_block_kernel(%arg0: i32, %arg1: memref<1x8x120xbf16, #tpu.memory_space<vmem>>, %arg2: memref<8x72xbf16, #tpu.memory_space<vmem>>, %arg3: memref<8x1xf32, #tpu.memory_space<vmem>>, %arg4: memref<8x72xbf16, #tpu.memory_space<vmem>>, %arg5: memref<8x1xf32, #tpu.memory_space<vmem>>, %arg6: memref<8x72xbf16, #tpu.memory_space<vmem>>, %arg7: memref<8x1xf32, #tpu.memory_space<vmem>>, %arg8: memref<8x72xbf16, #tpu.memory_space<vmem>>, %arg9: memref<8x1xf32, #tpu.memory_space<vmem>>, %arg10: memref<1x8x48xbf16, #tpu.memory_space<vmem>>, %arg11: memref<8x120xbf16, #tpu.memory_space<vmem>>, %arg12: memref<8x120xbf16, #tpu.memory_space<vmem>>, %arg13: memref<72x80xbf16, #tpu.memory_space<vmem>>, %arg14: memref<32x10xbf16, #tpu.memory_space<vmem>>) attributes {dimension_semantics = [#tpu.dimension_semantics<parallel>], iteration_bounds = array<i64: 2>, scalar_prefetch = 0 : i64, scratch_operands = 4 : i64, tpu.core_type = #tpu.core_type<tc>, window_params = [{transform_indices = @transform_0, window_bounds = array<i64: 1, 8, 120>}, {pipeline_mode = #tpu.pipeline_mode<synchronous>, transform_indices = @transform_1, window_bounds = array<i64: 8, 72>}, {pipeline_mode = #tpu.pipeline_mode<synchronous>, transform_indices = @transform_2, window_bounds = array<i64: 8, 1>}, {pipeline_mode = #tpu.pipeline_mode<synchronous>, transform_indices = @transform_3, window_bounds = array<i64: 8, 72>}, {pipeline_mode = #tpu.pipeline_mode<synchronous>, transform_indices = @transform_4, window_bounds = array<i64: 8, 1>}, {pipeline_mode = #tpu.pipeline_mode<synchronous>, transform_indices = @transform_5, window_bounds = array<i64: 8, 72>}, {pipeline_mode = #tpu.pipeline_mode<synchronous>, transform_indices = @transform_6, window_bounds = array<i64: 8, 1>}, {pipeline_mode = #tpu.pipeline_mode<synchronous>, transform_indices = @transform_7, window_bounds = array<i64: 8, 72>}, {pipeline_mode = #tpu.pipeline_mode<synchronous>, transform_indices = @transform_8, window_bounds = array<i64: 8, 1>}, {transform_indices = @transform_9, window_bounds = array<i64: 1, 8, 48>}]} {
    %cst = arith.constant 0.000000e+00 : bf16
    %0 = vector.broadcast %cst : bf16 to vector<8x20xbf16>
    %c0 = arith.constant 0 : index
    %c0_0 = arith.constant 0 : index
    %1 = vector.load %arg11[%c0, %c0_0] : memref<8x120xbf16, #tpu.memory_space<vmem>>, vector<8x20xbf16>
    tpu.vector_store %arg11[%c0, %c0_0], %0 {strides = array<i32>} : memref<8x120xbf16, #tpu.memory_space<vmem>>, vector<8x20xbf16>,
    %c0_1 = arith.constant 0 : index
    %c100 = arith.constant 100 : index
    %2 = vector.load %arg11[%c0_1, %c100] : memref<8x120xbf16, #tpu.memory_space<vmem>>, vector<8x20xbf16>
    tpu.vector_store %arg11[%c0_1, %c100], %0 {strides = array<i32>} : memref<8x120xbf16, #tpu.memory_space<vmem>>, vector<8x20xbf16>,
    %c0_2 = arith.constant 0 : index
    %c0_3 = arith.constant 0 : index
    %3 = vector.load %arg12[%c0_2, %c0_3] : memref<8x120xbf16, #tpu.memory_space<vmem>>, vector<8x20xbf16>
    tpu.vector_store %arg12[%c0_2, %c0_3], %0 {strides = array<i32>} : memref<8x120xbf16, #tpu.memory_space<vmem>>, vector<8x20xbf16>,
    %c0_4 = arith.constant 0 : index
    %c100_5 = arith.constant 100 : index
    %4 = vector.load %arg12[%c0_4, %c100_5] : memref<8x120xbf16, #tpu.memory_space<vmem>>, vector<8x20xbf16>
    tpu.vector_store %arg12[%c0_4, %c100_5], %0 {strides = array<i32>} : memref<8x120xbf16, #tpu.memory_space<vmem>>, vector<8x20xbf16>,
    %cst_6 = arith.constant 0.000000e+00 : bf16
    %5 = vector.broadcast %cst_6 : bf16 to vector<8x48xbf16>
    %c0_7 = arith.constant 0 : index
    %c0_8 = arith.constant 0 : index
    %c0_9 = arith.constant 0 : index
    %6 = vector.load %arg10[%c0_7, %c0_8, %c0_9] : memref<1x8x48xbf16, #tpu.memory_space<vmem>>, vector<1x8x48xbf16>
    %7 = vector.shape_cast %6 : vector<1x8x48xbf16> to vector<8x48xbf16>
    %8 = vector.shape_cast %5 : vector<8x48xbf16> to vector<1x8x48xbf16>
    tpu.vector_store %arg10[%c0_7, %c0_8, %c0_9], %8 {strides = array<i32>} : memref<1x8x48xbf16, #tpu.memory_space<vmem>>, vector<1x8x48xbf16>,
    %9 = tpu.iota {dimensions = array<i32: 1>} : vector<1x80xi32>
    %c10_i32 = arith.constant 10 : i32
    %c0_i32 = arith.constant 0 : i32
    %10 = arith.cmpi eq, %c10_i32, %c0_i32 : i32
    %c1_i32 = arith.constant 1 : i32
    %11 = arith.select %10, %c1_i32, %c10_i32 : i32
    %12 = vector.broadcast %11 : i32 to vector<1x80xi32>
    %13 = arith.remsi %9, %12 : vector<1x80xi32>
    %c0_i32_10 = arith.constant 0 : i32
    %14 = vector.broadcast %c0_i32_10 : i32 to vector<1x80xi32>
    %15 = arith.cmpi ne, %13, %14 : vector<1x80xi32>
    %c0_i32_11 = arith.constant 0 : i32
    %16 = vector.broadcast %c0_i32_11 : i32 to vector<1x80xi32>
    %17 = arith.cmpi slt, %13, %16 : vector<1x80xi32>
    %c0_i32_12 = arith.constant 0 : i32
    %18 = arith.cmpi slt, %11, %c0_i32_12 : i32
    %19 = vector.broadcast %18 : i1 to vector<1x80xi1>
    %20 = vector.broadcast %19 : vector<1x80xi1> to vector<1x80xi1>
    %21 = arith.xori %17, %20 : vector<1x80xi1>
    %22 = arith.andi %21, %15 : vector<1x80xi1>
    %23 = vector.broadcast %11 : i32 to vector<1x80xi32>
    %24 = arith.addi %13, %23 : vector<1x80xi32>
    %25 = arith.select %22, %24, %13 : vector<1x80xi1>, vector<1x80xi32>
    %c1_i32_13 = arith.constant 1 : i32
    %26 = vector.broadcast %c1_i32_13 : i32 to vector<1x80xi32>
    %27 = arith.cmpi sge, %25, %26 : vector<1x80xi32>
    %c8_i32 = arith.constant 8 : i32
    %28 = vector.broadcast %c8_i32 : i32 to vector<1x80xi32>
    %29 = arith.cmpi sle, %25, %28 : vector<1x80xi32>
    %30 = arith.andi %27, %29 : vector<1x80xi1>
    %31 = tpu.iota {dimensions = array<i32: 0>} : vector<10x4xi32>
    %32 = tpu.iota {dimensions = array<i32: 1>} : vector<10x4xi32>
    %c2_i32 = arith.constant 2 : i32
    %33 = vector.broadcast %c2_i32 : i32 to vector<10x4xi32>
    %34 = arith.muli %33, %32 : vector<10x4xi32>
    %c1_i32_14 = arith.constant 1 : i32
    %35 = vector.broadcast %c1_i32_14 : i32 to vector<10x4xi32>
    %36 = arith.addi %34, %35 : vector<10x4xi32>
    %37 = arith.cmpi eq, %31, %36 : vector<10x4xi32>
    %38 = arith.extui %37 : vector<10x4xi1> to vector<10x4xi32>
    %39 = arith.sitofp %38 : vector<10x4xi32> to vector<10x4xf32>
    %40 = arith.truncf %39 : vector<10x4xf32> to vector<10x4xbf16>
    %c2_i32_15 = arith.constant 2 : i32
    %41 = vector.broadcast %c2_i32_15 : i32 to vector<10x4xi32>
    %42 = arith.muli %41, %32 : vector<10x4xi32>
    %c2_i32_16 = arith.constant 2 : i32
    %43 = vector.broadcast %c2_i32_16 : i32 to vector<10x4xi32>
    %44 = arith.addi %42, %43 : vector<10x4xi32>
    %45 = arith.cmpi eq, %31, %44 : vector<10x4xi32>
    %46 = arith.extui %45 : vector<10x4xi1> to vector<10x4xi32>
    %47 = arith.sitofp %46 : vector<10x4xi32> to vector<10x4xf32>
    %48 = arith.truncf %47 : vector<10x4xf32> to vector<10x4xbf16>
    %c0_17 = arith.constant 0 : index
    %c0_18 = arith.constant 0 : index
    %c9 = arith.constant 9 : index
    %49 = vector.load %arg1[%c0_17, %c0_18, %c9] : memref<1x8x120xbf16, #tpu.memory_space<vmem>>, vector<1x8x80xbf16>
    %50 = vector.shape_cast %49 : vector<1x8x80xbf16> to vector<8x80xbf16>
    %c0_19 = arith.constant 0 : index
    %c0_20 = arith.constant 0 : index
    %51 = vector.load %arg13[%c0_19, %c0_20] : memref<72x80xbf16, #tpu.memory_space<vmem>>, vector<8x80xbf16>
    tpu.vector_store %arg13[%c0_19, %c0_20], %50 {strides = array<i32>} : memref<72x80xbf16, #tpu.memory_space<vmem>>, vector<8x80xbf16>,
    %c0_21 = arith.constant 0 : index
    %c0_22 = arith.constant 0 : index
    %c10 = arith.constant 10 : index
    %52 = vector.load %arg1[%c0_21, %c0_22, %c10] : memref<1x8x120xbf16, #tpu.memory_space<vmem>>, vector<1x8x80xbf16>
    %53 = vector.shape_cast %52 : vector<1x8x80xbf16> to vector<8x80xbf16>
    %c8 = arith.constant 8 : index
    %c0_23 = arith.constant 0 : index
    %54 = vector.load %arg13[%c8, %c0_23] : memref<72x80xbf16, #tpu.memory_space<vmem>>, vector<8x80xbf16>
    tpu.vector_store %arg13[%c8, %c0_23], %53 {strides = array<i32>} : memref<72x80xbf16, #tpu.memory_space<vmem>>, vector<8x80xbf16>,
    %c0_24 = arith.constant 0 : index
    %c0_25 = arith.constant 0 : index
    %c11 = arith.constant 11 : index
    %55 = vector.load %arg1[%c0_24, %c0_25, %c11] : memref<1x8x120xbf16, #tpu.memory_space<vmem>>, vector<1x8x80xbf16>
    %56 = vector.shape_cast %55 : vector<1x8x80xbf16> to vector<8x80xbf16>
    %c16 = arith.constant 16 : index
    %c0_26 = arith.constant 0 : index
    %57 = vector.load %arg13[%c16, %c0_26] : memref<72x80xbf16, #tpu.memory_space<vmem>>, vector<8x80xbf16>
    tpu.vector_store %arg13[%c16, %c0_26], %56 {strides = array<i32>} : memref<72x80xbf16, #tpu.memory_space<vmem>>, vector<8x80xbf16>,
    %c0_27 = arith.constant 0 : index
    %c0_28 = arith.constant 0 : index
    %c19 = arith.constant 19 : index
    %58 = vector.load %arg1[%c0_27, %c0_28, %c19] : memref<1x8x120xbf16, #tpu.memory_space<vmem>>, vector<1x8x80xbf16>
    %59 = vector.shape_cast %58 : vector<1x8x80xbf16> to vector<8x80xbf16>
    %c24 = arith.constant 24 : index
    %c0_29 = arith.constant 0 : index
    %60 = vector.load %arg13[%c24, %c0_29] : memref<72x80xbf16, #tpu.memory_space<vmem>>, vector<8x80xbf16>
    tpu.vector_store %arg13[%c24, %c0_29], %59 {strides = array<i32>} : memref<72x80xbf16, #tpu.memory_space<vmem>>, vector<8x80xbf16>,
    %c0_30 = arith.constant 0 : index
    %c0_31 = arith.constant 0 : index
    %c20 = arith.constant 20 : index
    %61 = vector.load %arg1[%c0_30, %c0_31, %c20] : memref<1x8x120xbf16, #tpu.memory_space<vmem>>, vector<1x8x80xbf16>
    %62 = vector.shape_cast %61 : vector<1x8x80xbf16> to vector<8x80xbf16>
    %c32 = arith.constant 32 : index
    %c0_32 = arith.constant 0 : index
    %63 = vector.load %arg13[%c32, %c0_32] : memref<72x80xbf16, #tpu.memory_space<vmem>>, vector<8x80xbf16>
    tpu.vector_store %arg13[%c32, %c0_32], %62 {strides = array<i32>} : memref<72x80xbf16, #tpu.memory_space<vmem>>, vector<8x80xbf16>,
    %c0_33 = arith.constant 0 : index
    %c0_34 = arith.constant 0 : index
    %c21 = arith.constant 21 : index
    %64 = vector.load %arg1[%c0_33, %c0_34, %c21] : memref<1x8x120xbf16, #tpu.memory_space<vmem>>, vector<1x8x80xbf16>
    %65 = vector.shape_cast %64 : vector<1x8x80xbf16> to vector<8x80xbf16>
    %c40 = arith.constant 40 : index
    %c0_35 = arith.constant 0 : index
    %66 = vector.load %arg13[%c40, %c0_35] : memref<72x80xbf16, #tpu.memory_space<vmem>>, vector<8x80xbf16>
    tpu.vector_store %arg13[%c40, %c0_35], %65 {strides = array<i32>} : memref<72x80xbf16, #tpu.memory_space<vmem>>, vector<8x80xbf16>,
    %c0_36 = arith.constant 0 : index
    %c0_37 = arith.constant 0 : index
    %c29 = arith.constant 29 : index
    %67 = vector.load %arg1[%c0_36, %c0_37, %c29] : memref<1x8x120xbf16, #tpu.memory_space<vmem>>, vector<1x8x80xbf16>
    %68 = vector.shape_cast %67 : vector<1x8x80xbf16> to vector<8x80xbf16>
    %c48 = arith.constant 48 : index
    %c0_38 = arith.constant 0 : index
    %69 = vector.load %arg13[%c48, %c0_38] : memref<72x80xbf16, #tpu.memory_space<vmem>>, vector<8x80xbf16>
    tpu.vector_store %arg13[%c48, %c0_38], %68 {strides = array<i32>} : memref<72x80xbf16, #tpu.memory_space<vmem>>, vector<8x80xbf16>,
    %c0_39 = arith.constant 0 : index
    %c0_40 = arith.constant 0 : index
    %c30 = arith.constant 30 : index
    %70 = vector.load %arg1[%c0_39, %c0_40, %c30] : memref<1x8x120xbf16, #tpu.memory_space<vmem>>, vector<1x8x80xbf16>
    %71 = vector.shape_cast %70 : vector<1x8x80xbf16> to vector<8x80xbf16>
    %c56 = arith.constant 56 : index
    %c0_41 = arith.constant 0 : index
    %72 = vector.load %arg13[%c56, %c0_41] : memref<72x80xbf16, #tpu.memory_space<vmem>>, vector<8x80xbf16>
    tpu.vector_store %arg13[%c56, %c0_41], %71 {strides = array<i32>} : memref<72x80xbf16, #tpu.memory_space<vmem>>, vector<8x80xbf16>,
    %c0_42 = arith.constant 0 : index
    %c0_43 = arith.constant 0 : index
    %c31 = arith.constant 31 : index
    %73 = vector.load %arg1[%c0_42, %c0_43, %c31] : memref<1x8x120xbf16, #tpu.memory_space<vmem>>, vector<1x8x80xbf16>
    %74 = vector.shape_cast %73 : vector<1x8x80xbf16> to vector<8x80xbf16>
    %c64 = arith.constant 64 : index
    %c0_44 = arith.constant 0 : index
    %75 = vector.load %arg13[%c64, %c0_44] : memref<72x80xbf16, #tpu.memory_space<vmem>>, vector<8x80xbf16>
    tpu.vector_store %arg13[%c64, %c0_44], %74 {strides = array<i32>} : memref<72x80xbf16, #tpu.memory_space<vmem>>, vector<8x80xbf16>,
    %c0_45 = arith.constant 0 : index
    %c0_46 = arith.constant 0 : index
    %76 = vector.load %arg2[%c0_45, %c0_46] : memref<8x72xbf16, #tpu.memory_space<vmem>>, vector<8x72xbf16>
    %c0_47 = arith.constant 0 : index
    %c0_48 = arith.constant 0 : index
    %77 = vector.load %arg13[%c0_47, %c0_48] : memref<72x80xbf16, #tpu.memory_space<vmem>>, vector<72x80xbf16>
    %cst_49 = arith.constant dense<0.000000e+00> : vector<8x80xf32>
    %78 = tpu.matmul %76, %77, %cst_49 {dimension_numbers = #tpu.dot_dimension_numbers<[1], [0], [0], [1], [0, 0, 1, 1], [], []>} : vector<8x72xbf16>, vector<72x80xbf16>, vector<8x80xf32> -> vector<8x80xf32>
    %c0_50 = arith.constant 0 : index
    %c0_51 = arith.constant 0 : index
    %79 = vector.load %arg3[%c0_50, %c0_51] : memref<8x1xf32, #tpu.memory_space<vmem>>, vector<8x1xf32>
    %80 = vector.broadcast %79 : vector<8x1xf32> to vector<8x80xf32>
    %81 = arith.addf %78, %80 : vector<8x80xf32>
    %cst_52 = arith.constant 0.000000e+00 : f32
    %82 = vector.shape_cast %30 : vector<1x80xi1> to vector<1x80xi1>
    %83 = vector.broadcast %82 : vector<1x80xi1> to vector<8x80xi1>
    %84 = vector.broadcast %cst_52 : f32 to vector<8x80xf32>
    %85 = arith.select %83, %81, %84 : vector<8x80xi1>, vector<8x80xf32>
    %86 = arith.truncf %85 : vector<8x80xf32> to vector<8x80xbf16>
    %c0_53 = arith.constant 0 : index
    %c20_54 = arith.constant 20 : index
    %87 = vector.load %arg11[%c0_53, %c20_54] : memref<8x120xbf16, #tpu.memory_space<vmem>>, vector<8x80xbf16>
    tpu.vector_store %arg11[%c0_53, %c20_54], %86 {strides = array<i32>} : memref<8x120xbf16, #tpu.memory_space<vmem>>, vector<8x80xbf16>,
    %c0_55 = arith.constant 0 : index
    %c9_56 = arith.constant 9 : index
    %88 = vector.load %arg11[%c0_55, %c9_56] : memref<8x120xbf16, #tpu.memory_space<vmem>>, vector<8x80xbf16>
    %c0_57 = arith.constant 0 : index
    %c0_58 = arith.constant 0 : index
    %89 = vector.load %arg13[%c0_57, %c0_58] : memref<72x80xbf16, #tpu.memory_space<vmem>>, vector<8x80xbf16>
    tpu.vector_store %arg13[%c0_57, %c0_58], %88 {strides = array<i32>} : memref<72x80xbf16, #tpu.memory_space<vmem>>, vector<8x80xbf16>,
    %c0_59 = arith.constant 0 : index
    %c10_60 = arith.constant 10 : index
    %90 = vector.load %arg11[%c0_59, %c10_60] : memref<8x120xbf16, #tpu.memory_space<vmem>>, vector<8x80xbf16>
    %c8_61 = arith.constant 8 : index
    %c0_62 = arith.constant 0 : index
    %91 = vector.load %arg13[%c8_61, %c0_62] : memref<72x80xbf16, #tpu.memory_space<vmem>>, vector<8x80xbf16>
    tpu.vector_store %arg13[%c8_61, %c0_62], %90 {strides = array<i32>} : memref<72x80xbf16, #tpu.memory_space<vmem>>, vector<8x80xbf16>,
    %c0_63 = arith.constant 0 : index
    %c11_64 = arith.constant 11 : index
    %92 = vector.load %arg11[%c0_63, %c11_64] : memref<8x120xbf16, #tpu.memory_space<vmem>>, vector<8x80xbf16>
    %c16_65 = arith.constant 16 : index
    %c0_66 = arith.constant 0 : index
    %93 = vector.load %arg13[%c16_65, %c0_66] : memref<72x80xbf16, #tpu.memory_space<vmem>>, vector<8x80xbf16>
    tpu.vector_store %arg13[%c16_65, %c0_66], %92 {strides = array<i32>} : memref<72x80xbf16, #tpu.memory_space<vmem>>, vector<8x80xbf16>,
    %c0_67 = arith.constant 0 : index
    %c19_68 = arith.constant 19 : index
    %94 = vector.load %arg11[%c0_67, %c19_68] : memref<8x120xbf16, #tpu.memory_space<vmem>>, vector<8x80xbf16>
    %c24_69 = arith.constant 24 : index
    %c0_70 = arith.constant 0 : index
    %95 = vector.load %arg13[%c24_69, %c0_70] : memref<72x80xbf16, #tpu.memory_space<vmem>>, vector<8x80xbf16>
    tpu.vector_store %arg13[%c24_69, %c0_70], %94 {strides = array<i32>} : memref<72x80xbf16, #tpu.memory_space<vmem>>, vector<8x80xbf16>,
    %c0_71 = arith.constant 0 : index
    %c20_72 = arith.constant 20 : index
    %96 = vector.load %arg11[%c0_71, %c20_72] : memref<8x120xbf16, #tpu.memory_space<vmem>>, vector<8x80xbf16>
    %c32_73 = arith.constant 32 : index
    %c0_74 = arith.constant 0 : index
    %97 = vector.load %arg13[%c32_73, %c0_74] : memref<72x80xbf16, #tpu.memory_space<vmem>>, vector<8x80xbf16>
    tpu.vector_store %arg13[%c32_73, %c0_74], %96 {strides = array<i32>} : memref<72x80xbf16, #tpu.memory_space<vmem>>, vector<8x80xbf16>,
    %c0_75 = arith.constant 0 : index
    %c21_76 = arith.constant 21 : index
    %98 = vector.load %arg11[%c0_75, %c21_76] : memref<8x120xbf16, #tpu.memory_space<vmem>>, vector<8x80xbf16>
    %c40_77 = arith.constant 40 : index
    %c0_78 = arith.constant 0 : index
    %99 = vector.load %arg13[%c40_77, %c0_78] : memref<72x80xbf16, #tpu.memory_space<vmem>>, vector<8x80xbf16>
    tpu.vector_store %arg13[%c40_77, %c0_78], %98 {strides = array<i32>} : memref<72x80xbf16, #tpu.memory_space<vmem>>, vector<8x80xbf16>,
    %c0_79 = arith.constant 0 : index
    %c29_80 = arith.constant 29 : index
    %100 = vector.load %arg11[%c0_79, %c29_80] : memref<8x120xbf16, #tpu.memory_space<vmem>>, vector<8x80xbf16>
    %c48_81 = arith.constant 48 : index
    %c0_82 = arith.constant 0 : index
    %101 = vector.load %arg13[%c48_81, %c0_82] : memref<72x80xbf16, #tpu.memory_space<vmem>>, vector<8x80xbf16>
    tpu.vector_store %arg13[%c48_81, %c0_82], %100 {strides = array<i32>} : memref<72x80xbf16, #tpu.memory_space<vmem>>, vector<8x80xbf16>,
    %c0_83 = arith.constant 0 : index
    %c30_84 = arith.constant 30 : index
    %102 = vector.load %arg11[%c0_83, %c30_84] : memref<8x120xbf16, #tpu.memory_space<vmem>>, vector<8x80xbf16>
    %c56_85 = arith.constant 56 : index
    %c0_86 = arith.constant 0 : index
    %103 = vector.load %arg13[%c56_85, %c0_86] : memref<72x80xbf16, #tpu.memory_space<vmem>>, vector<8x80xbf16>
    tpu.vector_store %arg13[%c56_85, %c0_86], %102 {strides = array<i32>} : memref<72x80xbf16, #tpu.memory_space<vmem>>, vector<8x80xbf16>,
    %c0_87 = arith.constant 0 : index
    %c31_88 = arith.constant 31 : index
    %104 = vector.load %arg11[%c0_87, %c31_88] : memref<8x120xbf16, #tpu.memory_space<vmem>>, vector<8x80xbf16>
    %c64_89 = arith.constant 64 : index
    %c0_90 = arith.constant 0 : index
    %105 = vector.load %arg13[%c64_89, %c0_90] : memref<72x80xbf16, #tpu.memory_space<vmem>>, vector<8x80xbf16>
    tpu.vector_store %arg13[%c64_89, %c0_90], %104 {strides = array<i32>} : memref<72x80xbf16, #tpu.memory_space<vmem>>, vector<8x80xbf16>,
    %c0_91 = arith.constant 0 : index
    %c0_92 = arith.constant 0 : index
    %106 = vector.load %arg4[%c0_91, %c0_92] : memref<8x72xbf16, #tpu.memory_space<vmem>>, vector<8x72xbf16>
    %c0_93 = arith.constant 0 : index
    %c0_94 = arith.constant 0 : index
    %107 = vector.load %arg13[%c0_93, %c0_94] : memref<72x80xbf16, #tpu.memory_space<vmem>>, vector<72x80xbf16>
    %cst_95 = arith.constant dense<0.000000e+00> : vector<8x80xf32>
    %108 = tpu.matmul %106, %107, %cst_95 {dimension_numbers = #tpu.dot_dimension_numbers<[1], [0], [0], [1], [0, 0, 1, 1], [], []>} : vector<8x72xbf16>, vector<72x80xbf16>, vector<8x80xf32> -> vector<8x80xf32>
    %c0_96 = arith.constant 0 : index
    %c0_97 = arith.constant 0 : index
    %109 = vector.load %arg5[%c0_96, %c0_97] : memref<8x1xf32, #tpu.memory_space<vmem>>, vector<8x1xf32>
    %110 = vector.broadcast %109 : vector<8x1xf32> to vector<8x80xf32>
    %111 = arith.addf %108, %110 : vector<8x80xf32>
    %cst_98 = arith.constant 0.000000e+00 : f32
    %112 = vector.broadcast %cst_98 : f32 to vector<8x80xf32>
    %113 = arith.maximumf %111, %112 : vector<8x80xf32>
    %cst_99 = arith.constant 0.000000e+00 : f32
    %114 = vector.shape_cast %30 : vector<1x80xi1> to vector<1x80xi1>
    %115 = vector.broadcast %114 : vector<1x80xi1> to vector<8x80xi1>
    %116 = vector.broadcast %cst_99 : f32 to vector<8x80xf32>
    %117 = arith.select %115, %113, %116 : vector<8x80xi1>, vector<8x80xf32>
    %118 = arith.truncf %117 : vector<8x80xf32> to vector<8x80xbf16>
    %c0_100 = arith.constant 0 : index
    %c20_101 = arith.constant 20 : index
    %119 = vector.load %arg12[%c0_100, %c20_101] : memref<8x120xbf16, #tpu.memory_space<vmem>>, vector<8x80xbf16>
    tpu.vector_store %arg12[%c0_100, %c20_101], %118 {strides = array<i32>} : memref<8x120xbf16, #tpu.memory_space<vmem>>, vector<8x80xbf16>,
    %c0_102 = arith.constant 0 : index
    %c9_103 = arith.constant 9 : index
    %120 = vector.load %arg12[%c0_102, %c9_103] : memref<8x120xbf16, #tpu.memory_space<vmem>>, vector<8x80xbf16>
    %c0_104 = arith.constant 0 : index
    %c0_105 = arith.constant 0 : index
    %121 = vector.load %arg13[%c0_104, %c0_105] : memref<72x80xbf16, #tpu.memory_space<vmem>>, vector<8x80xbf16>
    tpu.vector_store %arg13[%c0_104, %c0_105], %120 {strides = array<i32>} : memref<72x80xbf16, #tpu.memory_space<vmem>>, vector<8x80xbf16>,
    %c0_106 = arith.constant 0 : index
    %c10_107 = arith.constant 10 : index
    %122 = vector.load %arg12[%c0_106, %c10_107] : memref<8x120xbf16, #tpu.memory_space<vmem>>, vector<8x80xbf16>
    %c8_108 = arith.constant 8 : index
    %c0_109 = arith.constant 0 : index
    %123 = vector.load %arg13[%c8_108, %c0_109] : memref<72x80xbf16, #tpu.memory_space<vmem>>, vector<8x80xbf16>
    tpu.vector_store %arg13[%c8_108, %c0_109], %122 {strides = array<i32>} : memref<72x80xbf16, #tpu.memory_space<vmem>>, vector<8x80xbf16>,
    %c0_110 = arith.constant 0 : index
    %c11_111 = arith.constant 11 : index
    %124 = vector.load %arg12[%c0_110, %c11_111] : memref<8x120xbf16, #tpu.memory_space<vmem>>, vector<8x80xbf16>
    %c16_112 = arith.constant 16 : index
    %c0_113 = arith.constant 0 : index
    %125 = vector.load %arg13[%c16_112, %c0_113] : memref<72x80xbf16, #tpu.memory_space<vmem>>, vector<8x80xbf16>
    tpu.vector_store %arg13[%c16_112, %c0_113], %124 {strides = array<i32>} : memref<72x80xbf16, #tpu.memory_space<vmem>>, vector<8x80xbf16>,
    %c0_114 = arith.constant 0 : index
    %c19_115 = arith.constant 19 : index
    %126 = vector.load %arg12[%c0_114, %c19_115] : memref<8x120xbf16, #tpu.memory_space<vmem>>, vector<8x80xbf16>
    %c24_116 = arith.constant 24 : index
    %c0_117 = arith.constant 0 : index
    %127 = vector.load %arg13[%c24_116, %c0_117] : memref<72x80xbf16, #tpu.memory_space<vmem>>, vector<8x80xbf16>
    tpu.vector_store %arg13[%c24_116, %c0_117], %126 {strides = array<i32>} : memref<72x80xbf16, #tpu.memory_space<vmem>>, vector<8x80xbf16>,
    %c0_118 = arith.constant 0 : index
    %c20_119 = arith.constant 20 : index
    %128 = vector.load %arg12[%c0_118, %c20_119] : memref<8x120xbf16, #tpu.memory_space<vmem>>, vector<8x80xbf16>
    %c32_120 = arith.constant 32 : index
    %c0_121 = arith.constant 0 : index
    %129 = vector.load %arg13[%c32_120, %c0_121] : memref<72x80xbf16, #tpu.memory_space<vmem>>, vector<8x80xbf16>
    tpu.vector_store %arg13[%c32_120, %c0_121], %128 {strides = array<i32>} : memref<72x80xbf16, #tpu.memory_space<vmem>>, vector<8x80xbf16>,
    %c0_122 = arith.constant 0 : index
    %c21_123 = arith.constant 21 : index
    %130 = vector.load %arg12[%c0_122, %c21_123] : memref<8x120xbf16, #tpu.memory_space<vmem>>, vector<8x80xbf16>
    %c40_124 = arith.constant 40 : index
    %c0_125 = arith.constant 0 : index
    %131 = vector.load %arg13[%c40_124, %c0_125] : memref<72x80xbf16, #tpu.memory_space<vmem>>, vector<8x80xbf16>
    tpu.vector_store %arg13[%c40_124, %c0_125], %130 {strides = array<i32>} : memref<72x80xbf16, #tpu.memory_space<vmem>>, vector<8x80xbf16>,
    %c0_126 = arith.constant 0 : index
    %c29_127 = arith.constant 29 : index
    %132 = vector.load %arg12[%c0_126, %c29_127] : memref<8x120xbf16, #tpu.memory_space<vmem>>, vector<8x80xbf16>
    %c48_128 = arith.constant 48 : index
    %c0_129 = arith.constant 0 : index
    %133 = vector.load %arg13[%c48_128, %c0_129] : memref<72x80xbf16, #tpu.memory_space<vmem>>, vector<8x80xbf16>
    tpu.vector_store %arg13[%c48_128, %c0_129], %132 {strides = array<i32>} : memref<72x80xbf16, #tpu.memory_space<vmem>>, vector<8x80xbf16>,
    %c0_130 = arith.constant 0 : index
    %c30_131 = arith.constant 30 : index
    %134 = vector.load %arg12[%c0_130, %c30_131] : memref<8x120xbf16, #tpu.memory_space<vmem>>, vector<8x80xbf16>
    %c56_132 = arith.constant 56 : index
    %c0_133 = arith.constant 0 : index
    %135 = vector.load %arg13[%c56_132, %c0_133] : memref<72x80xbf16, #tpu.memory_space<vmem>>, vector<8x80xbf16>
    tpu.vector_store %arg13[%c56_132, %c0_133], %134 {strides = array<i32>} : memref<72x80xbf16, #tpu.memory_space<vmem>>, vector<8x80xbf16>,
    %c0_134 = arith.constant 0 : index
    %c31_135 = arith.constant 31 : index
    %136 = vector.load %arg12[%c0_134, %c31_135] : memref<8x120xbf16, #tpu.memory_space<vmem>>, vector<8x80xbf16>
    %c64_136 = arith.constant 64 : index
    %c0_137 = arith.constant 0 : index
    %137 = vector.load %arg13[%c64_136, %c0_137] : memref<72x80xbf16, #tpu.memory_space<vmem>>, vector<8x80xbf16>
    tpu.vector_store %arg13[%c64_136, %c0_137], %136 {strides = array<i32>} : memref<72x80xbf16, #tpu.memory_space<vmem>>, vector<8x80xbf16>,
    %c0_138 = arith.constant 0 : index
    %c0_139 = arith.constant 0 : index
    %138 = vector.load %arg6[%c0_138, %c0_139] : memref<8x72xbf16, #tpu.memory_space<vmem>>, vector<8x72xbf16>
    %c0_140 = arith.constant 0 : index
    %c0_141 = arith.constant 0 : index
    %139 = vector.load %arg13[%c0_140, %c0_141] : memref<72x80xbf16, #tpu.memory_space<vmem>>, vector<72x80xbf16>
    %cst_142 = arith.constant dense<0.000000e+00> : vector<8x80xf32>
    %140 = tpu.matmul %138, %139, %cst_142 {dimension_numbers = #tpu.dot_dimension_numbers<[1], [0], [0], [1], [0, 0, 1, 1], [], []>} : vector<8x72xbf16>, vector<72x80xbf16>, vector<8x80xf32> -> vector<8x80xf32>
    %c0_143 = arith.constant 0 : index
    %c0_144 = arith.constant 0 : index
    %141 = vector.load %arg7[%c0_143, %c0_144] : memref<8x1xf32, #tpu.memory_space<vmem>>, vector<8x1xf32>
    %142 = vector.broadcast %141 : vector<8x1xf32> to vector<8x80xf32>
    %143 = arith.addf %140, %142 : vector<8x80xf32>
    %cst_145 = arith.constant 0.000000e+00 : f32
    %144 = vector.shape_cast %30 : vector<1x80xi1> to vector<1x80xi1>
    %145 = vector.broadcast %144 : vector<1x80xi1> to vector<8x80xi1>
    %146 = vector.broadcast %cst_145 : f32 to vector<8x80xf32>
    %147 = arith.select %145, %143, %146 : vector<8x80xi1>, vector<8x80xf32>
    %148 = arith.truncf %147 : vector<8x80xf32> to vector<8x80xbf16>
    %c0_146 = arith.constant 0 : index
    %c20_147 = arith.constant 20 : index
    %149 = vector.load %arg11[%c0_146, %c20_147] : memref<8x120xbf16, #tpu.memory_space<vmem>>, vector<8x80xbf16>
    tpu.vector_store %arg11[%c0_146, %c20_147], %148 {strides = array<i32>} : memref<8x120xbf16, #tpu.memory_space<vmem>>, vector<8x80xbf16>,
    %c0_148 = arith.constant 0 : index
    %c9_149 = arith.constant 9 : index
    %150 = vector.load %arg11[%c0_148, %c9_149] : memref<8x120xbf16, #tpu.memory_space<vmem>>, vector<8x80xbf16>
    %c0_150 = arith.constant 0 : index
    %c0_151 = arith.constant 0 : index
    %151 = vector.load %arg13[%c0_150, %c0_151] : memref<72x80xbf16, #tpu.memory_space<vmem>>, vector<8x80xbf16>
    tpu.vector_store %arg13[%c0_150, %c0_151], %150 {strides = array<i32>} : memref<72x80xbf16, #tpu.memory_space<vmem>>, vector<8x80xbf16>,
    %c0_152 = arith.constant 0 : index
    %c10_153 = arith.constant 10 : index
    %152 = vector.load %arg11[%c0_152, %c10_153] : memref<8x120xbf16, #tpu.memory_space<vmem>>, vector<8x80xbf16>
    %c8_154 = arith.constant 8 : index
    %c0_155 = arith.constant 0 : index
    %153 = vector.load %arg13[%c8_154, %c0_155] : memref<72x80xbf16, #tpu.memory_space<vmem>>, vector<8x80xbf16>
    tpu.vector_store %arg13[%c8_154, %c0_155], %152 {strides = array<i32>} : memref<72x80xbf16, #tpu.memory_space<vmem>>, vector<8x80xbf16>,
    %c0_156 = arith.constant 0 : index
    %c11_157 = arith.constant 11 : index
    %154 = vector.load %arg11[%c0_156, %c11_157] : memref<8x120xbf16, #tpu.memory_space<vmem>>, vector<8x80xbf16>
    %c16_158 = arith.constant 16 : index
    %c0_159 = arith.constant 0 : index
    %155 = vector.load %arg13[%c16_158, %c0_159] : memref<72x80xbf16, #tpu.memory_space<vmem>>, vector<8x80xbf16>
    tpu.vector_store %arg13[%c16_158, %c0_159], %154 {strides = array<i32>} : memref<72x80xbf16, #tpu.memory_space<vmem>>, vector<8x80xbf16>,
    %c0_160 = arith.constant 0 : index
    %c19_161 = arith.constant 19 : index
    %156 = vector.load %arg11[%c0_160, %c19_161] : memref<8x120xbf16, #tpu.memory_space<vmem>>, vector<8x80xbf16>
    %c24_162 = arith.constant 24 : index
    %c0_163 = arith.constant 0 : index
    %157 = vector.load %arg13[%c24_162, %c0_163] : memref<72x80xbf16, #tpu.memory_space<vmem>>, vector<8x80xbf16>
    tpu.vector_store %arg13[%c24_162, %c0_163], %156 {strides = array<i32>} : memref<72x80xbf16, #tpu.memory_space<vmem>>, vector<8x80xbf16>,
    %c0_164 = arith.constant 0 : index
    %c20_165 = arith.constant 20 : index
    %158 = vector.load %arg11[%c0_164, %c20_165] : memref<8x120xbf16, #tpu.memory_space<vmem>>, vector<8x80xbf16>
    %c32_166 = arith.constant 32 : index
    %c0_167 = arith.constant 0 : index
    %159 = vector.load %arg13[%c32_166, %c0_167] : memref<72x80xbf16, #tpu.memory_space<vmem>>, vector<8x80xbf16>
    tpu.vector_store %arg13[%c32_166, %c0_167], %158 {strides = array<i32>} : memref<72x80xbf16, #tpu.memory_space<vmem>>, vector<8x80xbf16>,
    %c0_168 = arith.constant 0 : index
    %c21_169 = arith.constant 21 : index
    %160 = vector.load %arg11[%c0_168, %c21_169] : memref<8x120xbf16, #tpu.memory_space<vmem>>, vector<8x80xbf16>
    %c40_170 = arith.constant 40 : index
    %c0_171 = arith.constant 0 : index
    %161 = vector.load %arg13[%c40_170, %c0_171] : memref<72x80xbf16, #tpu.memory_space<vmem>>, vector<8x80xbf16>
    tpu.vector_store %arg13[%c40_170, %c0_171], %160 {strides = array<i32>} : memref<72x80xbf16, #tpu.memory_space<vmem>>, vector<8x80xbf16>,
    %c0_172 = arith.constant 0 : index
    %c29_173 = arith.constant 29 : index
    %162 = vector.load %arg11[%c0_172, %c29_173] : memref<8x120xbf16, #tpu.memory_space<vmem>>, vector<8x80xbf16>
    %c48_174 = arith.constant 48 : index
    %c0_175 = arith.constant 0 : index
    %163 = vector.load %arg13[%c48_174, %c0_175] : memref<72x80xbf16, #tpu.memory_space<vmem>>, vector<8x80xbf16>
    tpu.vector_store %arg13[%c48_174, %c0_175], %162 {strides = array<i32>} : memref<72x80xbf16, #tpu.memory_space<vmem>>, vector<8x80xbf16>,
    %c0_176 = arith.constant 0 : index
    %c30_177 = arith.constant 30 : index
    %164 = vector.load %arg11[%c0_176, %c30_177] : memref<8x120xbf16, #tpu.memory_space<vmem>>, vector<8x80xbf16>
    %c56_178 = arith.constant 56 : index
    %c0_179 = arith.constant 0 : index
    %165 = vector.load %arg13[%c56_178, %c0_179] : memref<72x80xbf16, #tpu.memory_space<vmem>>, vector<8x80xbf16>
    tpu.vector_store %arg13[%c56_178, %c0_179], %164 {strides = array<i32>} : memref<72x80xbf16, #tpu.memory_space<vmem>>, vector<8x80xbf16>,
    %c0_180 = arith.constant 0 : index
    %c31_181 = arith.constant 31 : index
    %166 = vector.load %arg11[%c0_180, %c31_181] : memref<8x120xbf16, #tpu.memory_space<vmem>>, vector<8x80xbf16>
    %c64_182 = arith.constant 64 : index
    %c0_183 = arith.constant 0 : index
    %167 = vector.load %arg13[%c64_182, %c0_183] : memref<72x80xbf16, #tpu.memory_space<vmem>>, vector<8x80xbf16>
    tpu.vector_store %arg13[%c64_182, %c0_183], %166 {strides = array<i32>} : memref<72x80xbf16, #tpu.memory_space<vmem>>, vector<8x80xbf16>,
    %c0_184 = arith.constant 0 : index
    %c0_185 = arith.constant 0 : index
    %168 = vector.load %arg8[%c0_184, %c0_185] : memref<8x72xbf16, #tpu.memory_space<vmem>>, vector<8x72xbf16>
    %c0_186 = arith.constant 0 : index
    %c0_187 = arith.constant 0 : index
    %169 = vector.load %arg13[%c0_186, %c0_187] : memref<72x80xbf16, #tpu.memory_space<vmem>>, vector<72x80xbf16>
    %cst_188 = arith.constant dense<0.000000e+00> : vector<8x80xf32>
    %170 = tpu.matmul %168, %169, %cst_188 {dimension_numbers = #tpu.dot_dimension_numbers<[1], [0], [0], [1], [0, 0, 1, 1], [], []>} : vector<8x72xbf16>, vector<72x80xbf16>, vector<8x80xf32> -> vector<8x80xf32>
    %c0_189 = arith.constant 0 : index
    %c0_190 = arith.constant 0 : index
    %171 = vector.load %arg9[%c0_189, %c0_190] : memref<8x1xf32, #tpu.memory_space<vmem>>, vector<8x1xf32>
    %172 = vector.broadcast %171 : vector<8x1xf32> to vector<8x80xf32>
    %173 = arith.addf %170, %172 : vector<8x80xf32>
    %cst_191 = arith.constant 0.000000e+00 : f32
    %174 = vector.broadcast %cst_191 : f32 to vector<8x80xf32>
    %175 = arith.maximumf %173, %174 : vector<8x80xf32>
    %176 = arith.truncf %175 : vector<8x80xf32> to vector<8x80xbf16>
    %177 = vector.extract_strided_slice %176 {offsets = [0, 0], sizes = [8, 10], strides = [1, 1]} : vector<8x80xbf16> to vector<8x10xbf16>
    %178 = vector.extract_strided_slice %176 {offsets = [0, 10], sizes = [8, 10], strides = [1, 1]} : vector<8x80xbf16> to vector<8x10xbf16>
    %179 = arith.maximumf %177, %178 : vector<8x10xbf16>
    %c0_192 = arith.constant 0 : index
    %c0_193 = arith.constant 0 : index
    %180 = vector.load %arg14[%c0_192, %c0_193] : memref<32x10xbf16, #tpu.memory_space<vmem>>, vector<8x10xbf16>
    tpu.vector_store %arg14[%c0_192, %c0_193], %179 {strides = array<i32>} : memref<32x10xbf16, #tpu.memory_space<vmem>>, vector<8x10xbf16>,
    %181 = vector.extract_strided_slice %176 {offsets = [0, 20], sizes = [8, 10], strides = [1, 1]} : vector<8x80xbf16> to vector<8x10xbf16>
    %182 = vector.extract_strided_slice %176 {offsets = [0, 30], sizes = [8, 10], strides = [1, 1]} : vector<8x80xbf16> to vector<8x10xbf16>
    %183 = arith.maximumf %181, %182 : vector<8x10xbf16>
    %c8_194 = arith.constant 8 : index
    %c0_195 = arith.constant 0 : index
    %184 = vector.load %arg14[%c8_194, %c0_195] : memref<32x10xbf16, #tpu.memory_space<vmem>>, vector<8x10xbf16>
    tpu.vector_store %arg14[%c8_194, %c0_195], %183 {strides = array<i32>} : memref<32x10xbf16, #tpu.memory_space<vmem>>, vector<8x10xbf16>,
    %185 = vector.extract_strided_slice %176 {offsets = [0, 40], sizes = [8, 10], strides = [1, 1]} : vector<8x80xbf16> to vector<8x10xbf16>
    %186 = vector.extract_strided_slice %176 {offsets = [0, 50], sizes = [8, 10], strides = [1, 1]} : vector<8x80xbf16> to vector<8x10xbf16>
    %187 = arith.maximumf %185, %186 : vector<8x10xbf16>
    %c16_196 = arith.constant 16 : index
    %c0_197 = arith.constant 0 : index
    %188 = vector.load %arg14[%c16_196, %c0_197] : memref<32x10xbf16, #tpu.memory_space<vmem>>, vector<8x10xbf16>
    tpu.vector_store %arg14[%c16_196, %c0_197], %187 {strides = array<i32>} : memref<32x10xbf16, #tpu.memory_space<vmem>>, vector<8x10xbf16>,
    %189 = vector.extract_strided_slice %176 {offsets = [0, 60], sizes = [8, 10], strides = [1, 1]} : vector<8x80xbf16> to vector<8x10xbf16>
    %190 = vector.extract_strided_slice %176 {offsets = [0, 70], sizes = [8, 10], strides = [1, 1]} : vector<8x80xbf16> to vector<8x10xbf16>
    %191 = arith.maximumf %189, %190 : vector<8x10xbf16>
    %c24_198 = arith.constant 24 : index
    %c0_199 = arith.constant 0 : index
    %192 = vector.load %arg14[%c24_198, %c0_199] : memref<32x10xbf16, #tpu.memory_space<vmem>>, vector<8x10xbf16>
    tpu.vector_store %arg14[%c24_198, %c0_199], %191 {strides = array<i32>} : memref<32x10xbf16, #tpu.memory_space<vmem>>, vector<8x10xbf16>,
    %c0_200 = arith.constant 0 : index
    %c0_201 = arith.constant 0 : index
    %193 = vector.load %arg14[%c0_200, %c0_201] : memref<32x10xbf16, #tpu.memory_space<vmem>>, vector<32x10xbf16>
    %cst_202 = arith.constant dense<0.000000e+00> : vector<32x4xf32>
    %194 = tpu.matmul %193, %40, %cst_202 {dimension_numbers = #tpu.dot_dimension_numbers<[1], [0], [0], [1], [0, 0, 1, 1], [], []>} : vector<32x10xbf16>, vector<10x4xbf16>, vector<32x4xf32> -> vector<32x4xf32>
    %cst_203 = arith.constant dense<0.000000e+00> : vector<32x4xf32>
    %195 = tpu.matmul %193, %48, %cst_203 {dimension_numbers = #tpu.dot_dimension_numbers<[1], [0], [0], [1], [0, 0, 1, 1], [], []>} : vector<32x10xbf16>, vector<10x4xbf16>, vector<32x4xf32> -> vector<32x4xf32>
    %196 = arith.maximumf %194, %195 : vector<32x4xf32>
    %197 = arith.truncf %196 : vector<32x4xf32> to vector<32x4xbf16>
    %198 = vector.extract_strided_slice %197 {offsets = [0, 0], sizes = [8, 4], strides = [1, 1]} : vector<32x4xbf16> to vector<8x4xbf16>
    %c0_204 = arith.constant 0 : index
    %c0_205 = arith.constant 0 : index
    %c13 = arith.constant 13 : index
    %199 = vector.load %arg10[%c0_204, %c0_205, %c13] : memref<1x8x48xbf16, #tpu.memory_space<vmem>>, vector<1x8x4xbf16>
    %200 = vector.shape_cast %199 : vector<1x8x4xbf16> to vector<8x4xbf16>
    %201 = vector.shape_cast %198 : vector<8x4xbf16> to vector<1x8x4xbf16>
    tpu.vector_store %arg10[%c0_204, %c0_205, %c13], %201 {strides = array<i32>} : memref<1x8x48xbf16, #tpu.memory_space<vmem>>, vector<1x8x4xbf16>,
    %202 = vector.extract_strided_slice %197 {offsets = [8, 0], sizes = [8, 4], strides = [1, 1]} : vector<32x4xbf16> to vector<8x4xbf16>
    %c0_206 = arith.constant 0 : index
    %c0_207 = arith.constant 0 : index
    %c19_208 = arith.constant 19 : index
    %203 = vector.load %arg10[%c0_206, %c0_207, %c19_208] : memref<1x8x48xbf16, #tpu.memory_space<vmem>>, vector<1x8x4xbf16>
    %204 = vector.shape_cast %203 : vector<1x8x4xbf16> to vector<8x4xbf16>
    %205 = vector.shape_cast %202 : vector<8x4xbf16> to vector<1x8x4xbf16>
    tpu.vector_store %arg10[%c0_206, %c0_207, %c19_208], %205 {strides = array<i32>} : memref<1x8x48xbf16, #tpu.memory_space<vmem>>, vector<1x8x4xbf16>,
    %206 = vector.extract_strided_slice %197 {offsets = [16, 0], sizes = [8, 4], strides = [1, 1]} : vector<32x4xbf16> to vector<8x4xbf16>
    %c0_209 = arith.constant 0 : index
    %c0_210 = arith.constant 0 : index
    %c25 = arith.constant 25 : index
    %207 = vector.load %arg10[%c0_209, %c0_210, %c25] : memref<1x8x48xbf16, #tpu.memory_space<vmem>>, vector<1x8x4xbf16>
    %208 = vector.shape_cast %207 : vector<1x8x4xbf16> to vector<8x4xbf16>
    %209 = vector.shape_cast %206 : vector<8x4xbf16> to vector<1x8x4xbf16>
    tpu.vector_store %arg10[%c0_209, %c0_210, %c25], %209 {strides = array<i32>} : memref<1x8x48xbf16, #tpu.memory_space<vmem>>, vector<1x8x4xbf16>,
    %210 = vector.extract_strided_slice %197 {offsets = [24, 0], sizes = [8, 4], strides = [1, 1]} : vector<32x4xbf16> to vector<8x4xbf16>
    %c0_211 = arith.constant 0 : index
    %c0_212 = arith.constant 0 : index
    %c31_213 = arith.constant 31 : index
    %211 = vector.load %arg10[%c0_211, %c0_212, %c31_213] : memref<1x8x48xbf16, #tpu.memory_space<vmem>>, vector<1x8x4xbf16>
    %212 = vector.shape_cast %211 : vector<1x8x4xbf16> to vector<8x4xbf16>
    %213 = vector.shape_cast %210 : vector<8x4xbf16> to vector<1x8x4xbf16>
    tpu.vector_store %arg10[%c0_211, %c0_212, %c31_213], %213 {strides = array<i32>} : memref<1x8x48xbf16, #tpu.memory_space<vmem>>, vector<1x8x4xbf16>,
    return
  }
  func.func @transform_0(%arg0: i32) -> (i32, i32, i32) {
    %c0_i32 = arith.constant 0 : i32
    %c0_i32_0 = arith.constant 0 : i32
    %c0_i32_1 = arith.constant 0 : i32
    return %arg0, %c0_i32, %c0_i32_0 : i32, i32, i32
  }
  func.func @transform_1(%arg0: i32) -> (i32, i32) {
    %c0_i32 = arith.constant 0 : i32
    %c0_i32_0 = arith.constant 0 : i32
    %c0_i32_1 = arith.constant 0 : i32
    return %c0_i32, %c0_i32_0 : i32, i32
  }
  func.func @transform_2(%arg0: i32) -> (i32, i32) {
    %c0_i32 = arith.constant 0 : i32
    %c0_i32_0 = arith.constant 0 : i32
    %c0_i32_1 = arith.constant 0 : i32
    return %c0_i32, %c0_i32_0 : i32, i32
  }
  func.func @transform_3(%arg0: i32) -> (i32, i32) {
    %c0_i32 = arith.constant 0 : i32
    %c0_i32_0 = arith.constant 0 : i32
    %c0_i32_1 = arith.constant 0 : i32
    return %c0_i32, %c0_i32_0 : i32, i32
  }
  func.func @transform_4(%arg0: i32) -> (i32, i32) {
    %c0_i32 = arith.constant 0 : i32
    %c0_i32_0 = arith.constant 0 : i32
    %c0_i32_1 = arith.constant 0 : i32
    return %c0_i32, %c0_i32_0 : i32, i32
  }
  func.func @transform_5(%arg0: i32) -> (i32, i32) {
    %c0_i32 = arith.constant 0 : i32
    %c0_i32_0 = arith.constant 0 : i32
    %c0_i32_1 = arith.constant 0 : i32
    return %c0_i32, %c0_i32_0 : i32, i32
  }
  func.func @transform_6(%arg0: i32) -> (i32, i32) {
    %c0_i32 = arith.constant 0 : i32
    %c0_i32_0 = arith.constant 0 : i32
    %c0_i32_1 = arith.constant 0 : i32
    return %c0_i32, %c0_i32_0 : i32, i32
  }
  func.func @transform_7(%arg0: i32) -> (i32, i32) {
    %c0_i32 = arith.constant 0 : i32
    %c0_i32_0 = arith.constant 0 : i32
    %c0_i32_1 = arith.constant 0 : i32
    return %c0_i32, %c0_i32_0 : i32, i32
  }
  func.func @transform_8(%arg0: i32) -> (i32, i32) {
    %c0_i32 = arith.constant 0 : i32
    %c0_i32_0 = arith.constant 0 : i32
    %c0_i32_1 = arith.constant 0 : i32
    return %c0_i32, %c0_i32_0 : i32, i32
  }
  func.func @transform_9(%arg0: i32) -> (i32, i32, i32) {
    %c0_i32 = arith.constant 0 : i32
    %c0_i32_0 = arith.constant 0 : i32
    %c0_i32_1 = arith.constant 0 : i32
    return %arg0, %c0_i32, %c0_i32_0 : i32, i32, i32
  }
}

module attributes {stable_mosaic.version = 11 : i64} {
  func.func @_linear_kernel(%arg0: i32, %arg1: memref<2x128xbf16, #tpu.memory_space<vmem>>, %arg2: memref<128x10xbf16, #tpu.memory_space<vmem>>, %arg3: memref<1x10xf32, #tpu.memory_space<vmem>>, %arg4: memref<2x10xf32, #tpu.memory_space<vmem>>) attributes {dimension_semantics = [#tpu.dimension_semantics<arbitrary>], iteration_bounds = array<i64: 3>, scalar_prefetch = 0 : i64, scratch_operands = 0 : i64, tpu.core_type = #tpu.core_type<tc>, window_params = [{transform_indices = @transform_0, window_bounds = array<i64: 2, 128>}, {transform_indices = @transform_1, window_bounds = array<i64: 128, 10>}, {pipeline_mode = #tpu.pipeline_mode<synchronous>, transform_indices = @transform_2, window_bounds = array<i64: 1, 10>}, {pipeline_mode = #tpu.pipeline_mode<synchronous>, transform_indices = @transform_3, window_bounds = array<i64: 2, 10>}]} {
    %c0_i32 = arith.constant 0 : i32
    %0 = arith.cmpi eq, %arg0, %c0_i32 : i32
    %1 = arith.extui %0 : i1 to i32
    %c0_i32_0 = arith.constant 0 : i32
    %2 = arith.cmpi ne, %1, %c0_i32_0 : i32
    scf.if %2 {
      %c0_8 = arith.constant 0 : index
      %c0_9 = arith.constant 0 : index
      %9 = vector.load %arg3[%c0_8, %c0_9] : memref<1x10xf32, #tpu.memory_space<vmem>>, vector<1x10xf32>
      %10 = vector.shape_cast %9 : vector<1x10xf32> to vector<1x10xf32>
      %11 = vector.broadcast %10 : vector<1x10xf32> to vector<2x10xf32>
      %c0_10 = arith.constant 0 : index
      %c0_11 = arith.constant 0 : index
      %12 = vector.load %arg4[%c0_10, %c0_11] : memref<2x10xf32, #tpu.memory_space<vmem>>, vector<2x10xf32>
      tpu.vector_store %arg4[%c0_10, %c0_11], %11 {strides = array<i32>} : memref<2x10xf32, #tpu.memory_space<vmem>>, vector<2x10xf32>,
    } else {
    }
    %c0 = arith.constant 0 : index
    %c0_1 = arith.constant 0 : index
    %3 = vector.load %arg4[%c0, %c0_1] : memref<2x10xf32, #tpu.memory_space<vmem>>, vector<2x10xf32>
    %c0_2 = arith.constant 0 : index
    %c0_3 = arith.constant 0 : index
    %4 = vector.load %arg1[%c0_2, %c0_3] : memref<2x128xbf16, #tpu.memory_space<vmem>>, vector<2x128xbf16>
    %c0_4 = arith.constant 0 : index
    %c0_5 = arith.constant 0 : index
    %5 = vector.load %arg2[%c0_4, %c0_5] : memref<128x10xbf16, #tpu.memory_space<vmem>>, vector<128x10xbf16>
    %cst = arith.constant dense<0.000000e+00> : vector<2x10xf32>
    %6 = tpu.matmul %4, %5, %cst {dimension_numbers = #tpu.dot_dimension_numbers<[1], [0], [0], [1], [0, 0, 1, 1], [], []>} : vector<2x128xbf16>, vector<128x10xbf16>, vector<2x10xf32> -> vector<2x10xf32>
    %7 = arith.addf %3, %6 : vector<2x10xf32>
    %c0_6 = arith.constant 0 : index
    %c0_7 = arith.constant 0 : index
    %8 = vector.load %arg4[%c0_6, %c0_7] : memref<2x10xf32, #tpu.memory_space<vmem>>, vector<2x10xf32>
    tpu.vector_store %arg4[%c0_6, %c0_7], %7 {strides = array<i32>} : memref<2x10xf32, #tpu.memory_space<vmem>>, vector<2x10xf32>,
    return
  }
  func.func @transform_0(%arg0: i32) -> (i32, i32) {
    %c0_i32 = arith.constant 0 : i32
    %c0_i32_0 = arith.constant 0 : i32
    return %c0_i32, %arg0 : i32, i32
  }
  func.func @transform_1(%arg0: i32) -> (i32, i32) {
    %c0_i32 = arith.constant 0 : i32
    %c0_i32_0 = arith.constant 0 : i32
    return %arg0, %c0_i32 : i32, i32
  }
  func.func @transform_2(%arg0: i32) -> (i32, i32) {
    %c0_i32 = arith.constant 0 : i32
    %c0_i32_0 = arith.constant 0 : i32
    %c0_i32_1 = arith.constant 0 : i32
    return %c0_i32, %c0_i32_0 : i32, i32
  }
  func.func @transform_3(%arg0: i32) -> (i32, i32) {
    %c0_i32 = arith.constant 0 : i32
    %c0_i32_0 = arith.constant 0 : i32
    %c0_i32_1 = arith.constant 0 : i32
    return %c0_i32, %c0_i32_0 : i32, i32
  }
}

</mosaic_0001>

<bundles_post_ra>
// kernel: spidey_forward.5
= control target key start
LH: loop header
LB: loop body
LE: loop exit
PB: predicated region body
PF: predicated region fallthrough
CT: control target
= control target key end

     0   :  { %8 = vsyncpa [#allocation3], 0  ;;  %s450_s12 = smov 0   ;;  %s480_s0 = inlined_call_operand.vmem [shape: bf16[2,384], index: 0, kind: input, shape index: {}]   ;;  %s481_s1 = inlined_call_operand.vmem [shape: bf16[384,10], index: 1, kind: input, shape index: {}]   ;;  %s482_s2 = inlined_call_operand.vmem [shape: f32[1,10], index: 2, kind: input, shape index: {}]   ;;  %s483_s3 = inlined_call_operand.hbm [shape: f32[2,10], index: 3, kind: output, shape index: {}]  }
   0x1 LB: > { %s456_s13 = sadd.s32 4294967295, %s427_s12   ;;  %p325_p0 = scmp.ge.s32.totalorder %s427_s12, 1  ;;  %s427_s12 = sphi %s450_s12, %s14_s12  }
   0x2   : > { %p142_p1 = scmp.lt.s32.totalorder %s427_s12, 4 }
   0x4   : > { %p143_p2 = pnand %p325_p0, %p142_p1 }
   0x5   : > { %p164_p3 = scmp.lt.s32.totalorder (!%p143_p2), %s456_s13, 2  ;;  %s326_s14 = sshll.u32 (!%p143_p2), %s456_s13, 4 }
   0x6   : > { %146 = sbr.rel (%p143_p2) target bundleno = 187 (0xbb), region = 32  ;;  %p168_p4 = scmp.lt.s32.totalorder (!%p143_p2), %s326_s14, 47 }
   0x7   : > { %p328_p5 = scmp.ne.s32.totalorder (!%p143_p2), %s456_s13, 0 }
   0xb   : > { %s165_s15 = scalar_select %p164_p3, %s456_s13, 2 }
   0xc   : > { %s485_s14 = smov (!%p168_p4, %s326_s14), 47  ;;  %176 = sbr.rel (%p328_p5) target bundleno = 19 (0x13), region = 36 }
   0xd   : > { %s166_s18 = scalar_lea.vmem %s480_s0, %s165_s15  ;;  %s327_s19 = sshll.u32 %s485_s14, 2 }
   0xe   : > { %s171_s22 = scalar_lea.vmem %s481_s1, %s327_s19 }
  0x11   : > { %v388_v0 = vld [vmem:[%s482_s2] ss:$0 sm:$0xff]  ;;  %vm181_vm0 = vcmask 74752  }
  0x12   : > { %182 = vst.msk [vmem:[#allocation2] sm:$0x3] %vm181_vm0, %v388_v0 }
  0x13 PF: > { %v372_v1 = vld [vmem:[%s171_s22 + $0x38] sm:$0xff]  ;;  %v371_v2 = vld [vmem:[%s171_s22 + $0x30] sm:$0xff]  ;;  %v370_v3 = vld [vmem:[%s171_s22 + $0x28] sm:$0xff]  ;;  %s429_s25 = smov [#allocation2]   ;;  %s273_s29 = sshll.u32 %s483_s3, 4  ;;  %vm263_vm1 = vcmask 74752   ;;  %s274_s29 = int_to_ptr.hbm [resolvable:$true] %s273_s29 }
  0x14   : > { %249 = vmatpush.bf16.msra.mxu0 %v372_v1  ;;  %v369_v4 = vld [vmem:[%s171_s22 + $0x20] sm:$0xff]  ;;  %v368_v5 = vld [vmem:[%s171_s22 + $0x18] sm:$0xff]  ;;  %v367_v6 = vld [vmem:[%s171_s22 + $0x10] sm:$0xff]  ;;  %s271_s26 = sshll.u32 %s429_s25, 4  ;;  %p377_p6 = scmp.eq.s32.totalorder %s456_s13, 2  ;;  %s272_s26 = int_to_ptr.vmem [resolvable:$true] %s271_s26 }
  0x15   : > { %v366_v7 = vld [vmem:[%s171_s22 + $0x8] sm:$0xff]  ;;  %v365_v8 = vld [vmem:[%s171_s22] sm:$0xff] }
  0x16   : > { %v184_v9 = vld [vmem:[%s166_s18] sm:$0x1] }
  0x18   : > { %250 = vmatpush.bf16.msra.mxu0 %v371_v2 }
  0x19   : > { %v183_v10 = vld [vmem:[#allocation2] sm:$0x3] }
  0x1c   : > { %251 = vmatpush.bf16.msra.mxu0 %v370_v3 }
  0x20   : > { %252 = vmatpush.bf16.msra.mxu0 %v369_v4 }
  0x24   : > { %253 = vmatpush.bf16.msra.mxu0 %v368_v5 }
  0x28   : > { %254 = vmatpush.bf16.msra.mxu0 %v367_v6 }
  0x2c   : > { %255 = vmatpush.bf16.msra.mxu0 %v366_v7 }
  0x30   : > { %256 = vmatpush.bf16.msra.mxu0 %v365_v8 }
  0x33   : > { %257 = vmatmul.bf16.vlgmr.msra.gmra.mxu0 %v184_v9 }
  0xb0   : > { %v258_v11 = vpop.f32.mrf.mxu0 }
  0xb1   : > { %v262_v12 = vadd.f32 %v258_v11, %v183_v10 }
  0xb3   : > { %264 = vst.msk [vmem:[#allocation2] sm:$0x3] %vm263_vm1, %v262_v12 }
  0xb4   : > { %374 = dma.vmem_to_hbm [thread:$0]  (%p377_p6), %s272_s26, 32, %s274_s29, [#allocation3]  }
  0xb8   : > { %v260_v13 = vpop.f32.mrf.mxu0 }
  0xb9   : > { %422 = dma.done.wait (%p377_p6), [#allocation3], 32  }
  0xba   : > { %424 = vsyncadd (%p377_p6), [#allocation3], 4294967264 }
  0xbb PF: > { %s14_s12 = sadd.s32 1, %s427_s12  }
  0xbc   : > { %p11_p7 = scmp.ge.s32.totalorder %s14_s12, 5  }
  0xbe   :  { %13 = sbr.rel (!%p11_p7) target bundleno = 1 (0x1), region = 66 }
  0xc3   :  { %287 = vsyncpa [#allocation3], 1 }
  0xc4   :  { %289 = vsyncpa [#allocation3 + $0x1], 1 }

// kernel: spidey_forward.4
= control target key start
LH: loop header
LB: loop body
LE: loop exit
PB: predicated region body
PF: predicated region fallthrough
CT: control target
= control target key end

     0   :  { %s1281_s30 = smov 0   ;;  %s1449_s0 = inlined_call_operand.vmem [shape: bf16[2,8,120], index: 0, kind: input, shape index: {}]   ;;  %s1450_s1 = inlined_call_operand.vmem [shape: bf16[8,72], index: 1, kind: input, shape index: {}]   ;;  %s1451_s2 = inlined_call_operand.vmem [shape: f32[8,1], index: 2, kind: input, shape index: {}]   ;;  %s1452_s3 = inlined_call_operand.vmem [shape: bf16[8,72], index: 3, kind: input, shape index: {}]   ;;  %s1453_s4 = inlined_call_operand.vmem [shape: f32[8,1], index: 4, kind: input, shape index: {}]   ;;  %s1454_s5 = inlined_call_operand.vmem [shape: bf16[8,72], index: 5, kind: input, shape index: {}]   ;;  %s1455_s6 = inlined_call_operand.vmem [shape: f32[8,1], index: 6, kind: input, shape index: {}]   ;;  %s1456_s7 = inlined_call_operand.vmem [shape: bf16[8,72], index: 7, kind: input, shape index: {}]   ;;  %s1457_s8 = inlined_call_operand.vmem [shape: f32[8,1], index: 8, kind: input, shape index: {}]   ;;  %s1458_s9 = inlined_call_operand.vmem [shape: bf16[2,8,48], index: 9, kind: output, shape index: {}]  }
   0x1 LB: > { %s1063_s10 = sadd.s32 4294967295, %s1211_s30   ;;  %p1067_p0 = scmp.ge.s32.totalorder %s1211_s30, 1  ;;  %s1211_s30 = sphi %s1281_s30, %s19_s30  }
   0x2   : > { %p286_p1 = scmp.lt.s32.totalorder %s1211_s30, 3 }
   0x4   : > { %p287_p2 = pnand %p1067_p0, %p286_p1 }
   0x5   : > { %p320_p3 = scmp.lt.s32.totalorder (!%p287_p2), %s1063_s10, 1  ;;  %s1213_s15 = smov (!%p287_p2), 97  }
   0x6   : > { %290 = sbr.rel (%p287_p2) target bundleno = 1985 (0x7c1), region = 56  ;;  %s1214_s16 = smov (!%p287_p2), 98  }
   0x7   : > { %s1215_s17 = smov (!%p287_p2), 107   ;;  %s1216_s18 = smov (!%p287_p2), 99  }
   0x8   : > { %s1217_s19 = smov (!%p287_p2), 108   ;;  %s1218_s20 = smov (!%p287_p2), 117  }
   0x9   : > { %s1219_s21 = smov (!%p287_p2), 109   ;;  %s1220_s22 = smov (!%p287_p2), 119  }
   0xa   : > { %s1221_s23 = smov (!%p287_p2), 118   ;;  %s1223_s28 = smov (!%p287_p2), 20  }
   0xb   : > { %s1462_s10 = smov (!%p320_p3, %s1063_s10), 1  ;;  %vm401_vm0 = vcmask 650240   ;;  %v461_v14 = vld [vmem:[%s1451_s2] sm:$0xff]  ;;  %v1222_v15 = vmov 0   ;;  %vm498_vm1 = vcmask 1043456   ;;  %vm494_vm2 = vcmask 588800  }
   0xc   : > { %s1068_s11 = sshll.u32 %s1462_s10, 2  ;;  %1202 = vset.pattern.permute.xlu0 %v1222_v15  ;;  %1203 = vset.pattern.permute.xlu2 %v1222_v15  ;;  %v451_v28 = vld [vmem:[%s1450_s1] sm:$0xf]  ;;  %v337_v29 = vlaneseq  ;;  %vm329_vm5 = vcmask 158720   ;;  %vm331_vm6 = vcmask 978720   ;;  %vm523_vm13 = vcmask 814240  }
   0xd   : > { %s323_s14 = scalar_lea.vmem %s1449_s0, %s1068_s11  ;;  %1204 = vset.pattern.permute.xlu1 %v1222_v15  ;;  %330 = vst.msk [vmem:[#allocation2] sm:$0xf] %vm329_vm5, %v1222_v15  ;;  %vm897_vm14 = vcmask 76800   ;;  %vm933_vm15 = vcmask 1044480   ;;  %s1228_s29 = smov 19  }
   0xe   : > { %v445_v0 = vld [vmem:[%s323_s14] sm:$0xf]  ;;  %v1327_v30 = vand.u32 127, %v337_v29  ;;  %332 = vst.msk [vmem:[#allocation2] sm:$0xf] %vm331_vm6, %v1222_v15  ;;  %s1229_s12 = smov 25  }
   0xf   : > { %v439_v1 = vld [vmem:[%s323_s14] sm:$0xf]  ;;  %447 = vrot.lane.b32.xlu0 %v445_v0, %s1213_s15  ;;  %333 = vst.msk [vmem:[#allocation3] sm:$0xf] %vm329_vm5, %v1222_v15  ;;  %vm335_vm5 = vcmask 388096   ;;  %s1230_s10 = smov 31  }
  0x10   : > { %441 = vrot.lane.b32.xlu1 %v439_v1, %s1214_s16  ;;  %v427_v2 = vld [vmem:[%s323_s14] sm:$0xf]  ;;  %v342_v31 = vand.u32 65535, %v1327_v30  ;;  %v343_v32 = vshrl.u32 %v1327_v30, 16  ;;  %334 = vst.msk [vmem:[#allocation3] sm:$0xf] %vm331_vm6, %v1222_v15 }
  0x11   : > { %429 = vrot.lane.b32.xlu2 %v427_v2, %s1215_s17  ;;  %v433_v3 = vld [vmem:[%s323_s14] sm:$0xf]  ;;  %vm990_vm6 = vcmask 134248  }
  0x12   : > { %v421_v4 = vld [vmem:[%s323_s14] sm:$0xf]  ;;  %v346_v33 = vmul.u32 52428, %v342_v31  ;;  %v345_v34 = vmul.u32 52429, %v342_v31  ;;  %v347_v35 = vmul.u32 52429, %v343_v32  ;;  %v348_v39 = vmul.u32 52428, %v343_v32 }
  0x13   : > { %v409_v5 = vld [vmem:[%s323_s14] sm:$0xf] }
  0x14   : > { %v415_v6 = vld [vmem:[%s323_s14] sm:$0xf]  ;;  %v349_v36 = vshll.u32 %v346_v33, 16  ;;  %v351_v37 = vshll.u32 %v347_v35, 16  ;;  %v350_v43 = vshrl.u32 %v346_v33, 16  ;;  %v352_v45 = vshrl.u32 %v347_v35, 16 }
  0x15   : > { %v396_v7 = vld [vmem:[%s323_s14] sm:$0xf] }
  0x16   : > { %v403_v8 = vld [vmem:[%s323_s14] sm:$0xf]  ;;  %vm353_vm3 = vc.u32 %v345_v34, %v349_v36  ;;  %v355_v38 = vadd.s32 %v349_v36, %v345_v34 }
  0x17   : > { %435 = vrot.lane.b32.xlu0 %v433_v3, %s1216_s18  ;;  %v354_v40 = vsel %vm353_vm3, 1, %v1222_v15  ;;  %v589_v3 = vld [vmem:[%s1453_s4] sm:$0xff] }
  0x18   : > { %423 = vrot.lane.b32.xlu1 %v421_v4, %s1217_s19  ;;  %vm357_vm4 = vc.u32 %v355_v38, %v351_v37  ;;  %v356_v41 = vadd.s32 %v354_v40, %v348_v39 }
  0x19   : > { %411 = vrot.lane.b32.xlu2 %v409_v5, %s1218_s20  ;;  %v358_v42 = vsel %vm357_vm4, 1, %v1222_v15  ;;  %vm926_vm4 = vcmask 80896  }
  0x1a   : > { %v360_v44 = vadd.s32 %v358_v42, %v356_v41 }
  0x1c   : > { %v361_v46 = vadd.s32 %v360_v44, %v350_v43 }
  0x1e   : > { %v362_v47 = vadd.s32 %v361_v46, %v352_v45 }
  0x1f   : > { %417 = vrot.lane.b32.xlu0 %v415_v6, %s1219_s21 }
  0x20   : > { %398 = vrot.lane.b32.xlu1 %v396_v7, %s1220_s22  ;;  %v363_v48 = vshrl.u32 %v362_v47, 3 }
  0x21   : > { %405 = vrot.lane.b32.xlu2 %v403_v8, %s1221_s23 }
  0x22   : > { %v364_v49 = vmul.u32 10, %v363_v48 }
  0x24   : > { %v365_v50 = vsub.s32 %v1327_v30, %v364_v49 }
  0x26   : > { %vm368_vm7 = vcmp.ne.s32.totalorder %v365_v50, 0  ;;  %vm369_vm8 = vcmp.lt.s32.totalorder %v365_v50, 0  ;;  %v371_v51 = vadd.s32 10, %v365_v50 }
  0x27   : > { %464 = vperm.xlu0 %1202, %v461_v14   ;;  %vm370_vm9 = vmand %vm369_vm8, %vm368_vm7  ;;  %vm996_vm7 = vcmask 183448   ;;  %vm1002_vm8 = vcmask 232648  }
  0x28   : > { %v372_v52 = vsel %vm370_vm9, %v371_v51, %v365_v50  ;;  %vm1008_vm9 = vcmask 281848  }
  0x29   : > { %vm373_vm10 = vcmp.ge.s32.totalorder %v372_v52, 1  ;;  %vm374_vm11 = vcmp.le.s32.totalorder %v372_v52, 8  ;;  %v713_v52 = vld [vmem:[%s1455_s6] sm:$0xff] }
  0x2a   : > { %vm1338_vm12 = vmand %vm373_vm10, %vm374_vm11 }
  0x6b   : > { %v430_v9 = vpop.permute.xlu2 %429 }
  0x6c   : > { %432 = vst.msk [vmem:[#allocation4 + $0x14] sm:$0xf] %vm401_vm0, %v430_v9 }
  0x73   : > { %v412_v10 = vpop.permute.xlu2 %411 }
  0x74   : > { %414 = vst.msk [vmem:[#allocation4 + $0x8] sm:$0xf] %vm401_vm0, %v412_v10 }
  0x7b   : > { %v406_v11 = vpop.permute.xlu2 %405 }
  0x7c   : > { %408 = vst.msk [vmem:[#allocation4 + $0x4] sm:$0xf] %vm401_vm0, %v406_v11 }
  0x81   : > { %v448_v12 = vpop.permute.xlu0 %447 }
  0x82   : > { %v442_v13 = vpop.permute.xlu1 %441  ;;  %450 = vst.msk [vmem:[#allocation4 + $0x20] sm:$0xf] %vm401_vm0, %v448_v12 }
  0x83   : > { %444 = vst.msk [vmem:[#allocation4 + $0x1c] sm:$0xf] %vm401_vm0, %v442_v13 }
  0x89   : > { %v436_v16 = vpop.permute.xlu0 %435  ;;  %v460_v18 = vld [vmem:[#allocation4 + $0x20] sm:$0xf] }
  0x8a   : > { %v424_v17 = vpop.permute.xlu1 %423  ;;  %438 = vst.msk [vmem:[#allocation4 + $0x18] sm:$0xf] %vm401_vm0, %v436_v16  ;;  %v484_v19 = vunpack.c.l.b16 %v460_v18 }
  0x8b   : > { %426 = vst.msk [vmem:[#allocation4 + $0x10] sm:$0xf] %vm401_vm0, %v424_v17 }
  0x8c   : > { %v489_v20 = vpack.c.b16 %v484_v19, %v484_v19 }
  0x8e   : > { %v500_v21 = vsel %vm498_vm1, %v489_v20, 0 }
  0x8f   : > { %505 = vmatpush.bf16.msra.mxu0 %v500_v21 }
  0x91   : > { %v418_v22 = vpop.permute.xlu0 %417  ;;  %v1159_v23 = vld [vmem:[#allocation4 + $0x18] sm:$0xff] }
  0x92   : > { %v399_v24 = vpop.permute.xlu1 %398  ;;  %420 = vst.msk [vmem:[#allocation4 + $0xc] sm:$0xf] %vm401_vm0, %v418_v22  ;;  %v1158_v25 = vld [vmem:[#allocation4 + $0x10] sm:$0xff] }
  0x93   : > { %506 = vmatpush.bf16.msra.mxu0 %v1159_v23  ;;  %402 = vst.msk [vmem:[#allocation4] sm:$0xf] %vm401_vm0, %v399_v24 }
  0x97   : > { %507 = vmatpush.bf16.msra.mxu0 %v1158_v25  ;;  %v579_v25 = vld [vmem:[%s1452_s3] sm:$0xf] }
  0x99   : > { %v1157_v26 = vld [vmem:[#allocation4 + $0x8] sm:$0xff]  ;;  %v465_v53 = vpop.permute.xlu0 %464 }
  0x9a   : > { %v1156_v27 = vld [vmem:[#allocation4] sm:$0xff] }
  0x9b   : > { %508 = vmatpush.bf16.msra.mxu0 %v1157_v26 }
  0x9f   : > { %509 = vmatpush.bf16.msra.mxu0 %v1156_v27 }
  0xa2   : > { %1090 = vmatmul.msk.bf16.vlgmr.msra.gmra.mxu0 %vm494_vm2, %v451_v28 }
 0x11f   : > { %v511_v55 = vpop.f32.mrf.mxu0 }
 0x120   : > { %v512_v56 = vadd.f32 %v511_v55, %v465_v53 }
 0x122   : > { %v517_v57 = vsel %vm1338_vm12, %v512_v56, 0.0 }
 0x123   : > { %v518_v58 = vpack.c.bf16 %v517_v57, %v517_v57 }
 0x125   : > { %520 = vrot.lane.b32.xlu1 %v518_v58, %s1223_s28 }
 0x127   : > { %v513_v59 = vpop.f32.mrf.mxu0 }
 0x197   : > { %v521_v60 = vpop.permute.xlu1 %520 }
 0x198   : > { %524 = vst.msk [vmem:[#allocation2] sm:$0xf] %vm523_vm13, %v521_v60 }
 0x19f   : > { %v573_v61 = vld [vmem:[#allocation2] sm:$0xf] }
 0x1a0   : > { %v561_v62 = vld [vmem:[#allocation2] sm:$0xf]  ;;  %575 = vrot.lane.b32.xlu2 %v573_v61, %s1213_s15 }
 0x1a1   : > { %v549_v63 = vld [vmem:[#allocation2] sm:$0xf]  ;;  %563 = vrot.lane.b32.xlu1 %v561_v62, %s1216_s18 }
 0x1a2   : > { %551 = vrot.lane.b32.xlu0 %v549_v63, %s1217_s19  ;;  %v567_v0 = vld [vmem:[#allocation2] sm:$0xf] }
 0x1a3   : > { %v555_v1 = vld [vmem:[#allocation2] sm:$0xf] }
 0x1a4   : > { %v543_v2 = vld [vmem:[#allocation2] sm:$0xf] }
 0x1a5   : > { %v537_v4 = vld [vmem:[#allocation2] sm:$0xf] }
 0x1a6   : > { %v525_v5 = vld [vmem:[#allocation2] sm:$0xf] }
 0x1a7   : > { %v531_v6 = vld [vmem:[#allocation2] sm:$0xf] }
 0x1a8   : > { %569 = vrot.lane.b32.xlu2 %v567_v0, %s1214_s16  ;;  %v703_v0 = vld [vmem:[%s1454_s5] sm:$0xf] }
 0x1a9   : > { %557 = vrot.lane.b32.xlu1 %v555_v1, %s1215_s17 }
 0x1aa   : > { %545 = vrot.lane.b32.xlu0 %v543_v2, %s1219_s21 }
 0x1b0   : > { %539 = vrot.lane.b32.xlu2 %v537_v4, %s1218_s20 }
 0x1b1   : > { %527 = vrot.lane.b32.xlu1 %v525_v5, %s1220_s22 }
 0x1b2   : > { %592 = vperm.xlu0 %1202, %v589_v3  }
 0x1b8   : > { %533 = vrot.lane.b32.xlu2 %v531_v6, %s1221_s23 }
 0x1fa   : > { %v576_v7 = vpop.permute.xlu2 %575 }
 0x1fb   : > { %578 = vst.msk [vmem:[#allocation4 + $0x20] sm:$0xf] %vm401_vm0, %v576_v7 }
 0x202   : > { %v570_v8 = vpop.permute.xlu2 %569  ;;  %v588_v9 = vld [vmem:[#allocation4 + $0x20] sm:$0xf] }
 0x203   : > { %572 = vst.msk [vmem:[#allocation4 + $0x1c] sm:$0xf] %vm401_vm0, %v570_v8  ;;  %v612_v10 = vunpack.c.l.b16 %v588_v9 }
 0x205   : > { %v617_v11 = vpack.c.b16 %v612_v10, %v612_v10 }
 0x207   : > { %v626_v12 = vsel %vm498_vm1, %v617_v11, 0 }
 0x208   : > { %631 = vmatpush.bf16.msra.mxu1 %v626_v12 }
 0x20a   : > { %v540_v13 = vpop.permute.xlu2 %539 }
 0x20b   : > { %542 = vst.msk [vmem:[#allocation4 + $0x8] sm:$0xf] %vm401_vm0, %v540_v13 }
 0x212   : > { %v534_v16 = vpop.permute.xlu2 %533 }
 0x213   : > { %v564_v14 = vpop.permute.xlu1 %563  ;;  %536 = vst.msk [vmem:[#allocation4 + $0x4] sm:$0xf] %vm401_vm0, %v534_v16 }
 0x214   : > { %566 = vst.msk [vmem:[#allocation4 + $0x18] sm:$0xf] %vm401_vm0, %v564_v14  ;;  %v552_v17 = vpop.permute.xlu0 %551 }
 0x215   : > { %554 = vst.msk [vmem:[#allocation4 + $0x10] sm:$0xf] %vm401_vm0, %v552_v17 }
 0x21b   : > { %v558_v18 = vpop.permute.xlu1 %557  ;;  %v1163_v19 = vld [vmem:[#allocation4 + $0x18] sm:$0xff] }
 0x21c   : > { %560 = vst.msk [vmem:[#allocation4 + $0x14] sm:$0xf] %vm401_vm0, %v558_v18  ;;  %v546_v20 = vpop.permute.xlu0 %545  ;;  %632 = vmatpush.bf16.msra.mxu1 %v1163_v19 }
 0x21d   : > { %548 = vst.msk [vmem:[#allocation4 + $0xc] sm:$0xf] %vm401_vm0, %v546_v20 }
 0x223   : > { %v528_v21 = vpop.permute.xlu1 %527  ;;  %v1162_v22 = vld [vmem:[#allocation4 + $0x10] sm:$0xff] }
 0x224   : > { %530 = vst.msk [vmem:[#allocation4] sm:$0xf] %vm401_vm0, %v528_v21  ;;  %633 = vmatpush.bf16.msra.mxu1 %v1162_v22  ;;  %v1161_v23 = vld [vmem:[#allocation4 + $0x8] sm:$0xff]  ;;  %v593_v26 = vpop.permute.xlu0 %592  ;;  %v836_v22 = vld [vmem:[%s1457_s8] sm:$0xff] }
 0x228   : > { %634 = vmatpush.bf16.msra.mxu1 %v1161_v23 }
 0x22b   : > { %v1160_v24 = vld [vmem:[#allocation4] sm:$0xff] }
 0x22c   : > { %635 = vmatpush.bf16.msra.mxu1 %v1160_v24 }
 0x22f   : > { %1107 = vmatmul.msk.bf16.vlgmr.msra.gmra.mxu1 %vm494_vm2, %v579_v25 }
 0x2ac   : > { %v637_v27 = vpop.f32.mrf.mxu1 }
 0x2ad   : > { %v638_v28 = vadd.f32 %v637_v27, %v593_v26 }
 0x2af   : > { %v641_v31 = vmax.f32 %v638_v28, 0.0 }
 0x2b1   : > { %v642_v32 = vsel %vm1338_vm12, %v641_v31, 0.0 }
 0x2b2   : > { %v643_v33 = vpack.c.bf16 %v642_v32, %v642_v32 }
 0x2b4   : > { %v639_v34 = vpop.f32.mrf.mxu1  ;;  %645 = vrot.lane.b32.xlu1 %v643_v33, %s1223_s28 }
 0x326   : > { %v646_v35 = vpop.permute.xlu1 %645 }
 0x327   : > { %648 = vst.msk [vmem:[#allocation3] sm:$0xf] %vm523_vm13, %v646_v35 }
 0x32e   : > { %v697_v36 = vld [vmem:[#allocation3] sm:$0xf] }
 0x32f   : > { %v691_v37 = vld [vmem:[#allocation3] sm:$0xf]  ;;  %699 = vrot.lane.b32.xlu2 %v697_v36, %s1213_s15 }
 0x330   : > { %v685_v38 = vld [vmem:[#allocation3] sm:$0xf]  ;;  %693 = vrot.lane.b32.xlu1 %v691_v37, %s1214_s16  ;;  %v826_v37 = vld [vmem:[%s1456_s7] sm:$0xf] }
 0x331   : > { %687 = vrot.lane.b32.xlu0 %v685_v38, %s1216_s18  ;;  %v673_v39 = vld [vmem:[#allocation3] sm:$0xf] }
 0x332   : > { %v661_v40 = vld [vmem:[#allocation3] sm:$0xf] }
 0x333   : > { %v679_v41 = vld [vmem:[#allocation3] sm:$0xf] }
 0x334   : > { %v667_v42 = vld [vmem:[#allocation3] sm:$0xf] }
 0x335   : > { %v655_v43 = vld [vmem:[#allocation3] sm:$0xf] }
 0x336   : > { %v649_v44 = vld [vmem:[#allocation3] sm:$0xf] }
 0x337   : > { %675 = vrot.lane.b32.xlu2 %v673_v39, %s1217_s19 }
 0x338   : > { %663 = vrot.lane.b32.xlu1 %v661_v40, %s1218_s20 }
 0x339   : > { %681 = vrot.lane.b32.xlu0 %v679_v41, %s1215_s17 }
 0x33f   : > { %669 = vrot.lane.b32.xlu2 %v667_v42, %s1219_s21 }
 0x340   : > { %657 = vrot.lane.b32.xlu1 %v655_v43, %s1221_s23 }
 0x341   : > { %651 = vrot.lane.b32.xlu0 %v649_v44, %s1220_s22 }
 0x347   : > { %716 = vperm.xlu2 %1203, %v713_v52  }
 0x389   : > { %v700_v45 = vpop.permute.xlu2 %699 }
 0x38a   : > { %702 = vst.msk [vmem:[#allocation4 + $0x20] sm:$0xf] %vm401_vm0, %v700_v45 }
 0x391   : > { %v676_v46 = vpop.permute.xlu2 %675  ;;  %v712_v47 = vld [vmem:[#allocation4 + $0x20] sm:$0xf] }
 0x392   : > { %678 = vst.msk [vmem:[#allocation4 + $0x10] sm:$0xf] %vm401_vm0, %v676_v46  ;;  %v736_v48 = vunpack.c.l.b16 %v712_v47 }
 0x394   : > { %v741_v49 = vpack.c.b16 %v736_v48, %v736_v48  ;;  %v377_v48 = vshrl.u32 %v337_v29, 7 }
 0x396   : > { %v750_v50 = vsel %vm498_vm1, %v741_v49, 0  ;;  %v379_v49 = vmul.u32 2, %v1327_v30 }
 0x397   : > { %755 = vmatpush.bf16.msra.mxu2 %v750_v50  ;;  %v378_v50 = vadd.s32 8, %v377_v48 }
 0x398   : > { %v388_v52 = vadd.s32 2, %v379_v49 }
 0x399   : > { %v670_v51 = vpop.permute.xlu2 %669 }
 0x39a   : > { %672 = vst.msk [vmem:[#allocation4 + $0xc] sm:$0xf] %vm401_vm0, %v670_v51  ;;  %v380_v51 = vadd.s32 1, %v379_v49  ;;  %vm390_vm3 = vcmp.eq.s32.totalorder %v378_v50, %v388_v52 }
 0x3a1   : > { %v717_v1 = vpop.permute.xlu2 %716 }
 0x3a2   : > { %v694_v53 = vpop.permute.xlu1 %693 }
 0x3a3   : > { %696 = vst.msk [vmem:[#allocation4 + $0x1c] sm:$0xf] %vm401_vm0, %v694_v53  ;;  %v688_v55 = vpop.permute.xlu0 %687  ;;  %v1226_v53 = vmov 0.0  }
 0x3a4   : > { %690 = vst.msk [vmem:[#allocation4 + $0x18] sm:$0xf] %vm401_vm0, %v688_v55 }
 0x3aa   : > { %v664_v56 = vpop.permute.xlu1 %663 }
 0x3ab   : > { %v682_v57 = vpop.permute.xlu0 %681  ;;  %666 = vst.msk [vmem:[#allocation4 + $0x8] sm:$0xf] %vm401_vm0, %v664_v56  ;;  %v1167_v58 = vld [vmem:[#allocation4 + $0x18] sm:$0xff] }
 0x3ac   : > { %684 = vst.msk [vmem:[#allocation4 + $0x14] sm:$0xf] %vm401_vm0, %v682_v57  ;;  %756 = vmatpush.bf16.msra.mxu2 %v1167_v58  ;;  %v1073_v58 = vsel %vm390_vm3, 1.0, %v1226_v53 }
 0x3b2   : > { %v658_v59 = vpop.permute.xlu1 %657  ;;  %v1165_v62 = vld [vmem:[#allocation4 + $0x8] sm:$0xff] }
 0x3b3   : > { %660 = vst.msk [vmem:[#allocation4 + $0x4] sm:$0xf] %vm401_vm0, %v658_v59  ;;  %v652_v60 = vpop.permute.xlu0 %651  ;;  %v1166_v61 = vld [vmem:[#allocation4 + $0x10] sm:$0xff] }
 0x3b4   : > { %654 = vst.msk [vmem:[#allocation4] sm:$0xf] %vm401_vm0, %v652_v60  ;;  %757 = vmatpush.bf16.msra.mxu2 %v1166_v61 }
 0x3b8   : > { %758 = vmatpush.bf16.msra.mxu2 %v1165_v62 }
 0x3bb   : > { %v1164_v63 = vld [vmem:[#allocation4] sm:$0xff] }
 0x3bc   : > { %759 = vmatpush.bf16.msra.mxu2 %v1164_v63 }
 0x3bf   : > { %1124 = vmatmul.msk.bf16.vlgmr.msra.gmra.mxu2 %vm494_vm2, %v703_v0 }
 0x442   : > { %v761_v2 = vpop.f32.mrf.mxu2 }
 0x443   : > { %v762_v3 = vadd.f32 %v761_v2, %v717_v1 }
 0x445   : > { %v765_v4 = vsel %vm1338_vm12, %v762_v3, 0.0 }
 0x446   : > { %v766_v5 = vpack.c.bf16 %v765_v4, %v765_v4 }
 0x448   : > { %768 = vrot.lane.b32.xlu0 %v766_v5, %s1223_s28  ;;  %s327_s28 = scalar_lea.vmem %s1458_s9, %s1068_s11 }
 0x449   : > { %336 = vst.msk [vmem:[%s327_s28] sm:$0xf] %vm335_vm5, %v1222_v15 }
 0x44a   : > { %v763_v6 = vpop.f32.mrf.mxu2 }
 0x4ba   : > { %v769_v7 = vpop.permute.xlu0 %768 }
 0x4bb   : > { %771 = vst.msk [vmem:[#allocation2] sm:$0xf] %vm523_vm13, %v769_v7 }
 0x4c2   : > { %v820_v8 = vld [vmem:[#allocation2] sm:$0xf] }
 0x4c3   : > { %v814_v9 = vld [vmem:[#allocation2] sm:$0xf]  ;;  %822 = vrot.lane.b32.xlu1 %v820_v8, %s1213_s15 }
 0x4c4   : > { %v808_v10 = vld [vmem:[#allocation2] sm:$0xf]  ;;  %816 = vrot.lane.b32.xlu0 %v814_v9, %s1214_s16 }
 0x4c5   : > { %810 = vrot.lane.b32.xlu2 %v808_v10, %s1216_s18  ;;  %v796_v11 = vld [vmem:[#allocation2] sm:$0xf] }
 0x4c6   : > { %v784_v12 = vld [vmem:[#allocation2] sm:$0xf] }
 0x4c7   : > { %v802_v54 = vld [vmem:[#allocation2] sm:$0xf] }
 0x4c8   : > { %v790_v13 = vld [vmem:[#allocation2] sm:$0xf] }
 0x4c9   : > { %v778_v14 = vld [vmem:[#allocation2] sm:$0xf] }
 0x4ca   : > { %v772_v16 = vld [vmem:[#allocation2] sm:$0xf] }
 0x4cb   : > { %798 = vrot.lane.b32.xlu1 %v796_v11, %s1217_s19 }
 0x4cc   : > { %786 = vrot.lane.b32.xlu0 %v784_v12, %s1218_s20  ;;  %s1224_s20 = smov 68  }
 0x4cd   : > { %804 = vrot.lane.b32.xlu2 %v802_v54, %s1215_s17 }
 0x4d3   : > { %792 = vrot.lane.b32.xlu1 %v790_v13, %s1219_s21  ;;  %s1225_s21 = smov 88  }
 0x4d4   : > { %780 = vrot.lane.b32.xlu0 %v778_v14, %s1221_s23 }
 0x4d5   : > { %774 = vrot.lane.b32.xlu2 %v772_v16, %s1220_s22 }
 0x4db   : > { %839 = vperm.xlu1 %1204, %v836_v22  }
 0x51f   : > { %v811_v17 = vpop.permute.xlu2 %810 }
 0x520   : > { %813 = vst.msk [vmem:[#allocation4 + $0x18] sm:$0xf] %vm401_vm0, %v811_v17 }
 0x527   : > { %v805_v18 = vpop.permute.xlu2 %804 }
 0x528   : > { %807 = vst.msk [vmem:[#allocation4 + $0x14] sm:$0xf] %vm401_vm0, %v805_v18 }
 0x52f   : > { %v775_v19 = vpop.permute.xlu2 %774 }
 0x530   : > { %777 = vst.msk [vmem:[#allocation4] sm:$0xf] %vm401_vm0, %v775_v19 }
 0x535   : > { %v823_v20 = vpop.permute.xlu1 %822 }
 0x536   : > { %v817_v21 = vpop.permute.xlu0 %816  ;;  %825 = vst.msk [vmem:[#allocation4 + $0x20] sm:$0xf] %vm401_vm0, %v823_v20 }
 0x537   : > { %819 = vst.msk [vmem:[#allocation4 + $0x1c] sm:$0xf] %vm401_vm0, %v817_v21 }
 0x53d   : > { %v799_v23 = vpop.permute.xlu1 %798  ;;  %v835_v25 = vld [vmem:[#allocation4 + $0x20] sm:$0xf] }
 0x53e   : > { %v787_v24 = vpop.permute.xlu0 %786  ;;  %801 = vst.msk [vmem:[#allocation4 + $0x10] sm:$0xf] %vm401_vm0, %v799_v23  ;;  %v859_v26 = vunpack.c.l.b16 %v835_v25  ;;  %v1171_v33 = vld [vmem:[#allocation4 + $0x18] sm:$0xff] }
 0x53f   : > { %789 = vst.msk [vmem:[#allocation4 + $0x8] sm:$0xf] %vm401_vm0, %v787_v24 }
 0x540   : > { %v864_v27 = vpack.c.b16 %v859_v26, %v859_v26 }
 0x542   : > { %v873_v28 = vsel %vm498_vm1, %v864_v27, 0  ;;  %vm382_vm1 = vcmp.eq.s32.totalorder %v378_v50, %v380_v51 }
 0x543   : > { %878 = vmatpush.bf16.msra.mxu3 %v873_v28  ;;  %v1071_v56 = vsel %vm382_vm1, 1.0, %v1226_v53 }
 0x545   : > { %v793_v31 = vpop.permute.xlu1 %792  ;;  %v1170_v34 = vld [vmem:[#allocation4 + $0x10] sm:$0xff] }
 0x546   : > { %v781_v32 = vpop.permute.xlu0 %780  ;;  %795 = vst.msk [vmem:[#allocation4 + $0xc] sm:$0xf] %vm401_vm0, %v793_v31 }
 0x547   : > { %783 = vst.msk [vmem:[#allocation4 + $0x4] sm:$0xf] %vm401_vm0, %v781_v32  ;;  %879 = vmatpush.bf16.msra.mxu3 %v1171_v33  ;;  %vm381_vm0 = vcmp.eq.s32.totalorder %v377_v48, %v380_v51 }
 0x548   : > { %v1070_v55 = vsel %vm381_vm0, 1.0, %v1226_v53 }
 0x549   : > { %v387_v59 = vpack.c.bf16 %v1071_v56, %v1070_v55 }
 0x54b   : > { %880 = vmatpush.bf16.msra.mxu3 %v1170_v34  ;;  %v935_v61 = vsel %vm933_vm15, %v387_v59, 0 }
 0x54c   : > { %944 = vmatpush.bf16.msrb.mxu0 %v935_v61  ;;  %1174 = vmatpush.bf16.msrb.mxu2 %v935_v61 }
 0x54d   : > { %v1169_v35 = vld [vmem:[#allocation4 + $0x8] sm:$0xff]  ;;  %v840_v38 = vpop.permute.xlu1 %839 }
 0x54e   : > { %v1168_v36 = vld [vmem:[#allocation4] sm:$0xff] }
 0x54f   : > { %881 = vmatpush.bf16.msra.mxu3 %v1169_v35 }
 0x553   : > { %882 = vmatpush.bf16.msra.mxu3 %v1168_v36 }
 0x556   : > { %1141 = vmatmul.msk.bf16.vlgmr.msra.gmra.mxu3 %vm494_vm2, %v826_v37  ;;  %vm389_vm2 = vcmp.eq.s32.totalorder %v377_v48, %v388_v52 }
 0x557   : > { %v1072_v57 = vsel %vm389_vm2, 1.0, %v1226_v53 }
 0x558   : > { %v395_v60 = vpack.c.bf16 %v1073_v58, %v1072_v57 }
 0x55a   : > { %v957_v62 = vsel %vm933_vm15, %v395_v60, 0 }
 0x55b   : > { %966 = vmatpush.bf16.msrb.mxu1 %v957_v62  ;;  %1175 = vmatpush.bf16.msrb.mxu3 %v957_v62 }
 0x5d9   : > { %v884_v39 = vpop.f32.mrf.mxu3 }
 0x5da   : > { %v885_v40 = vadd.f32 %v884_v39, %v840_v38 }
 0x5dc   : > { %v888_v41 = vmax.f32 %v885_v40, 0.0 }
 0x5de   : > { %v889_v42 = vpack.c.bf16 %v888_v41, %v888_v41 }
 0x5e0   : > { %v890_v43 = vunpack.c.l.bf16 %v889_v42 }
 0x5e1   : > { %v886_v44 = vpop.f32.mrf.mxu3 }
 0x5e2   : > { %892 = vrot.lane.b32.xlu2 %v890_v43, %s1221_s23 }
 0x63c   : > { %v893_v45 = vpop.permute.xlu2 %892 }
 0x63d   : > { %v895_v46 = vmax.f32 %v890_v43, %v893_v45 }
 0x63f   : > { %v896_v47 = vpack.c.bf16 %v895_v46, %v895_v46 }
 0x641   : > { %900 = vrot.lane.b32.xlu2 %v896_v47, %s1217_s19  ;;  %908 = vrot.lane.b32.xlu1 %v896_v47, %s1224_s20  ;;  %898 = vst.msk [vmem:[#allocation5] sm:$0xf] %vm897_vm14, %v896_v47  ;;  %s1227_s19 = smov 13  }
 0x642   : > { %904 = vrot.lane.b32.xlu0 %v896_v47, %s1225_s21 }
 0x69b   : > { %v901_v29 = vpop.permute.xlu2 %900 }
 0x69c   : > { %903 = vst.msk [vmem:[#allocation5 + $0x4] sm:$0xf] %vm897_vm14, %v901_v29 }
 0x6a3   : > { %v1172_v30 = vld [vmem:[#allocation5] sm:$0xff] }
 0x6a4   : > { %1150 = vmatmul.msk.bf16.vlgmr.msrb.gmra.mxu0 %vm926_vm4, %v1172_v30  ;;  %1152 = vmatmul.msk.bf16.vlgmr.msrb.gmra.mxu1 %vm926_vm4, %v1172_v30 }
 0x6b3   : > { %v909_v63 = vpop.permute.xlu1 %908 }
 0x6b4   : > { %911 = vst.msk [vmem:[#allocation5 + $0xc] sm:$0xf] %vm897_vm14, %v909_v63  ;;  %v905_v0 = vpop.permute.xlu0 %904 }
 0x6b5   : > { %907 = vst.msk [vmem:[#allocation5 + $0x8] sm:$0xf] %vm897_vm14, %v905_v0 }
 0x6bc   : > { %v1173_v1 = vld [vmem:[#allocation5 + $0x8] sm:$0xff] }
 0x6bd   : > { %1151 = vmatmul.msk.bf16.vlgmr.msrb.gmra.mxu2 %vm926_vm4, %v1173_v1  ;;  %1153 = vmatmul.msk.bf16.vlgmr.msrb.gmra.mxu3 %vm926_vm4, %v1173_v1 }
 0x721   : > { %v946_v2 = vpop.f32.mrf.mxu0  ;;  %v968_v3 = vpop.f32.mrf.mxu1 }
 0x722   : > { %v978_v4 = vmax.f32 %v946_v2, %v968_v3 }
 0x724   : > { %v982_v5 = vpack.c.bf16 %v978_v4, %v978_v4 }
 0x726   : > { %987 = vrot.lane.b32.xlu0 %v982_v5, %s1227_s19 }
 0x729   : > { %v948_v6 = vpop.f32.mrf.mxu0  ;;  %v970_v7 = vpop.f32.mrf.mxu1 }
 0x72a   : > { %v979_v8 = vmax.f32 %v948_v6, %v970_v7 }
 0x72c   : > { %v983_v9 = vpack.c.bf16 %v979_v8, %v979_v8 }
 0x72e   : > { %993 = vrot.lane.b32.xlu1 %v983_v9, %s1228_s29 }
 0x740   : > { %v951_v10 = vpop.f32.mrf.mxu2  ;;  %v973_v11 = vpop.f32.mrf.mxu3 }
 0x741   : > { %v980_v12 = vmax.f32 %v951_v10, %v973_v11 }
 0x743   : > { %v984_v54 = vpack.c.bf16 %v980_v12, %v980_v12 }
 0x745   : > { %999 = vrot.lane.b32.xlu2 %v984_v54, %s1229_s12 }
 0x748   : > { %v953_v13 = vpop.f32.mrf.mxu2  ;;  %v975_v14 = vpop.f32.mrf.mxu3 }
 0x749   : > { %v981_v16 = vmax.f32 %v953_v13, %v975_v14 }
 0x74b   : > { %v985_v17 = vpack.c.bf16 %v981_v16, %v981_v16 }
 0x74d   : > { %1005 = vrot.lane.b32.xlu0 %v985_v17, %s1230_s10 }
 0x798   : > { %v988_v18 = vpop.permute.xlu0 %987 }
 0x799   : > { %991 = vst.msk [vmem:[%s327_s28] sm:$0xf] %vm990_vm6, %v988_v18 }
 0x79f   : > { %v1000_v20 = vpop.permute.xlu2 %999 }
 0x7a0   : > { %v994_v19 = vpop.permute.xlu1 %993 }
 0x7a1   : > { %997 = vst.msk [vmem:[%s327_s28] sm:$0xf] %vm996_vm7, %v994_v19 }
 0x7a2   : > { %1003 = vst.msk [vmem:[%s327_s28] sm:$0xf] %vm1002_vm8, %v1000_v20 }
 0x7bf   : > { %v1006_v15 = vpop.permute.xlu0 %1005 }
 0x7c0   : > { %1009 = vst.msk [vmem:[%s327_s28] sm:$0xf] %vm1008_vm9, %v1006_v15 }
 0x7c1 PF: > { %s19_s30 = sadd.s32 1, %s1211_s30  }
 0x7c2   : > { %p16_p4 = scmp.ge.s32.totalorder %s19_s30, 4  }
 0x7c4   :  { %18 = sbr.rel (!%p16_p4) target bundleno = 1 (0x1), region = 86 }

// kernel: spidey_forward.3
= control target key start
LH: loop header
LB: loop body
LE: loop exit
PB: predicated region body
PF: predicated region fallthrough
CT: control target
= control target key end

     0   :  { %s2444_s30 = smov 0   ;;  %s2819_s0 = inlined_call_operand.vmem [shape: bf16[2,4,360], index: 0, kind: input, shape index: {}]   ;;  %s2820_s1 = inlined_call_operand.vmem [shape: bf16[8,36], index: 1, kind: input, shape index: {}]   ;;  %s2821_s2 = inlined_call_operand.vmem [shape: f32[8,1], index: 2, kind: input, shape index: {}]   ;;  %s2822_s3 = inlined_call_operand.vmem [shape: bf16[8,72], index: 3, kind: input, shape index: {}]   ;;  %s2823_s4 = inlined_call_operand.vmem [shape: f32[8,1], index: 4, kind: input, shape index: {}]   ;;  %s2824_s5 = inlined_call_operand.vmem [shape: bf16[8,72], index: 5, kind: input, shape index: {}]   ;;  %s2825_s6 = inlined_call_operand.vmem [shape: f32[8,1], index: 6, kind: input, shape index: {}]   ;;  %s2826_s7 = inlined_call_operand.vmem [shape: bf16[8,72], index: 7, kind: input, shape index: {}]   ;;  %s2827_s8 = inlined_call_operand.vmem [shape: f32[8,1], index: 8, kind: input, shape index: {}]   ;;  %s2828_s9 = inlined_call_operand.vmem [shape: bf16[2,8,120], index: 9, kind: output, shape index: {}]  }
   0x1 LB: > { %s2046_s10 = sadd.s32 4294967295, %s2362_s30   ;;  %p2050_p0 = scmp.ge.s32.totalorder %s2362_s30, 1  ;;  %s2362_s30 = sphi %s2444_s30, %s19_s30  }
   0x2   : > { %p287_p1 = scmp.lt.s32.totalorder %s2362_s30, 3 }
   0x4   : > { %p288_p2 = pnand %p2050_p0, %p287_p1 }
   0x5   : > { %p322_p3 = scmp.lt.s32.totalorder (!%p288_p2), %s2046_s10, 1  ;;  %s2364_s15 = smov (!%p288_p2), 111  }
   0x6   : > { %291 = sbr.rel (%p288_p2) target bundleno = 2192 (0x890), region = 56  ;;  %s2365_s16 = smov (!%p288_p2), 92  }
   0x7   : > { %s2366_s17 = smov (!%p288_p2), 91   ;;  %s2367_s18 = smov (!%p288_p2), 75  }
   0x8   : > { %s2368_s19 = smov (!%p288_p2), 110   ;;  %s2369_s20 = smov (!%p288_p2), 74  }
   0x9   : > { %s2370_s21 = smov (!%p288_p2), 73   ;;  %s2371_s22 = smov (!%p288_p2), 93  }
   0xa   : > { %s2372_s23 = smov (!%p288_p2), 109   ;;  %s2374_s28 = smov (!%p288_p2), 36  }
   0xb   : > { %s2867_s10 = smov (!%p322_p3, %s2046_s10), 1  ;;  %vm504_vm0 = vcmask 254976   ;;  %vm497_vm1 = vcmask 1043456   ;;  %vm2830_vm2 = vcmask 908288   ;;  %vm526_vm3 = vcmask 257026   ;;  %s2377_s27 = smov 112  }
   0xc   : > { %s2315_s11 = smul.u32 6, %s2867_s10  ;;  %vm2832_vm4 = vcmask 744448   ;;  %vm583_vm5 = vcmask 752640   ;;  %vm2834_vm6 = vcmask 613376   ;;  %vm2833_vm7 = vcmask 605184   ;;  %s2379_s29 = smov 58  }
   0xd   : > { %vm2835_vm8 = vcmask 760832   ;;  %vm665_vm9 = vcmask 596992   ;;  %vm2829_vm10 = vcmask 900096   ;;  %vm732_vm11 = vcmask 1041408   ;;  %s2383_s12 = smov 40   ;;  %s2384_s13 = smov 114  }
   0xe   : > { %s2458_s14 = scalar_lea.vmem %s2819_s0, %s2315_s11  ;;  %vm2831_vm12 = vcmask 891904   ;;  %vm728_vm13 = vcmask 293888   ;;  %s2382_s11 = smov 76  }
   0xf   : > { %v484_v0 = vld [vmem:[%s2458_s14] sm:$0x3f]  ;;  %s2388_s24 = smov 31   ;;  %s2389_s25 = smov 41  }
  0x10   : > { %486 = vst [vmem:[#allocation1] ss:$2 sm:$0xff] %v484_v0  ;;  %v506_v1 = vld [vmem:[%s2458_s14] sm:$0x3f]  ;;  %s2390_s26 = smov 51  }
  0x11   : > { %v528_v4 = vld [vmem:[%s2458_s14] sm:$0x3f] }
  0x12   : > { %v548_v7 = vld [vmem:[%s2458_s14] sm:$0x3f] }
  0x13   : > { %v569_v10 = vld [vmem:[%s2458_s14] sm:$0x3f] }
  0x14   : > { %v589_v13 = vld [vmem:[%s2458_s14] sm:$0x3f] }
  0x15   : > { %v610_v16 = vld [vmem:[%s2458_s14] sm:$0x3f] }
  0x16   : > { %v630_v19 = vld [vmem:[%s2458_s14] sm:$0x3f] }
  0x17   : > { %v487_v2 = vld.sshfl [vmem:[#allocation1] sm:$0xff pattern:$0x75643120]  ;;  %v489_v3 = vld.sshfl [vmem:[#allocation1 + $0x8] sm:$0xff pattern:$0x75643120] }
  0x18   : > { %491 = vrot.lane.b32.xlu1 %v487_v2, %s2364_s15  ;;  %509 = vst [vmem:[#allocation1 + $0x1] ss:$2 sm:$0xff] %v506_v1  ;;  %493 = vrot.lane.b32.xlu2 %v489_v3, %s2364_s15  ;;  %v651_v22 = vld [vmem:[%s2458_s14] sm:$0x3f]  ;;  %s2387_s14 = smov 21  }
  0x1f   : > { %v510_v5 = vld.sshfl [vmem:[#allocation1] sm:$0xff pattern:$0x75643120]  ;;  %v512_v6 = vld.sshfl [vmem:[#allocation1 + $0x8] sm:$0xff pattern:$0x75643120] }
  0x20   : > { %530 = vst [vmem:[#allocation1] ss:$2 sm:$0xff] %v528_v4 }
  0x27   : > { %v531_v8 = vld.sshfl [vmem:[#allocation1] sm:$0xff pattern:$0x75643120]  ;;  %v533_v9 = vld.sshfl [vmem:[#allocation1 + $0x8] sm:$0xff pattern:$0x75643120] }
  0x28   : > { %551 = vst [vmem:[#allocation1 + $0x1] ss:$2 sm:$0xff] %v548_v7 }
  0x2f   : > { %v552_v11 = vld.sshfl [vmem:[#allocation1] sm:$0xff pattern:$0x75643120]  ;;  %v554_v12 = vld.sshfl [vmem:[#allocation1 + $0x8] sm:$0xff pattern:$0x75643120] }
  0x30   : > { %571 = vst [vmem:[#allocation1] ss:$2 sm:$0xff] %v569_v10  ;;  %v2373_v10 = vmov 0  }
  0x31   : > { %2354 = vset.pattern.permute.xlu0 %v2373_v10  ;;  %2355 = vset.pattern.permute.xlu1 %v2373_v10 }
  0x37   : > { %v572_v14 = vld.sshfl [vmem:[#allocation1] sm:$0xff pattern:$0x75643120]  ;;  %v574_v15 = vld.sshfl [vmem:[#allocation1 + $0x8] sm:$0xff pattern:$0x75643120] }
  0x38   : > { %576 = vrot.lane.b32.xlu1 %v572_v14, %s2365_s16  ;;  %592 = vst [vmem:[#allocation1 + $0x1] ss:$2 sm:$0xff] %v589_v13 }
  0x3f   : > { %v593_v17 = vld.sshfl [vmem:[#allocation1] sm:$0xff pattern:$0x75643120]  ;;  %v595_v18 = vld.sshfl [vmem:[#allocation1 + $0x8] sm:$0xff pattern:$0x75643120] }
  0x40   : > { %578 = vrot.lane.b32.xlu1 %v574_v15, %s2365_s16  ;;  %612 = vst [vmem:[#allocation1] ss:$2 sm:$0xff] %v610_v16  ;;  %597 = vrot.lane.b32.xlu2 %v593_v17, %s2366_s17 }
  0x47   : > { %v615_v20 = vld.sshfl [vmem:[#allocation1 + $0x8] sm:$0xff pattern:$0x75643120]  ;;  %v613_v21 = vld.sshfl [vmem:[#allocation1] sm:$0xff pattern:$0x75643120] }
  0x48   : > { %619 = vrot.lane.b32.xlu1 %v615_v20, %s2367_s18  ;;  %617 = vrot.lane.b32.xlu0 %v613_v21, %s2367_s18  ;;  %633 = vst [vmem:[#allocation1 + $0x1] ss:$2 sm:$0xff] %v630_v19 }
  0x49   : > { %599 = vrot.lane.b32.xlu2 %v595_v18, %s2366_s17 }
  0x4f   : > { %v636_v23 = vld.sshfl [vmem:[#allocation1 + $0x8] sm:$0xff pattern:$0x75643120]  ;;  %v634_v24 = vld.sshfl [vmem:[#allocation1] sm:$0xff pattern:$0x75643120] }
  0x50   : > { %516 = vrot.lane.b32.xlu1 %v512_v6, %s2368_s19  ;;  %640 = vrot.lane.b32.xlu0 %v636_v23, %s2369_s20  ;;  %653 = vst [vmem:[#allocation1] ss:$2 sm:$0xff] %v651_v22 }
  0x51   : > { %638 = vrot.lane.b32.xlu2 %v634_v24, %s2369_s20 }
  0x57   : > { %v654_v25 = vld.sshfl [vmem:[#allocation1] sm:$0xff pattern:$0x75643120]  ;;  %v656_v26 = vld.sshfl [vmem:[#allocation1 + $0x8] sm:$0xff pattern:$0x75643120] }
  0x58   : > { %658 = vrot.lane.b32.xlu0 %v654_v25, %s2370_s21  ;;  %556 = vrot.lane.b32.xlu1 %v552_v11, %s2371_s22  ;;  %v682_v25 = vld [vmem:[%s2821_s2] sm:$0xff] }
  0x59   : > { %535 = vrot.lane.b32.xlu2 %v531_v8, %s2372_s23 }
  0x60   : > { %660 = vrot.lane.b32.xlu0 %v656_v26, %s2370_s21 }
  0x61   : > { %558 = vrot.lane.b32.xlu2 %v554_v12, %s2371_s22 }
  0x68   : > { %514 = vrot.lane.b32.xlu0 %v510_v5, %s2368_s19 }
  0x70   : > { %537 = vrot.lane.b32.xlu0 %v533_v9, %s2372_s23 }
  0x72   : > { %v494_v27 = vpop.permute.xlu2 %493 }
  0x73   : > { %505 = vst.msk [vmem:[#allocation4 + $0x8] sm:$0x3] %vm504_vm0, %v494_v27  ;;  %v496_v28 = vrot.slane %v494_v27, 4 }
  0x78   : > { %685 = vperm.xlu0 %2354, %v682_v25  }
  0x8a   : > { %v492_v29 = vpop.permute.xlu1 %491 }
  0x8b   : > { %v495_v30 = vrot.slane %v492_v29, 4 }
  0x8d   : > { %v498_v31 = vsel %vm497_vm1, %v495_v30, %v496_v28 }
  0x8e   : > { %v500_v32 = vsel %vm2830_vm2, %v492_v29, %v498_v31 }
  0x8f   : > { %503 = vst [vmem:[#allocation4] sm:$0x33] %v500_v32 }
  0x9a   : > { %v598_v33 = vpop.permute.xlu2 %597 }
  0x9b   : > { %v601_v34 = vrot.slane %v598_v33, 4 }
  0xa3   : > { %v600_v35 = vpop.permute.xlu2 %599 }
  0xa4   : > { %v602_v36 = vrot.slane %v600_v35, 4  ;;  %609 = vst.msk [vmem:[#allocation4 + $0x20] sm:$0xc] %vm526_vm3, %v600_v35 }
  0xa6   : > { %v603_v37 = vsel %vm497_vm1, %v601_v34, %v602_v36 }
  0xa7   : > { %v605_v38 = vsel %vm2832_vm4, %v598_v33, %v603_v37 }
  0xa8   : > { %608 = vst [vmem:[#allocation4 + $0x18] sm:$0xcc] %v605_v38 }
  0xaa   : > { %v577_v39 = vpop.permute.xlu1 %576 }
  0xab   : > { %v639_v40 = vpop.permute.xlu2 %638  ;;  %v580_v41 = vrot.slane %v577_v39, 4 }
  0xac   : > { %v642_v54 = vrot.slane %v639_v40, 4 }
  0xb2   : > { %v579_v42 = vpop.permute.xlu1 %578 }
  0xb3   : > { %v581_v43 = vrot.slane %v579_v42, 4  ;;  %588 = vst.msk [vmem:[#allocation4 + $0x20] sm:$0x3] %vm504_vm0, %v579_v42  ;;  %v2496_v46 = vpop.permute.xlu2 %535 }
  0xb4   : > { %v539_v18 = vrot.slane %v2496_v46, 4 }
  0xb5   : > { %v582_v44 = vsel %vm497_vm1, %v580_v41, %v581_v43  ;;  %v671_v43 = vld [vmem:[%s2820_s1] sm:$0xf] }
  0xb6   : > { %v584_v45 = vsel %vm583_vm5, %v577_v39, %v582_v44 }
  0xb7   : > { %587 = vst [vmem:[#allocation4 + $0x18] sm:$0x33] %v584_v45 }
  0xba   : > { %v620_v47 = vpop.permute.xlu1 %619  ;;  %v618_v48 = vpop.permute.xlu0 %617  ;;  %v2081_v41 = vld [vmem:[#allocation4 + $0x20] sm:$0xf] }
  0xbb   : > { %v622_v49 = vrot.slane %v620_v47, 4  ;;  %629 = vst.msk [vmem:[#allocation4 + $0x2c] sm:$0x3] %vm504_vm0, %v620_v47  ;;  %v621_v50 = vrot.slane %v618_v48, 4  ;;  %v559_v53 = vpop.permute.xlu2 %558 }
  0xbc   : > { %568 = vst.msk [vmem:[#allocation4 + $0x14] sm:$0xc] %vm526_vm3, %v559_v53  ;;  %v561_v60 = vrot.slane %v559_v53, 4 }
  0xbd   : > { %v623_v51 = vsel %vm497_vm1, %v621_v50, %v622_v49  ;;  %v340_v49 = vlaneseq }
  0xbe   : > { %v625_v52 = vsel %vm2834_vm6, %v618_v48, %v623_v51  ;;  %v2073_v27 = vld [vmem:[#allocation4 + $0x18] sm:$0xf]  ;;  %v2272_v28 = vld [vmem:[#allocation4 + $0x1c] sm:$0xf] }
  0xbf   : > { %628 = vst [vmem:[#allocation4 + $0x24] sm:$0x33] %v625_v52  ;;  %v2533_v50 = vand.u32 127, %v340_v49 }
  0xc1   : > { %v342_v51 = vadd.s32 128, %v2533_v50  ;;  %v347_v52 = vand.u32 65535, %v2533_v50 }
  0xc2   : > { %v517_v55 = vpop.permute.xlu1 %516  ;;  %v641_v56 = vpop.permute.xlu0 %640 }
  0xc3   : > { %527 = vst.msk [vmem:[#allocation4 + $0x8] sm:$0xc] %vm526_vm3, %v517_v55  ;;  %v643_v57 = vrot.slane %v641_v56, 4  ;;  %v519_v7 = vrot.slane %v517_v55, 4  ;;  %v376_v53 = vand.u32 65535, %v342_v51  ;;  %v351_v55 = vmul.u32 58254, %v347_v52 }
  0xc4   : > { %650 = vst.msk [vmem:[#allocation4 + $0x2c] sm:$0xc] %vm526_vm3, %v641_v56  ;;  %v377_v56 = vshrl.u32 %v342_v51, 16 }
  0xc5   : > { %v644_v58 = vsel %vm497_vm1, %v642_v54, %v643_v57  ;;  %v348_v54 = vshrl.u32 %v2533_v50, 16  ;;  %v380_v57 = vmul.u32 58254, %v376_v53 }
  0xc6   : > { %v646_v59 = vsel %vm2833_vm7, %v639_v40, %v644_v58  ;;  %v350_v58 = vmul.u32 14564, %v347_v52 }
  0xc7   : > { %649 = vst [vmem:[#allocation4 + $0x24] sm:$0xcc] %v646_v59  ;;  %v352_v59 = vmul.u32 14564, %v348_v54 }
  0xca   : > { %v659_v61 = vpop.permute.xlu0 %658  ;;  %v557_v62 = vpop.permute.xlu1 %556  ;;  %v2069_v47 = vld [vmem:[#allocation4 + $0x8] sm:$0xf] }
  0xcb   : > { %v560_v63 = vrot.slane %v557_v62, 4  ;;  %v662_v3 = vrot.slane %v659_v61, 4  ;;  %v2274_v44 = vld [vmem:[#allocation4 + $0x28] sm:$0xf0] }
  0xcc   : > { %v2082_v45 = vor.u32 %v2274_v44, %v2081_v41 }
  0xcd   : > { %v562_v0 = vsel %vm497_vm1, %v560_v63, %v561_v60  ;;  %v354_v60 = vshll.u32 %v351_v55, 16  ;;  %v383_v63 = vshll.u32 %v380_v57, 16 }
  0xce   : > { %v564_v1 = vsel %vm2835_vm8, %v557_v62, %v562_v0  ;;  %v2273_v20 = vld [vmem:[#allocation4 + $0x20] sm:$0xf0]  ;;  %v2075_v21 = vld [vmem:[#allocation4 + $0x24] sm:$0xf0]  ;;  %v381_v62 = vmul.u32 14564, %v377_v56  ;;  %v356_v0 = vshll.u32 %v352_v59, 16 }
  0xcf   : > { %567 = vst [vmem:[#allocation4 + $0xc] sm:$0xcc] %v564_v1  ;;  %v2074_v30 = vor.u32 %v2273_v20, %v2073_v27  ;;  %v2078_v31 = vor.u32 %v2272_v28, %v2075_v21  ;;  %vm358_vm14 = vc.u32 %v350_v58, %v354_v60  ;;  %v360_v1 = vadd.s32 %v354_v60, %v350_v58 }
  0xd2   : > { %v661_v2 = vpop.permute.xlu0 %660 }
  0xd3   : > { %v663_v4 = vrot.slane %v661_v2, 4  ;;  %670 = vst.msk [vmem:[#allocation4 + $0x38] sm:$0x3] %vm504_vm0, %v661_v2  ;;  %v385_v2 = vshll.u32 %v381_v62, 16 }
  0xd5   : > { %v664_v5 = vsel %vm497_vm1, %v662_v3, %v663_v4  ;;  %v353_v4 = vmul.u32 58254, %v348_v54 }
  0xd6   : > { %v666_v6 = vsel %vm665_vm9, %v659_v61, %v664_v5  ;;  %v379_v61 = vmul.u32 14564, %v376_v53  ;;  %v359_v5 = vsel %vm358_vm14, 1, %v2373_v10 }
  0xd7   : > { %669 = vst [vmem:[#allocation4 + $0x30] sm:$0x33] %v666_v6  ;;  %v382_v6 = vmul.u32 58254, %v377_v56 }
  0xd8   : > { %vm387_vm15 = vc.u32 %v379_v61, %v383_v63  ;;  %v389_v3 = vadd.s32 %v383_v63, %v379_v61 }
  0xda   : > { %v515_v8 = vpop.permute.xlu0 %514  ;;  %v681_v32 = vld [vmem:[#allocation4 + $0x38] sm:$0x3]  ;;  %vm391_vm3 = vc.u32 %v389_v3, %v385_v2 }
  0xdb   : > { %v518_v9 = vrot.slane %v515_v8, 4  ;;  %v712_v33 = vunpack.c.l.b16 %v681_v32 }
  0xdd   : > { %v520_v11 = vsel %vm497_vm1, %v518_v9, %v519_v7  ;;  %v721_v35 = vpack.c.b16 %v712_v33, %v712_v33  ;;  %v388_v7 = vsel %vm387_vm15, 1, %v2373_v10  ;;  %v343_v9 = vadd.s32 256, %v2533_v50 }
  0xde   : > { %v522_v12 = vsel %vm2829_vm10, %v515_v8, %v520_v11  ;;  %v680_v13 = vld [vmem:[#allocation4 + $0x30] sm:$0x33]  ;;  %v361_v8 = vadd.s32 %v359_v5, %v353_v4 }
  0xdf   : > { %525 = vst [vmem:[#allocation4] sm:$0xcc] %v522_v12  ;;  %v710_v14 = vunpack.c.l.b16 %v680_v13  ;;  %v711_v15 = vunpack.c.h.b16 %v680_v13  ;;  %v740_v42 = vsel %vm732_vm11, %v721_v35, 0  ;;  %v390_v12 = vadd.s32 %v388_v7, %v382_v6 }
  0xe0   : > { %v392_v13 = vsel %vm391_vm3, 1, %v2373_v10 }
  0xe1   : > { %v719_v16 = vpack.c.b16 %v710_v14, %v710_v14  ;;  %v720_v17 = vpack.c.b16 %v711_v15, %v711_v15  ;;  %v405_v14 = vand.u32 65535, %v343_v9  ;;  %v355_v15 = vshrl.u32 %v351_v55, 16 }
  0xe2   : > { %v538_v19 = vpop.permute.xlu0 %537  ;;  %v394_v20 = vadd.s32 %v392_v13, %v390_v12 }
  0xe3   : > { %v540_v22 = vrot.slane %v538_v19, 4  ;;  %547 = vst.msk [vmem:[#allocation4 + $0x14] sm:$0x3] %vm504_vm0, %v538_v19  ;;  %v734_v23 = vsel %vm732_vm11, %v719_v16, 0  ;;  %v737_v24 = vsel %vm732_vm11, %v720_v17, 0  ;;  %vm362_vm0 = vc.u32 %v360_v1, %v356_v0 }
  0xe4   : > { %747 = vmatpush.bf16.msra.mxu2 %v734_v23  ;;  %760 = vmatpush.bf16.msra.mxu3 %v737_v24  ;;  %v363_v11 = vsel %vm362_vm0, 1, %v2373_v10  ;;  %v406_v17 = vshrl.u32 %v343_v9, 16  ;;  %v384_v19 = vshrl.u32 %v380_v57, 16  ;;  %v408_v21 = vmul.u32 14564, %v405_v14 }
  0xe5   : > { %v541_v26 = vsel %vm497_vm1, %v539_v18, %v540_v22  ;;  %v365_v16 = vadd.s32 %v363_v11, %v361_v8  ;;  %v409_v18 = vmul.u32 58254, %v405_v14  ;;  %v357_v24 = vshrl.u32 %v352_v59, 16 }
  0xe6   : > { %v543_v29 = vsel %vm2831_vm12, %v2496_v46, %v541_v26  ;;  %v2061_v34 = vld [vmem:[#allocation4] sm:$0xf]  ;;  %v2269_v37 = vld [vmem:[#allocation4 + $0x4] sm:$0xf]  ;;  %v410_v22 = vmul.u32 14564, %v406_v17  ;;  %v386_v26 = vshrl.u32 %v381_v62, 16  ;;  %v395_v27 = vadd.s32 %v394_v20, %v384_v19 }
  0xe7   : > { %546 = vst [vmem:[#allocation4 + $0xc] sm:$0x33] %v543_v29  ;;  %v412_v23 = vshll.u32 %v409_v18, 16  ;;  %v366_v25 = vadd.s32 %v365_v16, %v355_v15  ;;  %v411_v32 = vmul.u32 58254, %v406_v17 }
  0xe8   : > { %748 = vmatpush.bf16.msra.mxu2 %v2074_v30  ;;  %761 = vmatpush.bf16.msra.mxu3 %v2078_v31  ;;  %v414_v28 = vshll.u32 %v410_v22, 16  ;;  %v396_v31 = vadd.s32 %v395_v27, %v386_v26  ;;  %v415_v44 = vshrl.u32 %v410_v22, 16 }
  0xe9   : > { %vm416_vm11 = vc.u32 %v408_v21, %v412_v23  ;;  %v418_v29 = vadd.s32 %v412_v23, %v408_v21  ;;  %v367_v30 = vadd.s32 %v366_v25, %v357_v24 }
  0xea   : > { %v2271_v46 = vld [vmem:[#allocation4 + $0x10] sm:$0xf0]  ;;  %v417_v33 = vsel %vm416_vm11, 1, %v2373_v10  ;;  %v397_v35 = vshrl.u32 %v396_v31, 4 }
  0xeb   : > { %v2070_v48 = vor.u32 %v2271_v46, %v2069_v47  ;;  %vm420_vm14 = vc.u32 %v418_v29, %v414_v28 }
  0xee   : > { %v2270_v36 = vld [vmem:[#allocation4 + $0x8] sm:$0xf0]  ;;  %v2063_v38 = vld [vmem:[#allocation4 + $0xc] sm:$0xf0] }
  0xef   : > { %v2062_v39 = vor.u32 %v2270_v36, %v2061_v34  ;;  %v2066_v40 = vor.u32 %v2269_v37, %v2063_v38  ;;  %v368_v34 = vshrl.u32 %v367_v30, 4  ;;  %v419_v36 = vadd.s32 %v417_v33, %v411_v32 }
  0xf0   : > { %v421_v37 = vsel %vm420_vm14, 1, %v2373_v10 }
  0xf1   : > { %749 = vmatpush.bf16.msra.mxu2 %v2062_v39  ;;  %762 = vmatpush.bf16.msra.mxu3 %v2066_v40  ;;  %v369_v38 = vmul.u32 18, %v368_v34  ;;  %v398_v39 = vmul.u32 18, %v397_v35  ;;  %v413_v40 = vshrl.u32 %v409_v18, 16  ;;  %v423_v41 = vadd.s32 %v421_v37, %v419_v36 }
  0xf4   : > { %2083 = vmatmul.msk.bf16.vlgmr.msra.gmra.mxu2 %vm728_vm13, %v671_v43  ;;  %2084 = vmatmul.msk.bf16.vlgmr.msra.gmra.mxu3 %vm728_vm13, %v671_v43 }
  0xf5   : > { %773 = vmatpush.bf16.msrb.mxu2 %v740_v42  ;;  %v370_v42 = vsub.s32 %v2533_v50, %v369_v38 }
  0xf7   : > { %vm431_vm15 = vcmp.ne.s32.totalorder %v370_v42, 0  ;;  %vm434_vm0 = vcmp.lt.s32.totalorder %v370_v42, 0  ;;  %v440_v47 = vadd.s32 18, %v370_v42 }
  0xf8   : > { %vm437_vm11 = vmand %vm434_vm0, %vm431_vm15  ;;  %vm332_vm0 = vcmask 289792  }
  0xf9   : > { %774 = vmatpush.bf16.msrb.mxu2 %v2082_v45  ;;  %v424_v45 = vadd.s32 %v423_v41, %v413_v40  ;;  %v443_v53 = vsel %vm437_vm11, %v440_v47, %v370_v42  ;;  %333 = vst.msk [vmem:[#allocation2] sm:$0xf] %vm332_vm0, %v2373_v10  ;;  %vm804_vm11 = vcmask 1043744  }
  0xfa   : > { %vm446_vm14 = vcmp.ge.s32.totalorder %v443_v53, 1  ;;  %vm449_vm12 = vcmp.le.s32.totalorder %v443_v53, 16  ;;  %336 = vst.msk [vmem:[#allocation3] sm:$0xf] %vm332_vm0, %v2373_v10  ;;  %vm2846_vm0 = vcmask 605184  }
  0xfb   : > { %v425_v46 = vadd.s32 %v424_v45, %v415_v44  ;;  %vm2546_vm6 = vmand %vm446_vm14, %vm449_vm12  ;;  %vm805_vm14 = vcmask 1047556  }
  0xfd   : > { %775 = vmatpush.bf16.msrb.mxu2 %v2070_v48  ;;  %v426_v52 = vshrl.u32 %v425_v46, 4 }
  0xff   : > { %v427_v55 = vmul.u32 18, %v426_v52 }
 0x101   : > { %v428_v60 = vsub.s32 %v343_v9, %v427_v55 }
 0x103   : > { %v442_v2 = vadd.s32 18, %v428_v60 }
 0x104   : > { %2085 = vmatmul.msk.bf16.vlgmr.msrb.gmra.mxu2 %vm728_vm13, %v671_v43  ;;  %v399_v43 = vsub.s32 %v342_v51, %v398_v39  ;;  %v686_v51 = vpop.permute.xlu0 %685 }
 0x106   : > { %vm432_vm3 = vcmp.ne.s32.totalorder %v399_v43, 0  ;;  %vm435_vm10 = vcmp.lt.s32.totalorder %v399_v43, 0  ;;  %v441_v48 = vadd.s32 18, %v399_v43 }
 0x107   : > { %vm438_vm2 = vmand %vm435_vm10, %vm432_vm3  ;;  %vm436_vm10 = vcmp.lt.s32.totalorder %v428_v60, 0  ;;  %vm334_vm3 = vcmask 847392  }
 0x108   : > { %v444_v54 = vsel %vm438_vm2, %v441_v48, %v399_v43  ;;  %vm433_vm2 = vcmp.ne.s32.totalorder %v428_v60, 0  ;;  %335 = vst.msk [vmem:[#allocation2 + $0x8] sm:$0xf] %vm334_vm3, %v2373_v10 }
 0x109   : > { %vm447_vm4 = vcmp.ge.s32.totalorder %v444_v54, 1  ;;  %vm450_vm7 = vcmp.le.s32.totalorder %v444_v54, 16  ;;  %337 = vst.msk [vmem:[#allocation3 + $0x8] sm:$0xf] %vm334_vm3, %v2373_v10  ;;  %vm2847_vm3 = vcmask 744448  }
 0x10a   : > { %vm2550_vm8 = vmand %vm447_vm4, %vm450_vm7 }
 0x10b   : > { %vm439_vm4 = vmand %vm436_vm10, %vm433_vm2  ;;  %vm808_vm10 = vcmask 551936  }
 0x10c   : > { %v445_v5 = vsel %vm439_vm4, %v442_v2, %v428_v60  ;;  %vm2570_vm2 = vmor %vm805_vm14, %vm804_vm11  ;;  %vm825_vm4 = vcmask 257024   ;;  %vm2848_vm11 = vcmask 891904   ;;  %vm2849_vm14 = vcmask 908288  }
 0x10d   : > { %vm448_vm7 = vcmp.ge.s32.totalorder %v445_v5, 1  ;;  %vm451_vm12 = vcmp.le.s32.totalorder %v445_v5, 16 }
 0x10e   : > { %vm2559_vm15 = vmand %vm448_vm7, %vm451_vm12  ;;  %vm2844_vm7 = vcmask 760832   ;;  %vm2845_vm12 = vcmask 613376  }
 0x177   : > { %v751_v57 = vpop.f32.mrf.mxu2  ;;  %v764_v58 = vpop.f32.mrf.mxu3 }
 0x178   : > { %v752_v61 = vadd.f32 %v751_v57, %v686_v51  ;;  %v765_v62 = vadd.f32 %v764_v58, %v686_v51 }
 0x17a   : > { %v787_v63 = vsel %vm2546_vm6, %v752_v61, 0.0  ;;  %v788_v0 = vsel %vm2550_vm8, %v765_v62, 0.0 }
 0x17b   : > { %v790_v1 = vpack.c.bf16 %v788_v0, %v787_v63 }
 0x17d   : > { %794 = vrot.lane.b32.xlu1 %v790_v1, %s2374_s28 }
 0x17f   : > { %v753_v3 = vpop.f32.mrf.mxu2  ;;  %v766_v4 = vpop.f32.mrf.mxu3 }
 0x187   : > { %v777_v7 = vpop.f32.mrf.mxu2 }
 0x188   : > { %v778_v8 = vadd.f32 %v777_v7, %v686_v51 }
 0x18a   : > { %v789_v9 = vsel %vm2559_vm15, %v778_v8, 0.0 }
 0x18b   : > { %v791_v11 = vpack.c.bf16 %v789_v9, %v789_v9 }
 0x18d   : > { %796 = vrot.lane.b32.xlu2 %v791_v11, %s2374_s28 }
 0x18f   : > { %v779_v12 = vpop.f32.mrf.mxu2 }
 0x1e7   : > { %v797_v16 = vpop.permute.xlu2 %796 }
 0x1ef   : > { %v795_v13 = vpop.permute.xlu1 %794 }
 0x1f0   : > { %v798_v15 = vrot.slane %v795_v13, 4 }
 0x1f2   : > { %v800_v17 = vsel %vm728_vm13, %v798_v15, %v795_v13  ;;  %v801_v18 = vsel %vm728_vm13, %v798_v15, %v797_v16 }
 0x1f3   : > { %807 = vst.msk [vmem:[#allocation2] sm:$0xff] %vm2570_vm2, %v800_v17 }
 0x1f4   : > { %809 = vst.msk [vmem:[#allocation2 + $0x8] sm:$0xf] %vm808_vm10, %v801_v18 }
 0x1fa   : > { %v939_v19 = vld [vmem:[#allocation2] sm:$0xff] }
 0x1fb   : > { %943 = vrot.lane.b32.xlu1 %v939_v19, %s2370_s21  ;;  %927 = vrot.lane.b32.xlu2 %v939_v19, %s2369_s20  ;;  %v940_v20 = vld [vmem:[#allocation2 + $0x8] sm:$0xf] }
 0x1fc   : > { %911 = vrot.lane.b32.xlu0 %v939_v19, %s2367_s18  ;;  %v908_v21 = vld [vmem:[#allocation2 + $0x8] sm:$0xf] }
 0x1fd   : > { %v876_v22 = vld [vmem:[#allocation2 + $0x8] sm:$0xf] }
 0x1fe   : > { %v924_v23 = vld [vmem:[#allocation2 + $0x8] sm:$0xf] }
 0x1ff   : > { %v892_v24 = vld [vmem:[#allocation2 + $0x8] sm:$0xf] }
 0x200   : > { %v860_v25 = vld [vmem:[#allocation2 + $0x8] sm:$0xf] }
 0x201   : > { %v844_v26 = vld [vmem:[#allocation2 + $0x8] sm:$0xf] }
 0x202   : > { %v811_v27 = vld [vmem:[#allocation2 + $0x8] sm:$0xf] }
 0x203   : > { %879 = vrot.lane.b32.xlu1 %v939_v19, %s2365_s16  ;;  %847 = vrot.lane.b32.xlu2 %v939_v19, %s2372_s23  ;;  %v828_v28 = vld [vmem:[#allocation2 + $0x8] sm:$0xf] }
 0x204   : > { %895 = vrot.lane.b32.xlu0 %v939_v19, %s2366_s17 }
 0x20b   : > { %863 = vrot.lane.b32.xlu1 %v939_v19, %s2371_s22  ;;  %945 = vrot.lane.b32.xlu2 %v940_v20, %s2370_s21 }
 0x20c   : > { %814 = vrot.lane.b32.xlu0 %v939_v19, %s2364_s15 }
 0x213   : > { %913 = vrot.lane.b32.xlu1 %v908_v21, %s2367_s18  ;;  %881 = vrot.lane.b32.xlu2 %v876_v22, %s2365_s16 }
 0x214   : > { %929 = vrot.lane.b32.xlu0 %v924_v23, %s2369_s20 }
 0x21b   : > { %897 = vrot.lane.b32.xlu1 %v892_v24, %s2366_s17  ;;  %865 = vrot.lane.b32.xlu2 %v860_v25, %s2371_s22 }
 0x21c   : > { %849 = vrot.lane.b32.xlu0 %v844_v26, %s2372_s23 }
 0x223   : > { %816 = vrot.lane.b32.xlu1 %v811_v27, %s2364_s15  ;;  %831 = vrot.lane.b32.xlu2 %v939_v19, %s2368_s19 }
 0x224   : > { %833 = vrot.lane.b32.xlu0 %v828_v28, %s2368_s19 }
 0x255   : > { %v928_v29 = vpop.permute.xlu2 %927 }
 0x256   : > { %v931_v2 = vrot.slane %v928_v29, 4 }
 0x25d   : > { %v2597_v30 = vpop.permute.xlu2 %847 }
 0x25e   : > { %v851_v15 = vrot.slane %v2597_v30, 4 }
 0x265   : > { %v946_v31 = vpop.permute.xlu2 %945 }
 0x266   : > { %954 = vst.msk [vmem:[#allocation4 + $0x68] sm:$0xf] %vm825_vm4, %v946_v31  ;;  %v948_v34 = vrot.slane %v946_v31, 4 }
 0x26d   : > { %v944_v32 = vpop.permute.xlu1 %943  ;;  %v882_v33 = vpop.permute.xlu2 %881 }
 0x26e   : > { %v947_v35 = vrot.slane %v944_v32, 4  ;;  %v912_v36 = vpop.permute.xlu0 %911  ;;  %890 = vst.msk [vmem:[#allocation4 + $0x38] sm:$0xf] %vm825_vm4, %v882_v33  ;;  %v884_v45 = vrot.slane %v882_v33, 4  ;;  %v974_v33 = vld [vmem:[%s2823_s4] sm:$0xff] }
 0x26f   : > { %v915_v63 = vrot.slane %v912_v36, 4  ;;  %977 = vperm.xlu1 %2355, %v974_v33  }
 0x270   : > { %v949_v37 = vsel %vm497_vm1, %v947_v35, %v948_v34 }
 0x271   : > { %v950_v38 = vsel %vm665_vm9, %v944_v32, %v949_v37 }
 0x272   : > { %v1022_v39 = vunpack.c.l.b16 %v950_v38  ;;  %v1023_v40 = vunpack.c.h.b16 %v950_v38 }
 0x274   : > { %v1037_v41 = vpack.c.b16 %v1022_v39, %v1022_v39  ;;  %v1038_v42 = vpack.c.b16 %v1023_v40, %v1023_v40 }
 0x275   : > { %v880_v43 = vpop.permute.xlu1 %879  ;;  %v866_v44 = vpop.permute.xlu2 %865 }
 0x276   : > { %v896_v46 = vpop.permute.xlu0 %895  ;;  %v883_v47 = vrot.slane %v880_v43, 4  ;;  %874 = vst.msk [vmem:[#allocation4 + $0x2c] sm:$0xf] %vm825_vm4, %v866_v44  ;;  %v1058_v48 = vsel %vm497_vm1, %v1037_v41, 0  ;;  %v1061_v52 = vsel %vm497_vm1, %v1038_v42, 0  ;;  %v868_v51 = vrot.slane %v866_v44, 4 }
 0x277   : > { %1069 = vmatpush.bf16.msrb.mxu3 %v1058_v48  ;;  %1082 = vmatpush.bf16.msra.mxu2 %v1061_v52  ;;  %v899_v11 = vrot.slane %v896_v46, 4 }
 0x278   : > { %v885_v53 = vsel %vm497_vm1, %v883_v47, %v884_v45  ;;  %v973_v45 = vld [vmem:[#allocation4 + $0x68] sm:$0xf] }
 0x279   : > { %v886_v54 = vsel %vm583_vm5, %v880_v43, %v885_v53  ;;  %v1024_v53 = vunpack.c.l.b16 %v973_v45 }
 0x27a   : > { %889 = vst [vmem:[#allocation4 + $0x30] sm:$0xff] %v886_v54 }
 0x27d   : > { %v864_v55 = vpop.permute.xlu1 %863  ;;  %v832_v27 = vpop.permute.xlu2 %831 }
 0x27e   : > { %v867_v57 = vrot.slane %v864_v55, 4  ;;  %v815_v58 = vpop.permute.xlu0 %814  ;;  %v835_v34 = vrot.slane %v832_v27, 4 }
 0x280   : > { %v869_v60 = vsel %vm497_vm1, %v867_v57, %v868_v51 }
 0x281   : > { %v870_v61 = vsel %vm2844_vm7, %v864_v55, %v869_v60  ;;  %v2281_v40 = vld [vmem:[#allocation4 + $0x34] sm:$0xf]  ;;  %vm2850_vm7 = vcmask 900096  }
 0x282   : > { %873 = vst [vmem:[#allocation4 + $0x24] sm:$0xff] %v870_v61 }
 0x285   : > { %v914_v62 = vpop.permute.xlu1 %913 }
 0x286   : > { %v916_v0 = vrot.slane %v914_v62, 4  ;;  %922 = vst.msk [vmem:[#allocation4 + $0x50] sm:$0xf] %vm825_vm4, %v914_v62  ;;  %v930_v1 = vpop.permute.xlu0 %929 }
 0x287   : > { %v932_v3 = vrot.slane %v930_v1, 4  ;;  %938 = vst.msk [vmem:[#allocation4 + $0x5c] sm:$0xf] %vm825_vm4, %v930_v1 }
 0x288   : > { %v917_v4 = vsel %vm497_vm1, %v915_v63, %v916_v0  ;;  %v955_v0 = vld [vmem:[%s2822_s3] sm:$0xf] }
 0x289   : > { %v918_v5 = vsel %vm2845_vm12, %v912_v36, %v917_v4  ;;  %v933_v7 = vsel %vm497_vm1, %v931_v2, %v932_v3  ;;  %v2112_v36 = vld [vmem:[#allocation4 + $0x30] sm:$0xf]  ;;  %v2279_v48 = vld [vmem:[#allocation4 + $0x20] sm:$0xf0]  ;;  %v2102_v52 = vld [vmem:[#allocation4 + $0x24] sm:$0xf0] }
 0x28a   : > { %921 = vst [vmem:[#allocation4 + $0x48] sm:$0xff] %v918_v5  ;;  %v934_v8 = vsel %vm2846_vm0, %v928_v29, %v933_v7  ;;  %v818_v29 = vrot.slane %v815_v58, 4  ;;  %vm1052_vm12 = vcmask 588800   ;;  %v2120_v7 = vld [vmem:[#allocation4 + $0x38] sm:$0xf]  ;;  %vm2851_vm0 = vcmask 760832  }
 0x28b   : > { %937 = vst [vmem:[#allocation4 + $0x54] sm:$0xff] %v934_v8 }
 0x28d   : > { %v898_v9 = vpop.permute.xlu1 %897  ;;  %v2132_v2 = vld [vmem:[#allocation4 + $0x50] sm:$0xf] }
 0x28e   : > { %v900_v12 = vrot.slane %v898_v9, 4  ;;  %906 = vst.msk [vmem:[#allocation4 + $0x44] sm:$0xf] %vm825_vm4, %v898_v9  ;;  %v850_v13 = vpop.permute.xlu0 %849  ;;  %v2286_v3 = vld [vmem:[#allocation4 + $0x58] sm:$0xf0] }
 0x28f   : > { %v852_v16 = vrot.slane %v850_v13, 4  ;;  %858 = vst.msk [vmem:[#allocation4 + $0x20] sm:$0xf] %vm825_vm4, %v850_v13  ;;  %v2133_v4 = vor.u32 %v2286_v3, %v2132_v2 }
 0x290   : > { %v901_v17 = vsel %vm497_vm1, %v899_v11, %v900_v12  ;;  %v2280_v11 = vld [vmem:[#allocation4 + $0x28] sm:$0xf0] }
 0x291   : > { %v902_v18 = vsel %vm2847_vm3, %v896_v46, %v901_v17  ;;  %v853_v19 = vsel %vm497_vm1, %v851_v15, %v852_v16  ;;  %v2124_v20 = vld [vmem:[#allocation4 + $0x48] sm:$0xf]  ;;  %v2284_v21 = vld [vmem:[#allocation4 + $0x4c] sm:$0xf]  ;;  %vm2852_vm3 = vcmask 613376  }
 0x292   : > { %905 = vst [vmem:[#allocation4 + $0x3c] sm:$0xff] %v902_v18  ;;  %v854_v22 = vsel %vm2848_vm11, %v2597_v30, %v853_v19  ;;  %v2285_v23 = vld [vmem:[#allocation4 + $0x50] sm:$0xf0]  ;;  %v2126_v24 = vld [vmem:[#allocation4 + $0x54] sm:$0xf0]  ;;  %vm2853_vm11 = vcmask 605184  }
 0x293   : > { %857 = vst [vmem:[#allocation4 + $0x18] sm:$0xff] %v854_v22  ;;  %v2125_v25 = vor.u32 %v2285_v23, %v2124_v20  ;;  %v2129_v26 = vor.u32 %v2284_v21, %v2126_v24 }
 0x295   : > { %1070 = vmatpush.bf16.msrb.mxu3 %v2125_v25  ;;  %1083 = vmatpush.bf16.msra.mxu2 %v2129_v26  ;;  %v817_v28 = vpop.permute.xlu1 %816  ;;  %v2283_v5 = vld [vmem:[#allocation4 + $0x40] sm:$0xf0] }
 0x296   : > { %v819_v31 = vrot.slane %v817_v28, 4  ;;  %826 = vst.msk [vmem:[#allocation4 + $0x8] sm:$0xf] %vm825_vm4, %v817_v28  ;;  %v834_v32 = vpop.permute.xlu0 %833  ;;  %v2121_v8 = vor.u32 %v2283_v5, %v2120_v7  ;;  %v2108_v9 = vld [vmem:[#allocation4 + $0x20] sm:$0xf] }
 0x297   : > { %v836_v30 = vrot.slane %v834_v32, 4  ;;  %842 = vst.msk [vmem:[#allocation4 + $0x14] sm:$0xf] %vm825_vm4, %v834_v32  ;;  %v2109_v12 = vor.u32 %v2280_v11, %v2108_v9 }
 0x298   : > { %v820_v35 = vsel %vm497_vm1, %v818_v29, %v819_v31 }
 0x299   : > { %v821_v37 = vsel %vm2849_vm14, %v815_v58, %v820_v35  ;;  %v837_v38 = vsel %vm497_vm1, %v835_v34, %v836_v30  ;;  %v2282_v39 = vld [vmem:[#allocation4 + $0x38] sm:$0xf0]  ;;  %v2114_v41 = vld [vmem:[#allocation4 + $0x3c] sm:$0xf0]  ;;  %v1039_v58 = vpack.c.b16 %v1024_v53, %v1024_v53  ;;  %vm2854_vm14 = vcmask 744448  }
 0x29a   : > { %824 = vst [vmem:[#allocation4] sm:$0xff] %v821_v37  ;;  %v838_v42 = vsel %vm2850_vm7, %v832_v27, %v837_v38  ;;  %v2113_v43 = vor.u32 %v2282_v39, %v2112_v36  ;;  %v2117_v44 = vor.u32 %v2281_v40, %v2114_v41  ;;  %v2100_v46 = vld [vmem:[#allocation4 + $0x18] sm:$0xf]  ;;  %v2278_v47 = vld [vmem:[#allocation4 + $0x1c] sm:$0xf]  ;;  %v1289_v53 = vld [vmem:[%s2825_s6] sm:$0xff] }
 0x29b   : > { %841 = vst [vmem:[#allocation4 + $0xc] sm:$0xff] %v838_v42  ;;  %v2101_v54 = vor.u32 %v2279_v48, %v2100_v46  ;;  %v2105_v55 = vor.u32 %v2278_v47, %v2102_v52  ;;  %v1064_v1 = vsel %vm497_vm1, %v1039_v58, 0  ;;  %vm2855_vm7 = vcmask 891904  }
 0x29c   : > { %1071 = vmatpush.bf16.msrb.mxu3 %v2113_v43  ;;  %1084 = vmatpush.bf16.msra.mxu2 %v2117_v44 }
 0x29d   : > { %v2096_v13 = vld [vmem:[#allocation4 + $0x8] sm:$0xf] }
 0x29e   : > { %v2277_v15 = vld [vmem:[#allocation4 + $0x10] sm:$0xf0] }
 0x29f   : > { %v2097_v16 = vor.u32 %v2277_v15, %v2096_v13 }
 0x2a0   : > { %1072 = vmatpush.bf16.msrb.mxu3 %v2101_v54  ;;  %1085 = vmatpush.bf16.msra.mxu2 %v2105_v55 }
 0x2a1   : > { %v2088_v51 = vld [vmem:[#allocation4] sm:$0xf]  ;;  %v2275_v57 = vld [vmem:[#allocation4 + $0x4] sm:$0xf] }
 0x2a2   : > { %v2276_v60 = vld [vmem:[#allocation4 + $0x8] sm:$0xf0]  ;;  %v2090_v61 = vld [vmem:[#allocation4 + $0xc] sm:$0xf0] }
 0x2a3   : > { %v2089_v62 = vor.u32 %v2276_v60, %v2088_v51  ;;  %v2093_v63 = vor.u32 %v2275_v57, %v2090_v61 }
 0x2a5   : > { %1073 = vmatpush.bf16.msrb.mxu3 %v2089_v62  ;;  %1086 = vmatpush.bf16.msra.mxu2 %v2093_v63 }
 0x2a8   : > { %2134 = vmatmul.msk.bf16.vlgmr.msrb.gmra.mxu3 %vm1052_vm12, %v955_v0  ;;  %2135 = vmatmul.msk.bf16.vlgmr.msra.gmra.mxu2 %vm1052_vm12, %v955_v0 }
 0x2a9   : > { %1095 = vmatpush.bf16.msra.mxu3 %v1064_v1 }
 0x2ad   : > { %1096 = vmatpush.bf16.msra.mxu3 %v2133_v4 }
 0x2b1   : > { %1097 = vmatpush.bf16.msra.mxu3 %v2121_v8 }
 0x2b5   : > { %1098 = vmatpush.bf16.msra.mxu3 %v2109_v12 }
 0x2b9   : > { %1099 = vmatpush.bf16.msra.mxu3 %v2097_v16 }
 0x2bc   : > { %2136 = vmatmul.msk.bf16.vlgmr.msra.gmra.mxu3 %vm1052_vm12, %v955_v0 }
 0x2e1   : > { %v978_v17 = vpop.permute.xlu1 %977 }
 0x32b   : > { %v1075_v18 = vpop.f32.mrf.mxu3  ;;  %v1088_v19 = vpop.f32.mrf.mxu2 }
 0x32c   : > { %v1076_v20 = vadd.f32 %v1075_v18, %v978_v17  ;;  %v1089_v21 = vadd.f32 %v1088_v19, %v978_v17 }
 0x32e   : > { %v1105_v22 = vmax.f32 %v1076_v20, 0.0  ;;  %v1106_v23 = vmax.f32 %v1089_v21, 0.0 }
 0x330   : > { %v1108_v24 = vsel %vm2546_vm6, %v1105_v22, 0.0  ;;  %v1109_v25 = vsel %vm2550_vm8, %v1106_v23, 0.0 }
 0x331   : > { %v1111_v26 = vpack.c.bf16 %v1109_v25, %v1108_v24 }
 0x333   : > { %v1077_v27 = vpop.f32.mrf.mxu3  ;;  %1115 = vrot.lane.b32.xlu2 %v1111_v26, %s2374_s28  ;;  %v1090_v28 = vpop.f32.mrf.mxu2 }
 0x33f   : > { %v1101_v29 = vpop.f32.mrf.mxu3 }
 0x340   : > { %v1102_v31 = vadd.f32 %v1101_v29, %v978_v17 }
 0x342   : > { %v1107_v32 = vmax.f32 %v1102_v31, 0.0 }
 0x344   : > { %v1110_v33 = vsel %vm2559_vm15, %v1107_v32, 0.0 }
 0x345   : > { %v1112_v34 = vpack.c.bf16 %v1110_v33, %v1110_v33 }
 0x347   : > { %v1103_v30 = vpop.f32.mrf.mxu3  ;;  %1117 = vrot.lane.b32.xlu0 %v1112_v34, %s2374_s28 }
 0x38d   : > { %v1116_v35 = vpop.permute.xlu2 %1115 }
 0x38e   : > { %v1119_v36 = vrot.slane %v1116_v35, 4 }
 0x390   : > { %v1120_v37 = vsel %vm728_vm13, %v1119_v36, %v1116_v35 }
 0x391   : > { %1124 = vst.msk [vmem:[#allocation3] sm:$0xff] %vm2570_vm2, %v1120_v37 }
 0x398   : > { %v1254_v38 = vld [vmem:[#allocation3] sm:$0xff] }
 0x399   : > { %1258 = vrot.lane.b32.xlu1 %v1254_v38, %s2370_s21  ;;  %1242 = vrot.lane.b32.xlu2 %v1254_v38, %s2369_s20 }
 0x39a   : > { %1226 = vrot.lane.b32.xlu0 %v1254_v38, %s2367_s18 }
 0x3a1   : > { %1194 = vrot.lane.b32.xlu1 %v1254_v38, %s2365_s16  ;;  %1162 = vrot.lane.b32.xlu2 %v1254_v38, %s2372_s23 }
 0x3a2   : > { %1210 = vrot.lane.b32.xlu0 %v1254_v38, %s2366_s17 }
 0x3a9   : > { %1178 = vrot.lane.b32.xlu1 %v1254_v38, %s2371_s22 }
 0x3aa   : > { %1130 = vrot.lane.b32.xlu0 %v1254_v38, %s2364_s15 }
 0x3b9   : > { %v1118_v39 = vpop.permute.xlu0 %1117 }
 0x3ba   : > { %v1121_v40 = vsel %vm728_vm13, %v1119_v36, %v1118_v39 }
 0x3bb   : > { %1125 = vst.msk [vmem:[#allocation3 + $0x8] sm:$0xf] %vm808_vm10, %v1121_v40 }
 0x3c2   : > { %v1223_v41 = vld [vmem:[#allocation3 + $0x8] sm:$0xf] }
 0x3c3   : > { %v1255_v42 = vld [vmem:[#allocation3 + $0x8] sm:$0xf]  ;;  %1228 = vrot.lane.b32.xlu1 %v1223_v41, %s2367_s18 }
 0x3c4   : > { %v1239_v43 = vld [vmem:[#allocation3 + $0x8] sm:$0xf]  ;;  %1260 = vrot.lane.b32.xlu2 %v1255_v42, %s2370_s21 }
 0x3c5   : > { %1244 = vrot.lane.b32.xlu0 %v1239_v43, %s2369_s20  ;;  %v1207_v44 = vld [vmem:[#allocation3 + $0x8] sm:$0xf] }
 0x3c6   : > { %v1191_v45 = vld [vmem:[#allocation3 + $0x8] sm:$0xf] }
 0x3c7   : > { %v1159_v46 = vld [vmem:[#allocation3 + $0x8] sm:$0xf] }
 0x3c8   : > { %v1127_v47 = vld [vmem:[#allocation3 + $0x8] sm:$0xf] }
 0x3c9   : > { %v1175_v48 = vld [vmem:[#allocation3 + $0x8] sm:$0xf] }
 0x3ca   : > { %v1143_v52 = vld [vmem:[#allocation3 + $0x8] sm:$0xf] }
 0x3cb   : > { %1212 = vrot.lane.b32.xlu1 %v1207_v44, %s2366_s17 }
 0x3cc   : > { %1196 = vrot.lane.b32.xlu2 %v1191_v45, %s2365_s16 }
 0x3cd   : > { %1164 = vrot.lane.b32.xlu0 %v1159_v46, %s2372_s23 }
 0x3d3   : > { %1132 = vrot.lane.b32.xlu1 %v1127_v47, %s2364_s15 }
 0x3d4   : > { %1180 = vrot.lane.b32.xlu2 %v1175_v48, %s2371_s22 }
 0x3d5   : > { %1148 = vrot.lane.b32.xlu0 %v1143_v52, %s2368_s19 }
 0x3db   : > { %1292 = vperm.xlu1 %2355, %v1289_v53  }
 0x3dc   : > { %1146 = vrot.lane.b32.xlu2 %v1254_v38, %s2368_s19 }
 0x3f3   : > { %v1243_v54 = vpop.permute.xlu2 %1242 }
 0x3f4   : > { %v1246_v32 = vrot.slane %v1243_v54, 4 }
 0x3fb   : > { %v2674_v55 = vpop.permute.xlu2 %1162 }
 0x3fc   : > { %v1166_v43 = vrot.slane %v2674_v55, 4 }
 0x40b   : > { %v1259_v51 = vpop.permute.xlu1 %1258 }
 0x40c   : > { %v1227_v57 = vpop.permute.xlu0 %1226  ;;  %v1262_v60 = vrot.slane %v1259_v51, 4 }
 0x40d   : > { %v1230_v28 = vrot.slane %v1227_v57, 4 }
 0x413   : > { %v1195_v63 = vpop.permute.xlu1 %1194 }
 0x414   : > { %v1211_v3 = vpop.permute.xlu0 %1210  ;;  %v1198_v7 = vrot.slane %v1195_v63, 4 }
 0x415   : > { %v1214_v39 = vrot.slane %v1211_v3, 4 }
 0x41b   : > { %v1179_v20 = vpop.permute.xlu1 %1178 }
 0x41c   : > { %v1182_v22 = vrot.slane %v1179_v20, 4  ;;  %v2685_v23 = vpop.permute.xlu0 %1130 }
 0x41e   : > { %v1261_v58 = vpop.permute.xlu2 %1260 }
 0x41f   : > { %v1263_v61 = vrot.slane %v1261_v58, 4  ;;  %1269 = vst.msk [vmem:[#allocation4 + $0x68] sm:$0xf] %vm825_vm4, %v1261_v58 }
 0x421   : > { %v1264_v62 = vsel %vm497_vm1, %v1262_v60, %v1263_v61 }
 0x422   : > { %v1265_v0 = vsel %vm665_vm9, %v1259_v51, %v1264_v62 }
 0x423   : > { %v1337_v1 = vunpack.c.l.b16 %v1265_v0  ;;  %v1338_v2 = vunpack.c.h.b16 %v1265_v0 }
 0x425   : > { %v1352_v4 = vpack.c.b16 %v1337_v1, %v1337_v1  ;;  %v1353_v5 = vpack.c.b16 %v1338_v2, %v1338_v2  ;;  %v1134_v1 = vrot.slane %v2685_v23, 4 }
 0x426   : > { %v1197_v8 = vpop.permute.xlu2 %1196  ;;  %v1288_v9 = vld [vmem:[#allocation4 + $0x68] sm:$0xf] }
 0x427   : > { %v1199_v11 = vrot.slane %v1197_v8, 4  ;;  %1205 = vst.msk [vmem:[#allocation4 + $0x38] sm:$0xf] %vm825_vm4, %v1197_v8  ;;  %v1339_v12 = vunpack.c.l.b16 %v1288_v9  ;;  %v1371_v13 = vsel %vm497_vm1, %v1352_v4, 0  ;;  %v1374_v15 = vsel %vm497_vm1, %v1353_v5, 0 }
 0x428   : > { %1382 = vmatpush.bf16.msrb.mxu2 %v1371_v13  ;;  %1395 = vmatpush.bf16.msrb.mxu3 %v1374_v15 }
 0x429   : > { %v1200_v16 = vsel %vm497_vm1, %v1198_v7, %v1199_v11  ;;  %v1354_v17 = vpack.c.b16 %v1339_v12, %v1339_v12 }
 0x42a   : > { %v1201_v18 = vsel %vm583_vm5, %v1195_v63, %v1200_v16 }
 0x42b   : > { %1204 = vst [vmem:[#allocation4 + $0x30] sm:$0xff] %v1201_v18  ;;  %v1377_v19 = vsel %vm497_vm1, %v1354_v17, 0 }
 0x42c   : > { %1408 = vmatpush.bf16.msra.mxu0 %v1377_v19 }
 0x42e   : > { %v1181_v21 = vpop.permute.xlu2 %1180  ;;  %v2171_v63 = vld [vmem:[#allocation4 + $0x38] sm:$0xf] }
 0x42f   : > { %v1183_v24 = vrot.slane %v1181_v21, 4  ;;  %1189 = vst.msk [vmem:[#allocation4 + $0x2c] sm:$0xf] %vm825_vm4, %v1181_v21 }
 0x431   : > { %v1184_v25 = vsel %vm497_vm1, %v1182_v22, %v1183_v24 }
 0x432   : > { %v1185_v26 = vsel %vm2851_vm0, %v1179_v20, %v1184_v25  ;;  %v2163_v8 = vld [vmem:[#allocation4 + $0x30] sm:$0xf]  ;;  %vm2856_vm0 = vcmask 908288   ;;  %v2293_v15 = vld [vmem:[#allocation4 + $0x34] sm:$0xf] }
 0x433   : > { %1188 = vst [vmem:[#allocation4 + $0x24] sm:$0xff] %v1185_v26 }
 0x435   : > { %v1229_v27 = vpop.permute.xlu1 %1228 }
 0x436   : > { %v1231_v29 = vrot.slane %v1229_v27, 4  ;;  %1237 = vst.msk [vmem:[#allocation4 + $0x50] sm:$0xf] %vm825_vm4, %v1229_v27  ;;  %v1147_v61 = vpop.permute.xlu2 %1146  ;;  %v2292_v20 = vld [vmem:[#allocation4 + $0x28] sm:$0xf0] }
 0x437   : > { %v1245_v31 = vpop.permute.xlu0 %1244  ;;  %v1150_v5 = vrot.slane %v1147_v61, 4 }
 0x438   : > { %v1247_v33 = vrot.slane %v1245_v31, 4  ;;  %1253 = vst.msk [vmem:[#allocation4 + $0x5c] sm:$0xf] %vm825_vm4, %v1245_v31  ;;  %v1232_v34 = vsel %vm497_vm1, %v1230_v28, %v1231_v29 }
 0x439   : > { %v1233_v30 = vsel %vm2852_vm3, %v1227_v57, %v1232_v34  ;;  %vm2857_vm3 = vcmask 900096  }
 0x43a   : > { %v1248_v35 = vsel %vm497_vm1, %v1246_v32, %v1247_v33  ;;  %1236 = vst [vmem:[#allocation4 + $0x48] sm:$0xff] %v1233_v30  ;;  %v2291_v25 = vld [vmem:[#allocation4 + $0x20] sm:$0xf0]  ;;  %v1270_v32 = vld [vmem:[%s2824_s5] sm:$0xf] }
 0x43b   : > { %v1249_v36 = vsel %vm2853_vm11, %v1243_v54, %v1248_v35 }
 0x43c   : > { %1252 = vst [vmem:[#allocation4 + $0x54] sm:$0xff] %v1249_v36 }
 0x43d   : > { %v1213_v37 = vpop.permute.xlu1 %1212  ;;  %v2183_v38 = vld [vmem:[#allocation4 + $0x50] sm:$0xf] }
 0x43e   : > { %v1215_v40 = vrot.slane %v1213_v37, 4  ;;  %1221 = vst.msk [vmem:[#allocation4 + $0x44] sm:$0xf] %vm825_vm4, %v1213_v37 }
 0x43f   : > { %v1165_v41 = vpop.permute.xlu0 %1164  ;;  %v2298_v42 = vld [vmem:[#allocation4 + $0x58] sm:$0xf0] }
 0x440   : > { %v1167_v44 = vrot.slane %v1165_v41, 4  ;;  %1173 = vst.msk [vmem:[#allocation4 + $0x20] sm:$0xf] %vm825_vm4, %v1165_v41  ;;  %v2184_v45 = vor.u32 %v2298_v42, %v2183_v38  ;;  %v1216_v46 = vsel %vm497_vm1, %v1214_v39, %v1215_v40 }
 0x441   : > { %v1217_v47 = vsel %vm2854_vm14, %v1211_v3, %v1216_v46  ;;  %v2175_v52 = vld [vmem:[#allocation4 + $0x48] sm:$0xf]  ;;  %v2296_v53 = vld [vmem:[#allocation4 + $0x4c] sm:$0xf] }
 0x442   : > { %v1168_v48 = vsel %vm497_vm1, %v1166_v43, %v1167_v44  ;;  %1409 = vmatpush.bf16.msra.mxu0 %v2184_v45  ;;  %1220 = vst [vmem:[#allocation4 + $0x3c] sm:$0xff] %v1217_v47 }
 0x443   : > { %v1169_v54 = vsel %vm2855_vm7, %v2674_v55, %v1168_v48  ;;  %v2297_v51 = vld [vmem:[#allocation4 + $0x50] sm:$0xf0]  ;;  %v2177_v57 = vld [vmem:[#allocation4 + $0x54] sm:$0xf0] }
 0x444   : > { %1172 = vst [vmem:[#allocation4 + $0x18] sm:$0xff] %v1169_v54  ;;  %v2176_v58 = vor.u32 %v2297_v51, %v2175_v52  ;;  %v2180_v60 = vor.u32 %v2296_v53, %v2177_v57 }
 0x445   : > { %v1133_v62 = vpop.permute.xlu1 %1132  ;;  %v2295_v0 = vld [vmem:[#allocation4 + $0x40] sm:$0xf0] }
 0x446   : > { %1383 = vmatpush.bf16.msrb.mxu2 %v2176_v58  ;;  %1396 = vmatpush.bf16.msrb.mxu3 %v2180_v60  ;;  %v1135_v2 = vrot.slane %v1133_v62, 4  ;;  %1141 = vst.msk [vmem:[#allocation4 + $0x8] sm:$0xf] %vm825_vm4, %v1133_v62  ;;  %v2172_v4 = vor.u32 %v2295_v0, %v2171_v63 }
 0x447   : > { %v1149_v3 = vpop.permute.xlu0 %1148  ;;  %v2159_v9 = vld [vmem:[#allocation4 + $0x20] sm:$0xf] }
 0x448   : > { %v1151_v55 = vrot.slane %v1149_v3, 4  ;;  %1157 = vst.msk [vmem:[#allocation4 + $0x14] sm:$0xf] %vm825_vm4, %v1149_v3  ;;  %v1136_v7 = vsel %vm497_vm1, %v1134_v1, %v1135_v2  ;;  %1410 = vmatpush.bf16.msra.mxu0 %v2172_v4  ;;  %v2160_v21 = vor.u32 %v2292_v20, %v2159_v9 }
 0x449   : > { %v1137_v11 = vsel %vm2856_vm0, %v2685_v23, %v1136_v7  ;;  %v2294_v13 = vld [vmem:[#allocation4 + $0x38] sm:$0xf0]  ;;  %v2165_v16 = vld [vmem:[#allocation4 + $0x3c] sm:$0xf0]  ;;  %v2153_v23 = vld [vmem:[#allocation4 + $0x24] sm:$0xf0] }
 0x44a   : > { %v1152_v12 = vsel %vm497_vm1, %v1150_v5, %v1151_v55  ;;  %1140 = vst [vmem:[#allocation4] sm:$0xff] %v1137_v11  ;;  %v2164_v18 = vor.u32 %v2294_v13, %v2163_v8  ;;  %v2168_v19 = vor.u32 %v2293_v15, %v2165_v16  ;;  %v1599_v5 = vld [vmem:[%s2827_s8] sm:$0xff] }
 0x44b   : > { %v1153_v17 = vsel %vm2857_vm3, %v1147_v61, %v1152_v12  ;;  %v2151_v22 = vld [vmem:[#allocation4 + $0x18] sm:$0xf]  ;;  %v2290_v24 = vld [vmem:[#allocation4 + $0x1c] sm:$0xf] }
 0x44c   : > { %1156 = vst [vmem:[#allocation4 + $0xc] sm:$0xff] %v1153_v17  ;;  %1384 = vmatpush.bf16.msrb.mxu2 %v2164_v18  ;;  %1397 = vmatpush.bf16.msrb.mxu3 %v2168_v19  ;;  %v2152_v27 = vor.u32 %v2291_v25, %v2151_v22  ;;  %v2156_v28 = vor.u32 %v2290_v24, %v2153_v23 }
 0x44d   : > { %1411 = vmatpush.bf16.msra.mxu0 %v2160_v21  ;;  %v2147_v26 = vld [vmem:[#allocation4 + $0x8] sm:$0xf]  ;;  %v1293_v38 = vpop.permute.xlu1 %1292 }
 0x44f   : > { %v2289_v29 = vld [vmem:[#allocation4 + $0x10] sm:$0xf0] }
 0x450   : > { %v2148_v31 = vor.u32 %v2289_v29, %v2147_v26  ;;  %1385 = vmatpush.bf16.msrb.mxu2 %v2152_v27  ;;  %1398 = vmatpush.bf16.msrb.mxu3 %v2156_v28 }
 0x451   : > { %v2139_v33 = vld [vmem:[#allocation4] sm:$0xf]  ;;  %v2287_v34 = vld [vmem:[#allocation4 + $0x4] sm:$0xf] }
 0x452   : > { %1412 = vmatpush.bf16.msra.mxu0 %v2148_v31 }
 0x453   : > { %v2288_v30 = vld [vmem:[#allocation4 + $0x8] sm:$0xf0]  ;;  %v2141_v35 = vld [vmem:[#allocation4 + $0xc] sm:$0xf0] }
 0x454   : > { %v2140_v36 = vor.u32 %v2288_v30, %v2139_v33  ;;  %v2144_v37 = vor.u32 %v2287_v34, %v2141_v35 }
 0x455   : > { %2187 = vmatmul.msk.bf16.vlgmr.msra.gmra.mxu0 %vm1052_vm12, %v1270_v32 }
 0x456   : > { %1386 = vmatpush.bf16.msrb.mxu2 %v2140_v36  ;;  %1399 = vmatpush.bf16.msrb.mxu3 %v2144_v37 }
 0x459   : > { %2185 = vmatmul.msk.bf16.vlgmr.msrb.gmra.mxu2 %vm1052_vm12, %v1270_v32  ;;  %2186 = vmatmul.msk.bf16.vlgmr.msrb.gmra.mxu3 %vm1052_vm12, %v1270_v32 }
 0x4d2   : > { %v1414_v39 = vpop.f32.mrf.mxu0 }
 0x4d3   : > { %v1415_v40 = vadd.f32 %v1414_v39, %v1293_v38 }
 0x4d5   : > { %v1420_v41 = vsel %vm2559_vm15, %v1415_v40, 0.0  ;;  %vm2863_vm15 = vmmov %vm2856_vm0 }
 0x4d6   : > { %v1422_v42 = vpack.c.bf16 %v1420_v41, %v1420_v41 }
 0x4d8   : > { %1427 = vrot.lane.b32.xlu0 %v1422_v42, %s2374_s28 }
 0x4da   : > { %v1416_v43 = vpop.f32.mrf.mxu0 }
 0x4dc   : > { %v1388_v44 = vpop.f32.mrf.mxu2  ;;  %v1401_v45 = vpop.f32.mrf.mxu3 }
 0x4dd   : > { %v1389_v46 = vadd.f32 %v1388_v44, %v1293_v38  ;;  %v1402_v47 = vadd.f32 %v1401_v45, %v1293_v38 }
 0x4df   : > { %v1418_v48 = vsel %vm2546_vm6, %v1389_v46, 0.0  ;;  %v1419_v52 = vsel %vm2550_vm8, %v1402_v47, 0.0  ;;  %vm2858_vm6 = vcmask 613376   ;;  %vm2859_vm8 = vmmov %vm2853_vm11  ;;  %vm1864_vm11 = vcmask 1040384  }
 0x4e0   : > { %v1421_v53 = vpack.c.bf16 %v1419_v52, %v1418_v48 }
 0x4e2   : > { %1425 = vrot.lane.b32.xlu2 %v1421_v53, %s2374_s28  ;;  %s2378_s28 = smov 4  }
 0x4e4   : > { %v1390_v54 = vpop.f32.mrf.mxu2  ;;  %v1403_v6 = vpop.f32.mrf.mxu3 }
 0x53c   : > { %v1426_v51 = vpop.permute.xlu2 %1425 }
 0x53d   : > { %v1429_v57 = vrot.slane %v1426_v51, 4 }
 0x53f   : > { %v1430_v58 = vsel %vm728_vm13, %v1429_v57, %v1426_v51 }
 0x540   : > { %1434 = vst.msk [vmem:[#allocation2] sm:$0xff] %vm2570_vm2, %v1430_v58  ;;  %vm2864_vm2 = vmmov %vm2857_vm3 }
 0x547   : > { %v1564_v60 = vld [vmem:[#allocation2] sm:$0xff] }
 0x548   : > { %1568 = vrot.lane.b32.xlu1 %v1564_v60, %s2370_s21  ;;  %1536 = vrot.lane.b32.xlu0 %v1564_v60, %s2367_s18 }
 0x54a   : > { %v1428_v56 = vpop.permute.xlu0 %1427 }
 0x54b   : > { %v1431_v59 = vsel %vm728_vm13, %v1429_v57, %v1428_v56  ;;  %vm2862_vm13 = vcmask 760832  }
 0x54c   : > { %1435 = vst.msk [vmem:[#allocation2 + $0x8] sm:$0xf] %vm808_vm10, %v1431_v59  ;;  %vm2865_vm10 = vmmov %vm2864_vm2 }
 0x553   : > { %v1565_v61 = vld [vmem:[#allocation2 + $0x8] sm:$0xf] }
 0x554   : > { %v1533_v62 = vld [vmem:[#allocation2 + $0x8] sm:$0xf]  ;;  %1570 = vrot.lane.b32.xlu2 %v1565_v61, %s2370_s21  ;;  %s2052_s21 = sshll.u32 %s2867_s10, 2 }
 0x555   : > { %v1549_v63 = vld [vmem:[#allocation2 + $0x8] sm:$0xf]  ;;  %1538 = vrot.lane.b32.xlu1 %v1533_v62, %s2367_s18  ;;  %s2391_s18 = smov 61  }
 0x556   : > { %1554 = vrot.lane.b32.xlu0 %v1549_v63, %s2369_s20  ;;  %v1501_v14 = vld [vmem:[#allocation2 + $0x8] sm:$0xf] }
 0x557   : > { %v1517_v0 = vld [vmem:[#allocation2 + $0x8] sm:$0xf] }
 0x558   : > { %v1469_v1 = vld [vmem:[#allocation2 + $0x8] sm:$0xf] }
 0x559   : > { %v1437_v2 = vld [vmem:[#allocation2 + $0x8] sm:$0xf] }
 0x55a   : > { %v1485_v3 = vld [vmem:[#allocation2 + $0x8] sm:$0xf] }
 0x55b   : > { %v1453_v4 = vld [vmem:[#allocation2 + $0x8] sm:$0xf] }
 0x55c   : > { %1552 = vrot.lane.b32.xlu2 %v1564_v60, %s2369_s20  ;;  %s2392_s20 = smov 71  }
 0x55d   : > { %1504 = vrot.lane.b32.xlu1 %v1564_v60, %s2365_s16 }
 0x55e   : > { %1520 = vrot.lane.b32.xlu0 %v1564_v60, %s2366_s17 }
 0x564   : > { %1506 = vrot.lane.b32.xlu2 %v1501_v14, %s2365_s16 }
 0x565   : > { %1522 = vrot.lane.b32.xlu1 %v1517_v0, %s2366_s17 }
 0x566   : > { %1474 = vrot.lane.b32.xlu0 %v1469_v1, %s2372_s23 }
 0x56c   : > { %1472 = vrot.lane.b32.xlu2 %v1564_v60, %s2372_s23  ;;  %s2376_s23 = smov 94  }
 0x56d   : > { %1488 = vrot.lane.b32.xlu1 %v1564_v60, %s2371_s22 }
 0x56e   : > { %1440 = vrot.lane.b32.xlu0 %v1564_v60, %s2364_s15 }
 0x574   : > { %1490 = vrot.lane.b32.xlu2 %v1485_v3, %s2371_s22  ;;  %s2375_s22 = smov 56  }
 0x575   : > { %1442 = vrot.lane.b32.xlu1 %v1437_v2, %s2364_s15  ;;  %s2393_s15 = smov 81  }
 0x576   : > { %1458 = vrot.lane.b32.xlu0 %v1453_v4, %s2368_s19 }
 0x57c   : > { %1456 = vrot.lane.b32.xlu2 %v1564_v60, %s2368_s19 }
 0x57d   : > { %1602 = vperm.xlu1 %2355, %v1599_v5  }
 0x5ae   : > { %v1571_v55 = vpop.permute.xlu2 %1570 }
 0x5af   : > { %1579 = vst.msk [vmem:[#allocation4 + $0x68] sm:$0xf] %vm825_vm4, %v1571_v55  ;;  %v1573_v13 = vrot.slane %v1571_v55, 4 }
 0x5b6   : > { %v1553_v7 = vpop.permute.xlu2 %1552  ;;  %v1598_v8 = vld [vmem:[#allocation4 + $0x68] sm:$0xf] }
 0x5b7   : > { %v1649_v9 = vunpack.c.l.b16 %v1598_v8  ;;  %v1556_v33 = vrot.slane %v1553_v7, 4 }
 0x5b9   : > { %v1664_v11 = vpack.c.b16 %v1649_v9, %v1649_v9 }
 0x5ba   : > { %v1569_v12 = vpop.permute.xlu1 %1568  ;;  %v1537_v20 = vpop.permute.xlu0 %1536 }
 0x5bb   : > { %v1572_v15 = vrot.slane %v1569_v12, 4  ;;  %v1687_v16 = vsel %vm497_vm1, %v1664_v11, 0  ;;  %v1540_v29 = vrot.slane %v1537_v20, 4 }
 0x5bc   : > { %1718 = vmatpush.bf16.msra.mxu3 %v1687_v16 }
 0x5bd   : > { %v1574_v17 = vsel %vm497_vm1, %v1572_v15, %v1573_v13 }
 0x5be   : > { %v1575_v18 = vsel %vm665_vm9, %v1569_v12, %v1574_v17  ;;  %v1507_v19 = vpop.permute.xlu2 %1506  ;;  %vm2861_vm9 = vmmov %vm2855_vm7 }
 0x5bf   : > { %v1647_v21 = vunpack.c.l.b16 %v1575_v18  ;;  %v1648_v22 = vunpack.c.h.b16 %v1575_v18  ;;  %1515 = vst.msk [vmem:[#allocation4 + $0x38] sm:$0xf] %vm825_vm4, %v1507_v19  ;;  %v1509_v41 = vrot.slane %v1507_v19, 4 }
 0x5c1   : > { %v1662_v24 = vpack.c.b16 %v1647_v21, %v1647_v21  ;;  %v1663_v25 = vpack.c.b16 %v1648_v22, %v1648_v22 }
 0x5c3   : > { %v1681_v23 = vsel %vm497_vm1, %v1662_v24, 0  ;;  %v1684_v26 = vsel %vm497_vm1, %v1663_v25, 0 }
 0x5c4   : > { %1692 = vmatpush.bf16.msra.mxu1 %v1681_v23  ;;  %1705 = vmatpush.bf16.msra.mxu2 %v1684_v26 }
 0x5c6   : > { %v1473_v28 = vpop.permute.xlu2 %1472  ;;  %v2222_v2 = vld [vmem:[#allocation4 + $0x38] sm:$0xf] }
 0x5c7   : > { %v1539_v27 = vpop.permute.xlu1 %1538  ;;  %v1476_v59 = vrot.slane %v1473_v28, 4 }
 0x5c8   : > { %v1541_v31 = vrot.slane %v1539_v27, 4  ;;  %1547 = vst.msk [vmem:[#allocation4 + $0x50] sm:$0xf] %vm825_vm4, %v1539_v27  ;;  %v1555_v32 = vpop.permute.xlu0 %1554 }
 0x5c9   : > { %v1557_v34 = vrot.slane %v1555_v32, 4  ;;  %1563 = vst.msk [vmem:[#allocation4 + $0x5c] sm:$0xf] %vm825_vm4, %v1555_v32 }
 0x5ca   : > { %v1542_v30 = vsel %vm497_vm1, %v1540_v29, %v1541_v31 }
 0x5cb   : > { %v1543_v35 = vsel %vm2858_vm6, %v1537_v20, %v1542_v30  ;;  %v1558_v36 = vsel %vm497_vm1, %v1556_v33, %v1557_v34 }
 0x5cc   : > { %1546 = vst [vmem:[#allocation4 + $0x48] sm:$0xff] %v1543_v35  ;;  %v1559_v37 = vsel %vm2859_vm8, %v1553_v7, %v1558_v36 }
 0x5cd   : > { %1562 = vst [vmem:[#allocation4 + $0x54] sm:$0xff] %v1559_v37 }
 0x5ce   : > { %v1491_v39 = vpop.permute.xlu2 %1490 }
 0x5cf   : > { %v1505_v38 = vpop.permute.xlu1 %1504  ;;  %v2234_v40 = vld [vmem:[#allocation4 + $0x50] sm:$0xf]  ;;  %1499 = vst.msk [vmem:[#allocation4 + $0x2c] sm:$0xf] %vm825_vm4, %v1491_v39  ;;  %v1493_v4 = vrot.slane %v1491_v39, 4 }
 0x5d0   : > { %v1521_v42 = vpop.permute.xlu0 %1520  ;;  %v1508_v43 = vrot.slane %v1505_v38, 4  ;;  %v2310_v44 = vld [vmem:[#allocation4 + $0x58] sm:$0xf0] }
 0x5d1   : > { %v2235_v45 = vor.u32 %v2310_v44, %v2234_v40  ;;  %v1524_v58 = vrot.slane %v1521_v42, 4 }
 0x5d2   : > { %v1510_v46 = vsel %vm497_vm1, %v1508_v43, %v1509_v41  ;;  %v1580_v41 = vld [vmem:[%s2826_s7] sm:$0xf] }
 0x5d3   : > { %v1511_v47 = vsel %vm583_vm5, %v1505_v38, %v1510_v46  ;;  %1719 = vmatpush.bf16.msra.mxu3 %v2235_v45  ;;  %v2226_v48 = vld [vmem:[#allocation4 + $0x48] sm:$0xf]  ;;  %v2308_v52 = vld [vmem:[#allocation4 + $0x4c] sm:$0xf]  ;;  %vm2860_vm5 = vmmov %vm2854_vm14 }
 0x5d4   : > { %1514 = vst [vmem:[#allocation4 + $0x30] sm:$0xff] %v1511_v47  ;;  %v2309_v53 = vld [vmem:[#allocation4 + $0x50] sm:$0xf0]  ;;  %v2228_v54 = vld [vmem:[#allocation4 + $0x54] sm:$0xf0] }
 0x5d5   : > { %v2227_v6 = vor.u32 %v2309_v53, %v2226_v48  ;;  %v2231_v51 = vor.u32 %v2308_v52, %v2228_v54 }
 0x5d6   : > { %v2304_v19 = vld [vmem:[#allocation4 + $0x28] sm:$0xf0]  ;;  %v1457_v21 = vpop.permute.xlu2 %1456 }
 0x5d7   : > { %1693 = vmatpush.bf16.msra.mxu1 %v2227_v6  ;;  %1706 = vmatpush.bf16.msra.mxu2 %v2231_v51  ;;  %v1523_v57 = vpop.permute.xlu1 %1522  ;;  %v1460_v26 = vrot.slane %v1457_v21, 4 }
 0x5d8   : > { %v1475_v60 = vpop.permute.xlu0 %1474  ;;  %v1525_v56 = vrot.slane %v1523_v57, 4  ;;  %1531 = vst.msk [vmem:[#allocation4 + $0x44] sm:$0xf] %vm825_vm4, %v1523_v57 }
 0x5d9   : > { %v1477_v61 = vrot.slane %v1475_v60, 4  ;;  %1483 = vst.msk [vmem:[#allocation4 + $0x20] sm:$0xf] %vm825_vm4, %v1475_v60 }
 0x5da   : > { %v1526_v62 = vsel %vm497_vm1, %v1524_v58, %v1525_v56 }
 0x5db   : > { %v1478_v63 = vsel %vm497_vm1, %v1476_v59, %v1477_v61  ;;  %v1527_v14 = vsel %vm2860_vm5, %v1521_v42, %v1526_v62  ;;  %v2214_v9 = vld [vmem:[#allocation4 + $0x30] sm:$0xf]  ;;  %v2305_v15 = vld [vmem:[#allocation4 + $0x34] sm:$0xf]  ;;  %vm1851_vm5 = vcmask 146432  }
 0x5dc   : > { %v1479_v0 = vsel %vm2861_vm9, %v1473_v28, %v1478_v63  ;;  %1530 = vst [vmem:[#allocation4 + $0x3c] sm:$0xff] %v1527_v14  ;;  %vm1811_vm9 = vcmask 31744  }
 0x5dd   : > { %1482 = vst [vmem:[#allocation4 + $0x18] sm:$0xff] %v1479_v0 }
 0x5df   : > { %v1489_v1 = vpop.permute.xlu1 %1488  ;;  %v2307_v3 = vld [vmem:[#allocation4 + $0x40] sm:$0xf0] }
 0x5e0   : > { %v1492_v5 = vrot.slane %v1489_v1, 4  ;;  %v1441_v55 = vpop.permute.xlu0 %1440  ;;  %v2223_v7 = vor.u32 %v2307_v3, %v2222_v2  ;;  %v2210_v11 = vld [vmem:[#allocation4 + $0x20] sm:$0xf] }
 0x5e1   : > { %v2211_v20 = vor.u32 %v2304_v19, %v2210_v11  ;;  %v1444_v24 = vrot.slane %v1441_v55, 4  ;;  %v456_v11 = vshrl.u32 %v340_v49, 7 }
 0x5e2   : > { %v1494_v8 = vsel %vm497_vm1, %v1492_v5, %v1493_v4  ;;  %1720 = vmatpush.bf16.msra.mxu3 %v2223_v7 }
 0x5e3   : > { %v1495_v12 = vsel %vm2862_vm13, %v1489_v1, %v1494_v8  ;;  %v2306_v13 = vld [vmem:[#allocation4 + $0x38] sm:$0xf0]  ;;  %v2216_v16 = vld [vmem:[#allocation4 + $0x3c] sm:$0xf0]  ;;  %vm338_vm13 = vcmask 977920  }
 0x5e4   : > { %1498 = vst [vmem:[#allocation4 + $0x24] sm:$0xff] %v1495_v12  ;;  %v2215_v17 = vor.u32 %v2306_v13, %v2214_v9  ;;  %v2219_v18 = vor.u32 %v2305_v15, %v2216_v16  ;;  %v2202_v29 = vld [vmem:[#allocation4 + $0x18] sm:$0xf]  ;;  %v2302_v34 = vld [vmem:[#allocation4 + $0x1c] sm:$0xf]  ;;  %v459_v12 = vmul.u32 2, %v2533_v50 }
 0x5e5   : > { %v458_v13 = vadd.s32 16, %v456_v11  ;;  %v2386_v50 = vmov 1.0|1.0  }
 0x5e6   : > { %1694 = vmatpush.bf16.msra.mxu1 %v2215_v17  ;;  %1707 = vmatpush.bf16.msra.mxu2 %v2219_v18  ;;  %v460_v15 = vadd.s32 1, %v459_v12  ;;  %v472_v16 = vadd.s32 2, %v459_v12  ;;  %v2385_v17 = vmov 0.0  }
 0x5e7   : > { %1721 = vmatpush.bf16.msra.mxu3 %v2211_v20  ;;  %v1443_v22 = vpop.permute.xlu1 %1442 }
 0x5e8   : > { %v1445_v25 = vrot.slane %v1443_v22, 4  ;;  %1451 = vst.msk [vmem:[#allocation4 + $0x8] sm:$0xf] %vm825_vm4, %v1443_v22  ;;  %v1459_v23 = vpop.permute.xlu0 %1458  ;;  %v457_v22 = vadd.s32 8, %v456_v11  ;;  %vm461_vm14 = vcmp.eq.s32.totalorder %v456_v11, %v460_v15  ;;  %vm473_vm7 = vcmp.eq.s32.totalorder %v456_v11, %v472_v16 }
 0x5e9   : > { %v1461_v27 = vrot.slane %v1459_v23, 4  ;;  %1467 = vst.msk [vmem:[#allocation4 + $0x14] sm:$0xf] %vm825_vm4, %v1459_v23  ;;  %vm463_vm4 = vcmp.eq.s32.totalorder %v458_v13, %v460_v15 }
 0x5ea   : > { %v1446_v28 = vsel %vm497_vm1, %v1444_v24, %v1445_v25  ;;  %v2055_v18 = vsel %vm463_vm4, 1.0, %v2385_v17  ;;  %vm462_vm0 = vcmp.eq.s32.totalorder %v457_v22, %v460_v15  ;;  %vm474_vm3 = vcmp.eq.s32.totalorder %v457_v22, %v472_v16 }
 0x5eb   : > { %v1447_v31 = vsel %vm2863_vm15, %v1441_v55, %v1446_v28  ;;  %v1462_v32 = vsel %vm497_vm1, %v1460_v26, %v1461_v27  ;;  %v2303_v33 = vld [vmem:[#allocation4 + $0x20] sm:$0xf0]  ;;  %v2204_v30 = vld [vmem:[#allocation4 + $0x24] sm:$0xf0]  ;;  %vm1740_vm1 = vcmask 142336   ;;  %v471_v20 = vpack.c.bf16 %v2055_v18, %v2055_v18  ;;  %vm2255_vm6 = vmpackc.low %vm462_vm0, %vm461_vm14 }
 0x5ec   : > { %1450 = vst [vmem:[#allocation4] sm:$0xff] %v1447_v31  ;;  %v1463_v35 = vsel %vm2864_vm2, %v1457_v21, %v1462_v32  ;;  %v2203_v36 = vor.u32 %v2303_v33, %v2202_v29  ;;  %v2207_v37 = vor.u32 %v2302_v34, %v2204_v30  ;;  %vm2261_vm8 = vmpackc.low %vm474_vm3, %vm473_vm7  ;;  %vm1949_vm15 = vcmask 232616  }
 0x5ed   : > { %1466 = vst [vmem:[#allocation4 + $0xc] sm:$0xff] %v1463_v35  ;;  %v1866_v24 = vsel %vm1864_vm11, %v471_v20, 0  ;;  %vm1955_vm2 = vcmask 314616   ;;  %vm1973_vm4 = vcmask 560616   ;;  %vm1991_vm14 = vcmask 806616  }
 0x5ee   : > { %1695 = vmatpush.bf16.msra.mxu1 %v2203_v36  ;;  %1708 = vmatpush.bf16.msra.mxu2 %v2207_v37 }
 0x5ef   : > { %v2198_v38 = vld [vmem:[#allocation4 + $0x8] sm:$0xf]  ;;  %v1603_v53 = vpop.permute.xlu1 %1602  ;;  %1874 = vmatpush.bf16.msrb.mxu0 %v1866_v24 }
 0x5f0   : > { %v2301_v39 = vld [vmem:[#allocation4 + $0x10] sm:$0xf0] }
 0x5f1   : > { %v2199_v40 = vor.u32 %v2301_v39, %v2198_v38 }
 0x5f3   : > { %1722 = vmatpush.bf16.msra.mxu3 %v2199_v40  ;;  %v2190_v42 = vld [vmem:[#allocation4] sm:$0xf]  ;;  %v2299_v43 = vld [vmem:[#allocation4 + $0x4] sm:$0xf]  ;;  %2256 = vmatpush.bf16.msk.msrb.mxu0 %vm2255_vm6, %v2386_v50 }
 0x5f4   : > { %v2300_v44 = vld [vmem:[#allocation4 + $0x8] sm:$0xf0]  ;;  %v2192_v45 = vld [vmem:[#allocation4 + $0xc] sm:$0xf0] }
 0x5f5   : > { %v2191_v46 = vor.u32 %v2300_v44, %v2190_v42  ;;  %v2195_v47 = vor.u32 %v2299_v43, %v2192_v45 }
 0x5f6   : > { %2238 = vmatmul.msk.bf16.vlgmr.msra.gmra.mxu3 %vm1052_vm12, %v1580_v41 }
 0x5f7   : > { %1696 = vmatpush.bf16.msra.mxu1 %v2191_v46  ;;  %1709 = vmatpush.bf16.msra.mxu2 %v2195_v47 }
 0x5fa   : > { %2236 = vmatmul.msk.bf16.vlgmr.msra.gmra.mxu1 %vm1052_vm12, %v1580_v41  ;;  %2237 = vmatmul.msk.bf16.vlgmr.msra.gmra.mxu2 %vm1052_vm12, %v1580_v41  ;;  %vm475_vm12 = vcmp.eq.s32.totalorder %v458_v13, %v472_v16 }
 0x5fb   : > { %v2058_v19 = vsel %vm475_vm12, 1.0, %v2385_v17  ;;  %vm1979_vm12 = vcmask 642616  }
 0x5fc   : > { %v483_v21 = vpack.c.bf16 %v2058_v19, %v2058_v19 }
 0x5fe   : > { %v1898_v25 = vsel %vm1864_vm11, %v483_v21, 0  ;;  %vm1985_vm11 = vcmask 724616  }
 0x5ff   : > { %1906 = vmatpush.bf16.msrb.mxu1 %v1898_v25 }
 0x603   : > { %2262 = vmatpush.bf16.msk.msrb.mxu1 %vm2261_vm8, %v2386_v50 }
 0x677   : > { %v1698_v48 = vpop.f32.mrf.mxu1 }
 0x678   : > { %v1699_v54 = vadd.f32 %v1698_v48, %v1603_v53 }
 0x679   : > { %v1724_v52 = vpop.f32.mrf.mxu3 }
 0x67a   : > { %v1728_v58 = vmax.f32 %v1699_v54, 0.0  ;;  %v1725_v2 = vadd.f32 %v1724_v52, %v1603_v53 }
 0x67c   : > { %v1730_v3 = vmax.f32 %v1725_v2, 0.0 }
 0x67d   : > { %v1711_v6 = vpop.f32.mrf.mxu2 }
 0x67e   : > { %v1712_v51 = vadd.f32 %v1711_v6, %v1603_v53  ;;  %v1732_v7 = vpack.c.bf16 %v1730_v3, %v1730_v3 }
 0x67f   : > { %v1700_v57 = vpop.f32.mrf.mxu1 }
 0x680   : > { %v1729_v60 = vmax.f32 %v1712_v51, 0.0  ;;  %v1815_v9 = vunpack.c.l.bf16 %v1732_v7 }
 0x681   : > { %v1726_v56 = vpop.f32.mrf.mxu3 }
 0x682   : > { %v1731_v59 = vpack.c.bf16 %v1729_v60, %v1728_v58 }
 0x684   : > { %v1751_v61 = vunpack.c.h.bf16 %v1731_v59  ;;  %v1733_v62 = vunpack.c.l.bf16 %v1731_v59 }
 0x685   : > { %v1713_v63 = vpop.f32.mrf.mxu2 }
 0x686   : > { %1753 = vrot.lane.b32.xlu0 %v1751_v61, %s2368_s19  ;;  %1735 = vrot.lane.b32.xlu2 %v1733_v62, %s2368_s19  ;;  %s2380_s19 = smov 22  }
 0x6e0   : > { %v1736_v14 = vpop.permute.xlu2 %1735 }
 0x6e1   : > { %v1738_v0 = vmax.f32 %v1733_v62, %v1736_v14 }
 0x6e3   : > { %v1739_v1 = vpack.c.bf16 %v1738_v0, %v1738_v0 }
 0x6e5   : > { %1741 = vst.msk [vmem:[#allocation5] sm:$0xf] %vm1740_vm1, %v1739_v1  ;;  %1747 = vrot.lane.b32.xlu2 %v1739_v1, %s2375_s22  ;;  %1743 = vrot.lane.b32.xlu1 %v1739_v1, %s2365_s16  ;;  %s2381_s16 = smov 20  }
 0x6ed   : > { %1771 = vrot.lane.b32.xlu2 %v1731_v59, %s2376_s23  ;;  %1766 = vrot.lane.b32.xlu1 %v1731_v59, %s2377_s27  ;;  %s330_s27 = scalar_lea.vmem %s2828_s9, %s2052_s21 }
 0x6ee   : > { %339 = vst.msk [vmem:[%s330_s27] sm:$0xf] %vm338_vm13, %v2373_v10 }
 0x6f5   : > { %1806 = vrot.lane.b32.xlu2 %v1731_v59, %s2378_s28  ;;  %1784 = vrot.lane.b32.xlu1 %v1731_v59, %s2379_s29 }
 0x6f8   : > { %v1754_v4 = vpop.permute.xlu0 %1753 }
 0x6f9   : > { %v1756_v5 = vsel %vm2865_vm10, %v1736_v14, %v1754_v4  ;;  %vm1967_vm10 = vcmask 478616  }
 0x6fa   : > { %v1758_v55 = vmax.f32 %v1733_v62, %v1756_v5 }
 0x6fc   : > { %v1759_v8 = vpack.c.bf16 %v1758_v55, %v1758_v55 }
 0x6fd   : > { %1808 = vrot.lane.b32.xlu2 %v1732_v7, %s2378_s28  ;;  %1797 = vrot.lane.b32.xlu1 %v1731_v59, %s2380_s19 }
 0x6fe   : > { %1761 = vrot.lane.b32.xlu0 %v1759_v8, %s2381_s16 }
 0x706   : > { %1779 = vrot.lane.b32.xlu0 %v1731_v59, %s2382_s11 }
 0x70e   : > { %1792 = vrot.lane.b32.xlu0 %v1731_v59, %s2383_s12 }
 0x716   : > { %1817 = vrot.lane.b32.xlu0 %v1815_v9, %s2384_s13 }
 0x73f   : > { %v1748_v49 = vpop.permute.xlu2 %1747 }
 0x740   : > { %1750 = vst.msk [vmem:[#allocation5 + $0x8] sm:$0xf] %vm1740_vm1, %v1748_v49 }
 0x747   : > { %v1772_v26 = vpop.permute.xlu2 %1771 }
 0x748   : > { %v1773_v27 = vrot.slane %v1772_v26, 4 }
 0x74a   : > { %v1775_v32 = vunpack.c.l.bf16 %v1773_v27 }
 0x74f   : > { %v1807_v37 = vpop.permute.xlu2 %1806 }
 0x750   : > { %v1810_v54 = vrot.slane %v1807_v37, 4 }
 0x757   : > { %v1744_v23 = vpop.permute.xlu1 %1743  ;;  %v1809_v52 = vpop.permute.xlu2 %1808 }
 0x758   : > { %1746 = vst.msk [vmem:[#allocation5 + $0x4] sm:$0xf] %vm1740_vm1, %v1744_v23  ;;  %v1812_v57 = vsel %vm1811_vm9, %v1810_v54, %v1809_v52 }
 0x759   : > { %v1814_v60 = vunpack.c.l.bf16 %v1812_v57 }
 0x75f   : > { %v1767_v28 = vpop.permute.xlu1 %1766  ;;  %v2311_v29 = vld [vmem:[#allocation5] sm:$0xff] }
 0x760   : > { %v1768_v31 = vrot.slane %v1767_v28, 4  ;;  %2257 = vmatmul.msk.bf16.vlgmr.msrb.gmra.mxu0 %vm1851_vm5, %v2311_v29  ;;  %2263 = vmatmul.msk.bf16.vlgmr.msrb.gmra.mxu1 %vm1851_vm5, %v2311_v29 }
 0x762   : > { %v1770_v33 = vunpack.c.l.bf16 %v1768_v31 }
 0x764   : > { %v1776_v34 = vmax.f32 %v1770_v33, %v1775_v32 }
 0x766   : > { %v1777_v30 = vpack.c.bf16 %v1776_v34, %v1776_v34 }
 0x767   : > { %v1785_v36 = vpop.permute.xlu1 %1784 }
 0x768   : > { %1778 = vst.msk [vmem:[#allocation5 + $0x10] sm:$0xf] %vm1740_vm1, %v1777_v30  ;;  %v1786_v38 = vrot.slane %v1785_v36, 4 }
 0x76a   : > { %v1788_v42 = vunpack.c.l.bf16 %v1786_v38 }
 0x76f   : > { %v1798_v44 = vpop.permute.xlu1 %1797 }
 0x770   : > { %v1762_v35 = vpop.permute.xlu0 %1761  ;;  %v1799_v46 = vrot.slane %v1798_v44, 4 }
 0x771   : > { %1764 = vst.msk [vmem:[#allocation5 + $0xc] sm:$0xf] %vm1740_vm1, %v1762_v35 }
 0x772   : > { %v1801_v6 = vunpack.c.l.bf16 %v1799_v46 }
 0x778   : > { %v1780_v39 = vpop.permute.xlu0 %1779  ;;  %v2312_v40 = vld [vmem:[#allocation5 + $0x8] sm:$0xff] }
 0x779   : > { %v1781_v41 = vrot.slane %v1780_v39, 4  ;;  %2258 = vmatmul.msk.bf16.gmra.mxu0 %vm1851_vm5, %v2312_v40  ;;  %2264 = vmatmul.msk.bf16.gmra.mxu1 %vm1851_vm5, %v2312_v40 }
 0x77b   : > { %v1783_v43 = vunpack.c.l.bf16 %v1781_v41 }
 0x77d   : > { %v1789_v45 = vmax.f32 %v1783_v43, %v1788_v42 }
 0x77f   : > { %v1790_v47 = vpack.c.bf16 %v1789_v45, %v1789_v45 }
 0x780   : > { %v1793_v48 = vpop.permute.xlu0 %1792 }
 0x781   : > { %1791 = vst.msk [vmem:[#allocation5 + $0x14] sm:$0xf] %vm1740_vm1, %v1790_v47  ;;  %v1794_v53 = vrot.slane %v1793_v48, 4 }
 0x783   : > { %v1796_v51 = vunpack.c.l.bf16 %v1794_v53 }
 0x785   : > { %v1802_v58 = vmax.f32 %v1796_v51, %v1801_v6 }
 0x787   : > { %v1803_v56 = vpack.c.bf16 %v1802_v58, %v1802_v58 }
 0x788   : > { %v1818_v59 = vpop.permute.xlu0 %1817  ;;  %v2313_v61 = vld [vmem:[#allocation5 + $0x10] sm:$0xff] }
 0x789   : > { %1804 = vst.msk [vmem:[#allocation5 + $0x18] sm:$0xf] %vm1740_vm1, %v1803_v56  ;;  %v1820_v62 = vmax.f32 %v1814_v60, %v1818_v59  ;;  %2259 = vmatmul.msk.bf16.gmra.mxu0 %vm1851_vm5, %v2313_v61  ;;  %2265 = vmatmul.msk.bf16.gmra.mxu1 %vm1851_vm5, %v2313_v61 }
 0x78b   : > { %v1821_v63 = vpack.c.bf16 %v1820_v62, %v1820_v62 }
 0x78d   : > { %1822 = vst.msk [vmem:[#allocation5 + $0x1c] sm:$0xf] %vm1740_vm1, %v1821_v63  ;;  %vm1961_vm1 = vcmask 396616  }
 0x794   : > { %v2314_v14 = vld [vmem:[#allocation5 + $0x18] sm:$0xff] }
 0x799   : > { %2260 = vmatmul.msk.bf16.gmra.mxu0 %vm1851_vm5, %v2314_v14  ;;  %2266 = vmatmul.msk.bf16.gmra.mxu1 %vm1851_vm5, %v2314_v14 }
 0x7dd   : > { %v1877_v0 = vpop.f32.mrf.mxu0  ;;  %v1909_v1 = vpop.f32.mrf.mxu1 }
 0x7de   : > { %v1929_v2 = vmax.f32 %v1877_v0, %v1909_v1 }
 0x7e0   : > { %v1937_v3 = vpack.c.bf16 %v1929_v2, %v1929_v2 }
 0x7e2   : > { %1946 = vrot.lane.b32.xlu1 %v1937_v3, %s2387_s14 }
 0x7e5   : > { %v1879_v4 = vpop.f32.mrf.mxu0  ;;  %v1911_v5 = vpop.f32.mrf.mxu1 }
 0x7e6   : > { %v1930_v55 = vmax.f32 %v1879_v4, %v1911_v5 }
 0x7e8   : > { %v1938_v7 = vpack.c.bf16 %v1930_v55, %v1930_v55 }
 0x7ea   : > { %1952 = vrot.lane.b32.xlu2 %v1938_v7, %s2388_s24 }
 0x7f6   : > { %v1882_v8 = vpop.f32.mrf.mxu0  ;;  %v1914_v9 = vpop.f32.mrf.mxu1 }
 0x7f7   : > { %v1931_v11 = vmax.f32 %v1882_v8, %v1914_v9 }
 0x7f9   : > { %v1939_v12 = vpack.c.bf16 %v1931_v11, %v1931_v11 }
 0x7fb   : > { %1958 = vrot.lane.b32.xlu0 %v1939_v12, %s2389_s25 }
 0x7fe   : > { %v1884_v13 = vpop.f32.mrf.mxu0  ;;  %v1916_v15 = vpop.f32.mrf.mxu1 }
 0x7ff   : > { %v1932_v16 = vmax.f32 %v1884_v13, %v1916_v15 }
 0x801   : > { %v1940_v17 = vpack.c.bf16 %v1932_v16, %v1932_v16 }
 0x803   : > { %1964 = vrot.lane.b32.xlu1 %v1940_v17, %s2390_s26 }
 0x806   : > { %v1887_v18 = vpop.f32.mrf.mxu0  ;;  %v1919_v19 = vpop.f32.mrf.mxu1 }
 0x807   : > { %v1933_v20 = vmax.f32 %v1887_v18, %v1919_v19 }
 0x809   : > { %v1941_v21 = vpack.c.bf16 %v1933_v20, %v1933_v20 }
 0x80b   : > { %1970 = vrot.lane.b32.xlu2 %v1941_v21, %s2391_s18 }
 0x80e   : > { %v1889_v22 = vpop.f32.mrf.mxu0  ;;  %v1921_v24 = vpop.f32.mrf.mxu1 }
 0x80f   : > { %v1934_v25 = vmax.f32 %v1889_v22, %v1921_v24 }
 0x811   : > { %v1942_v49 = vpack.c.bf16 %v1934_v25, %v1934_v25 }
 0x813   : > { %1976 = vrot.lane.b32.xlu0 %v1942_v49, %s2392_s20 }
 0x816   : > { %v1892_v50 = vpop.f32.mrf.mxu0  ;;  %v1924_v23 = vpop.f32.mrf.mxu1 }
 0x817   : > { %v1935_v26 = vmax.f32 %v1892_v50, %v1924_v23 }
 0x819   : > { %v1943_v27 = vpack.c.bf16 %v1935_v26, %v1935_v26 }
 0x81b   : > { %1982 = vrot.lane.b32.xlu1 %v1943_v27, %s2393_s15 }
 0x81e   : > { %v1894_v28 = vpop.f32.mrf.mxu0  ;;  %v1926_v29 = vpop.f32.mrf.mxu1 }
 0x81f   : > { %v1936_v31 = vmax.f32 %v1894_v28, %v1926_v29 }
 0x821   : > { %v1944_v32 = vpack.c.bf16 %v1936_v31, %v1936_v31 }
 0x823   : > { %1988 = vrot.lane.b32.xlu2 %v1944_v32, %s2366_s17 }
 0x844   : > { %v1953_v34 = vpop.permute.xlu2 %1952 }
 0x854   : > { %v1947_v33 = vpop.permute.xlu1 %1946 }
 0x855   : > { %1950 = vst.msk [vmem:[%s330_s27] sm:$0xf] %vm1949_vm15, %v1947_v33 }
 0x856   : > { %1956 = vst.msk [vmem:[%s330_s27] sm:$0xf] %vm1955_vm2, %v1953_v34 }
 0x865   : > { %v1971_v36 = vpop.permute.xlu2 %1970 }
 0x86d   : > { %v1959_v30 = vpop.permute.xlu0 %1958 }
 0x86e   : > { %1962 = vst.msk [vmem:[%s330_s27] sm:$0xf] %vm1961_vm1, %v1959_v30 }
 0x875   : > { %v1965_v35 = vpop.permute.xlu1 %1964 }
 0x876   : > { %1968 = vst.msk [vmem:[%s330_s27] sm:$0xf] %vm1967_vm10, %v1965_v35 }
 0x877   : > { %1974 = vst.msk [vmem:[%s330_s27] sm:$0xf] %vm1973_vm4, %v1971_v36 }
 0x87d   : > { %v1989_v38 = vpop.permute.xlu2 %1988 }
 0x885   : > { %v1977_v37 = vpop.permute.xlu0 %1976 }
 0x886   : > { %1980 = vst.msk [vmem:[%s330_s27] sm:$0xf] %vm1979_vm12, %v1977_v37 }
 0x88d   : > { %v1983_v10 = vpop.permute.xlu1 %1982 }
 0x88e   : > { %1986 = vst.msk [vmem:[%s330_s27] sm:$0xf] %vm1985_vm11, %v1983_v10 }
 0x88f   : > { %1992 = vst.msk [vmem:[%s330_s27] sm:$0xf] %vm1991_vm14, %v1989_v38 }
 0x890 PF: > { %s19_s30 = sadd.s32 1, %s2362_s30  }
 0x891   : > { %p16_p4 = scmp.ge.s32.totalorder %s19_s30, 4  }
 0x893   :  { %18 = sbr.rel (!%p16_p4) target bundleno = 1 (0x1), region = 90 }

</bundles_post_ra>
